<compile_context>
chip_gen: v6e
topology: v6e:2x2x1
jax: 0.10.0
libtpu: 0.0.40
codegen_flags: <defaults>
</compile_context>

<pallas_src>
import math

import jax
import jax.numpy as jnp
import numpy as np
from jax.experimental import pallas as pl
from jax.experimental.pallas import tpu as pltpu


# ----------------------------- Pallas kernel --------------------------------

def _make_fused_gcn_kernel(B: int, N: int):
    """Kernel: 3 fused GraphConv layers + fused classifier, whole batch."""

    def kernel(x_ref, a_ref, w1_ref, b1_ref, w2_ref, b2_ref, w3_ref, b3_ref,
               wc_ref, bc_ref, out_ref):
        # x_ref : (B*N, F_in)   rows ordered b*N + n
        # a_ref : (B*N, B*N)    block-diagonal normalized adjacency
        # w*_ref: (F_in, F_out) (transposed vs torch Linear.weight), b*: (1, F_out)
        # wc_ref: (N, H3, C)    classifier weight reshaped, bc_ref: (1, C)
        # out_ref: (B, C)       logits
        h = x_ref[...]
        a = a_ref[...]

        # layer 1: relu(adj @ (h @ W1 + b1)) -- batch stacked into rows (M=128).
        h = jnp.dot(h, w1_ref[...], preferred_element_type=jnp.float32) + b1_ref[...]
        h = jnp.maximum(jnp.dot(a, h, preferred_element_type=jnp.float32), 0.0)
        # layer 2
        h = jnp.dot(h, w2_ref[...], preferred_element_type=jnp.float32) + b2_ref[...]
        h = jnp.maximum(jnp.dot(a, h, preferred_element_type=jnp.float32), 0.0)
        # layer 3
        h = jnp.dot(h, w3_ref[...], preferred_element_type=jnp.float32) + b3_ref[...]
        h = jnp.maximum(jnp.dot(a, h, preferred_element_type=jnp.float32), 0.0)
        # h: (B*N, H3)

        # Fused classifier:
        #   logits[b, c] = sum_{n,f} h[b*N+n, f] * wc[n, f, c] + bc[c]
        # (broadcast-multiply-reduce; avoids an in-kernel (128,16)->(2,1024)
        #  lane reshape while keeping C in the lane dimension throughout).
        wc = wc_ref[...]                                       # (N, H3, C)
        rows = []
        for b in range(B):                                     # B static -> unrolled
            hb = h[b * N:(b + 1) * N, :]                       # (N, H3) static slice
            prod = hb[:, :, None] * wc                         # (N, H3, C)
            red = jnp.sum(prod, axis=(0, 1), keepdims=True)    # (1, 1, C)
            rows.append(red[0])                                # (1, C)
        out_ref[...] = jnp.concatenate(rows, axis=0) + bc_ref[...]

    return kernel


# ------------------------------ Wrapper --------------------------------------

def fused_gcn_classifier(x_nodes, adj_blk, params, num_nodes):
    """x_nodes: (B*N, F_in), adj_blk: (B*N, B*N) -> logits (B, num_classes)."""
    BN, Fin = x_nodes.shape
    N = num_nodes
    B = BN // N
    H1 = params["w1"].shape[1]
    H3 = params["w3"].shape[1]
    C = params["wc"].shape[1]
    wc_r = params["wc"].reshape(N, H3, C)   # free layout change, done in XLA

    return pl.pallas_call(
        _make_fused_gcn_kernel(B, N),
        out_shape=jax.ShapeDtypeStruct((B, C), jnp.float32),
        grid=(1,),
        in_specs=[
            pl.BlockSpec((BN, Fin), lambda i: (0, 0)),      # x (stacked nodes)
            pl.BlockSpec((BN, BN), lambda i: (0, 0)),       # block-diag adjacency
            pl.BlockSpec((Fin, H1), lambda i: (0, 0)),      # W1
            pl.BlockSpec((1, H1), lambda i: (0, 0)),        # b1
            pl.BlockSpec((H1, H1), lambda i: (0, 0)),       # W2
            pl.BlockSpec((1, H1), lambda i: (0, 0)),        # b2
            pl.BlockSpec((H1, H3), lambda i: (0, 0)),       # W3
            pl.BlockSpec((1, H3), lambda i: (0, 0)),        # b3
            pl.BlockSpec((N, H3, C), lambda i: (0, 0, 0)),  # Wc reshaped
            pl.BlockSpec((1, C), lambda i: (0, 0)),         # bc
        ],
        out_specs=pl.BlockSpec((B, C), lambda i: (0, 0)),
        compiler_params=pltpu.CompilerParams(dimension_semantics=("arbitrary",)),
    )(x_nodes, adj_blk, params["w1"], params["b1"], params["w2"], params["b2"],
      params["w3"], params["b3"], wc_r, params["bc"])


# ------------------------------ Glue (plain JAX) -----------------------------

def image_to_graph_rows(x, grid_size, patch_size):
    """NCHW image -> (B*N, C*ps*ps) node rows ordered b*N + n (torch unfold+permute)."""
    # TODO(synk): patchification stays a single XLA transpose; it is not a
    # rectangular tile pattern expressible via a BlockSpec index_map.
    B, C, H, W = x.shape
    x = x.reshape(B, C, grid_size, patch_size, grid_size, patch_size)
    x = x.transpose(0, 2, 4, 1, 3, 5)      # (B, gh, gw, C, ph, pw)
    return x.reshape(B * grid_size * grid_size, C * patch_size * patch_size)


def create_grid_adjacency(grid_size):
    n = grid_size * grid_size
    adj = np.zeros((n, n), dtype=np.float32)
    for i in range(grid_size):
        for j in range(grid_size):
            node_id = i * grid_size + j
            adj[node_id, node_id] = 1.0
            for di, dj in [(-1, 0), (1, 0), (0, -1), (0, 1)]:
                ni, nj = i + di, j + dj
                if 0 <= ni < grid_size and 0 <= nj < grid_size:
                    adj[node_id, ni * grid_size + nj] = 1.0
    degree = adj.sum(axis=1)
    with np.errstate(divide="ignore"):
        dinv = np.power(degree, -0.5)
    dinv[np.isinf(dinv)] = 0.0
    norm_adj = dinv[:, None] * adj * dinv[None, :]
    return jnp.asarray(norm_adj, dtype=jnp.float32)


def init_linear(key, fan_in, fan_out):
    """PyTorch-style nn.Linear init; weight stored transposed as (fan_in, fan_out)."""
    kw, kb = jax.random.split(key)
    bound = 1.0 / math.sqrt(fan_in)
    w = jax.random.uniform(kw, (fan_in, fan_out), jnp.float32, -bound, bound)
    b = jax.random.uniform(kb, (1, fan_out), jnp.float32, -bound, bound)
    return w, b


def fp32_gcn_forward(x_img, adj, params, grid_size, patch_size):
    B = x_img.shape[0]
    N = grid_size * grid_size
    x_nodes = image_to_graph_rows(x_img, grid_size, patch_size)   # (B*N, F_in)
    adj_blk = jnp.kron(jnp.eye(B, dtype=adj.dtype), adj)          # (B*N, B*N)
    # F.dropout(..., training=False) and nn.Dropout in eval mode: identity.
    return fused_gcn_classifier(x_nodes, adj_blk, params, N)      # (B, num_classes)


def reference_forward(x_img, adj, params, grid_size, patch_size):
    """Pure-JAX reference (same math as the PyTorch module in eval mode)."""
    B, C, H, W = x_img.shape
    gs, ps = grid_size, patch_size
    xg = x_img.reshape(B, C, gs, ps, gs, ps).transpose(0, 2, 4, 1, 3, 5)
    xg = xg.reshape(B, gs * gs, C * ps * ps)                      # (B, N, F_in)
    h = xg
    for w, b in ((params["w1"], params["b1"]),
                 (params["w2"], params["b2"]),
                 (params["w3"], params["b3"])):
        lin = jnp.einsum("bnf,fg->bng", h, w, precision="highest") + b
        h = jax.nn.relu(jnp.einsum("nm,bmf->bnf", adj, lin, precision="highest"))
    flat = h.reshape(h.shape[0], -1)
    return jnp.dot(flat, params["wc"], precision="highest") + params["bc"]


# --------------------------------- Main --------------------------------------

if __name__ == "__main__":
    # Small shapes consistent with the module: num_nodes=64 -> grid 8x8, patch 4.
    B, C, H, W = 2, 3, 32, 32
    num_nodes = 64
    grid_size = int(math.sqrt(num_nodes))        # 8
    patch_size = 32 // grid_size                 # 4
    node_features = C * patch_size * patch_size  # 48
    hidden_dim = 32
    num_classes = 10

    key = jax.random.PRNGKey(0)
    kx, k1, k2, k3, kc = jax.random.split(key, 5)

    x_img = jax.random.normal(kx, (B, C, H, W), jnp.float32)
    adj = create_grid_adjacency(grid_size)

    w1, b1 = init_linear(k1, node_features, hidden_dim)
    w2, b2 = init_linear(k2, hidden_dim, hidden_dim)
    w3, b3 = init_linear(k3, hidden_dim, hidden_dim // 2)
    wc, bc = init_linear(kc, num_nodes * (hidden_dim // 2), num_classes)
    params = dict(w1=w1, b1=b1, w2=w2, b2=b2, w3=w3, b3=b3, wc=wc, bc=bc)

    fwd = jax.jit(fp32_gcn_forward, static_argnums=(3, 4))
    out = fwd(x_img, adj, params, grid_size, patch_size)
    out = jax.block_until_ready(out)

    ref = reference_forward(x_img, adj, params, grid_size, patch_size)
    assert out.shape == (B, num_classes)
    # f32 MXU multi-pass matmuls vs XLA highest-precision reference.
    assert jnp.allclose(out, ref, atol=1e-3, rtol=1e-3), "mismatch vs reference"

    print("KERNEL_OK")
</pallas_src>

<mosaic_0001>
module attributes {stable_mosaic.version = 11 : i64} {
  func.func @kernel(%arg0: i32, %arg1: memref<128x48xf32, #tpu.memory_space<vmem>>, %arg2: memref<128x128xf32, #tpu.memory_space<vmem>>, %arg3: memref<48x32xf32, #tpu.memory_space<vmem>>, %arg4: memref<1x32xf32, #tpu.memory_space<vmem>>, %arg5: memref<32x32xf32, #tpu.memory_space<vmem>>, %arg6: memref<1x32xf32, #tpu.memory_space<vmem>>, %arg7: memref<32x16xf32, #tpu.memory_space<vmem>>, %arg8: memref<1x16xf32, #tpu.memory_space<vmem>>, %arg9: memref<64x16x10xf32, #tpu.memory_space<vmem>>, %arg10: memref<1x10xf32, #tpu.memory_space<vmem>>, %arg11: memref<2x10xf32, #tpu.memory_space<vmem>>) attributes {dimension_semantics = [#tpu.dimension_semantics<arbitrary>], iteration_bounds = array<i64: 1>, scalar_prefetch = 0 : i64, scratch_operands = 0 : i64, tpu.core_type = #tpu.core_type<tc>, window_params = [{pipeline_mode = #tpu.pipeline_mode<synchronous>, transform_indices = @transform_0, window_bounds = array<i64: 128, 48>}, {pipeline_mode = #tpu.pipeline_mode<synchronous>, transform_indices = @transform_1, window_bounds = array<i64: 128, 128>}, {pipeline_mode = #tpu.pipeline_mode<synchronous>, transform_indices = @transform_2, window_bounds = array<i64: 48, 32>}, {pipeline_mode = #tpu.pipeline_mode<synchronous>, transform_indices = @transform_3, window_bounds = array<i64: 1, 32>}, {pipeline_mode = #tpu.pipeline_mode<synchronous>, transform_indices = @transform_4, window_bounds = array<i64: 32, 32>}, {pipeline_mode = #tpu.pipeline_mode<synchronous>, transform_indices = @transform_5, window_bounds = array<i64: 1, 32>}, {pipeline_mode = #tpu.pipeline_mode<synchronous>, transform_indices = @transform_6, window_bounds = array<i64: 32, 16>}, {pipeline_mode = #tpu.pipeline_mode<synchronous>, transform_indices = @transform_7, window_bounds = array<i64: 1, 16>}, {pipeline_mode = #tpu.pipeline_mode<synchronous>, transform_indices = @transform_8, window_bounds = array<i64: 64, 16, 10>}, {pipeline_mode = #tpu.pipeline_mode<synchronous>, transform_indices = @transform_9, window_bounds = array<i64: 1, 10>}, {pipeline_mode = #tpu.pipeline_mode<synchronous>, transform_indices = @transform_10, window_bounds = array<i64: 2, 10>}]} {
    %c0 = arith.constant 0 : index
    %c0_0 = arith.constant 0 : index
    %0 = vector.load %arg1[%c0, %c0_0] : memref<128x48xf32, #tpu.memory_space<vmem>>, vector<128x48xf32>
    %c0_1 = arith.constant 0 : index
    %c0_2 = arith.constant 0 : index
    %1 = vector.load %arg2[%c0_1, %c0_2] : memref<128x128xf32, #tpu.memory_space<vmem>>, vector<128x128xf32>
    %c0_3 = arith.constant 0 : index
    %c0_4 = arith.constant 0 : index
    %2 = vector.load %arg3[%c0_3, %c0_4] : memref<48x32xf32, #tpu.memory_space<vmem>>, vector<48x32xf32>
    %cst = arith.constant dense<0.000000e+00> : vector<128x32xf32>
    %3 = tpu.matmul %0, %2, %cst {dimension_numbers = #tpu.dot_dimension_numbers<[1], [0], [0], [1], [0, 0, 1, 1], [], []>} : vector<128x48xf32>, vector<48x32xf32>, vector<128x32xf32> -> vector<128x32xf32>
    %c0_5 = arith.constant 0 : index
    %c0_6 = arith.constant 0 : index
    %4 = vector.load %arg4[%c0_5, %c0_6] : memref<1x32xf32, #tpu.memory_space<vmem>>, vector<1x32xf32>
    %5 = vector.broadcast %4 : vector<1x32xf32> to vector<128x32xf32>
    %6 = arith.addf %3, %5 : vector<128x32xf32>
    %cst_7 = arith.constant dense<0.000000e+00> : vector<128x32xf32>
    %7 = tpu.matmul %1, %6, %cst_7 {dimension_numbers = #tpu.dot_dimension_numbers<[1], [0], [0], [1], [0, 0, 1, 1], [], []>} : vector<128x128xf32>, vector<128x32xf32>, vector<128x32xf32> -> vector<128x32xf32>
    %cst_8 = arith.constant 0.000000e+00 : f32
    %8 = vector.broadcast %cst_8 : f32 to vector<128x32xf32>
    %9 = arith.maximumf %7, %8 : vector<128x32xf32>
    %c0_9 = arith.constant 0 : index
    %c0_10 = arith.constant 0 : index
    %10 = vector.load %arg5[%c0_9, %c0_10] : memref<32x32xf32, #tpu.memory_space<vmem>>, vector<32x32xf32>
    %cst_11 = arith.constant dense<0.000000e+00> : vector<128x32xf32>
    %11 = tpu.matmul %9, %10, %cst_11 {dimension_numbers = #tpu.dot_dimension_numbers<[1], [0], [0], [1], [0, 0, 1, 1], [], []>} : vector<128x32xf32>, vector<32x32xf32>, vector<128x32xf32> -> vector<128x32xf32>
    %c0_12 = arith.constant 0 : index
    %c0_13 = arith.constant 0 : index
    %12 = vector.load %arg6[%c0_12, %c0_13] : memref<1x32xf32, #tpu.memory_space<vmem>>, vector<1x32xf32>
    %13 = vector.broadcast %12 : vector<1x32xf32> to vector<128x32xf32>
    %14 = arith.addf %11, %13 : vector<128x32xf32>
    %cst_14 = arith.constant dense<0.000000e+00> : vector<128x32xf32>
    %15 = tpu.matmul %1, %14, %cst_14 {dimension_numbers = #tpu.dot_dimension_numbers<[1], [0], [0], [1], [0, 0, 1, 1], [], []>} : vector<128x128xf32>, vector<128x32xf32>, vector<128x32xf32> -> vector<128x32xf32>
    %cst_15 = arith.constant 0.000000e+00 : f32
    %16 = vector.broadcast %cst_15 : f32 to vector<128x32xf32>
    %17 = arith.maximumf %15, %16 : vector<128x32xf32>
    %c0_16 = arith.constant 0 : index
    %c0_17 = arith.constant 0 : index
    %18 = vector.load %arg7[%c0_16, %c0_17] : memref<32x16xf32, #tpu.memory_space<vmem>>, vector<32x16xf32>
    %cst_18 = arith.constant dense<0.000000e+00> : vector<128x16xf32>
    %19 = tpu.matmul %17, %18, %cst_18 {dimension_numbers = #tpu.dot_dimension_numbers<[1], [0], [0], [1], [0, 0, 1, 1], [], []>} : vector<128x32xf32>, vector<32x16xf32>, vector<128x16xf32> -> vector<128x16xf32>
    %c0_19 = arith.constant 0 : index
    %c0_20 = arith.constant 0 : index
    %20 = vector.load %arg8[%c0_19, %c0_20] : memref<1x16xf32, #tpu.memory_space<vmem>>, vector<1x16xf32>
    %21 = vector.broadcast %20 : vector<1x16xf32> to vector<128x16xf32>
    %22 = arith.addf %19, %21 : vector<128x16xf32>
    %cst_21 = arith.constant dense<0.000000e+00> : vector<128x16xf32>
    %23 = tpu.matmul %1, %22, %cst_21 {dimension_numbers = #tpu.dot_dimension_numbers<[1], [0], [0], [1], [0, 0, 1, 1], [], []>} : vector<128x128xf32>, vector<128x16xf32>, vector<128x16xf32> -> vector<128x16xf32>
    %cst_22 = arith.constant 0.000000e+00 : f32
    %24 = vector.broadcast %cst_22 : f32 to vector<128x16xf32>
    %25 = arith.maximumf %23, %24 : vector<128x16xf32>
    %c0_23 = arith.constant 0 : index
    %c0_24 = arith.constant 0 : index
    %c0_25 = arith.constant 0 : index
    %26 = vector.load %arg9[%c0_23, %c0_24, %c0_25] : memref<64x16x10xf32, #tpu.memory_space<vmem>>, vector<64x16x10xf32>
    %27 = vector.extract_strided_slice %25 {offsets = [0, 0], sizes = [64, 16], strides = [1, 1]} : vector<128x16xf32> to vector<64x16xf32>
    %28 = vector.shape_cast %27 : vector<64x16xf32> to vector<64x16x1xf32>
    %29 = vector.broadcast %28 : vector<64x16x1xf32> to vector<64x16x10xf32>
    %30 = arith.mulf %29, %26 : vector<64x16x10xf32>
    %cst_26 = arith.constant dense<0.000000e+00> : vector<10xf32>
    %31 = vector.multi_reduction <add>, %30, %cst_26 [0, 1] : vector<64x16x10xf32> to vector<10xf32>
    %32 = vector.shape_cast %31 : vector<10xf32> to vector<1x1x10xf32>
    %33 = vector.shape_cast %32 : vector<1x1x10xf32> to vector<1x10xf32>
    %34 = vector.extract_strided_slice %25 {offsets = [64, 0], sizes = [64, 16], strides = [1, 1]} : vector<128x16xf32> to vector<64x16xf32>
    %35 = vector.shape_cast %34 : vector<64x16xf32> to vector<64x16x1xf32>
    %36 = vector.broadcast %35 : vector<64x16x1xf32> to vector<64x16x10xf32>
    %37 = arith.mulf %36, %26 : vector<64x16x10xf32>
    %cst_27 = arith.constant dense<0.000000e+00> : vector<10xf32>
    %38 = vector.multi_reduction <add>, %37, %cst_27 [0, 1] : vector<64x16x10xf32> to vector<10xf32>
    %39 = vector.shape_cast %38 : vector<10xf32> to vector<1x1x10xf32>
    %40 = vector.shape_cast %39 : vector<1x1x10xf32> to vector<1x10xf32>
    %41 = tpu.concatenate %33, %40 in 0 : vector<1x10xf32>, vector<1x10xf32> -> vector<2x10xf32>
    %c0_28 = arith.constant 0 : index
    %c0_29 = arith.constant 0 : index
    %42 = vector.load %arg10[%c0_28, %c0_29] : memref<1x10xf32, #tpu.memory_space<vmem>>, vector<1x10xf32>
    %43 = vector.broadcast %42 : vector<1x10xf32> to vector<2x10xf32>
    %44 = arith.addf %41, %43 : vector<2x10xf32>
    %c0_30 = arith.constant 0 : index
    %c0_31 = arith.constant 0 : index
    %45 = vector.load %arg11[%c0_30, %c0_31] : memref<2x10xf32, #tpu.memory_space<vmem>>, vector<2x10xf32>
    tpu.vector_store %arg11[%c0_30, %c0_31], %44 {strides = array<i32>} : memref<2x10xf32, #tpu.memory_space<vmem>>, vector<2x10xf32>,
    return
  }
  func.func @transform_0(%arg0: i32) -> (i32, i32) {
    %c0_i32 = arith.constant 0 : i32
    %c0_i32_0 = arith.constant 0 : i32
    %c0_i32_1 = arith.constant 0 : i32
    return %c0_i32, %c0_i32_0 : i32, i32
  }
  func.func @transform_1(%arg0: i32) -> (i32, i32) {
    %c0_i32 = arith.constant 0 : i32
    %c0_i32_0 = arith.constant 0 : i32
    %c0_i32_1 = arith.constant 0 : i32
    return %c0_i32, %c0_i32_0 : i32, i32
  }
  func.func @transform_2(%arg0: i32) -> (i32, i32) {
    %c0_i32 = arith.constant 0 : i32
    %c0_i32_0 = arith.constant 0 : i32
    %c0_i32_1 = arith.constant 0 : i32
    return %c0_i32, %c0_i32_0 : i32, i32
  }
  func.func @transform_3(%arg0: i32) -> (i32, i32) {
    %c0_i32 = arith.constant 0 : i32
    %c0_i32_0 = arith.constant 0 : i32
    %c0_i32_1 = arith.constant 0 : i32
    return %c0_i32, %c0_i32_0 : i32, i32
  }
  func.func @transform_4(%arg0: i32) -> (i32, i32) {
    %c0_i32 = arith.constant 0 : i32
    %c0_i32_0 = arith.constant 0 : i32
    %c0_i32_1 = arith.constant 0 : i32
    return %c0_i32, %c0_i32_0 : i32, i32
  }
  func.func @transform_5(%arg0: i32) -> (i32, i32) {
    %c0_i32 = arith.constant 0 : i32
    %c0_i32_0 = arith.constant 0 : i32
    %c0_i32_1 = arith.constant 0 : i32
    return %c0_i32, %c0_i32_0 : i32, i32
  }
  func.func @transform_6(%arg0: i32) -> (i32, i32) {
    %c0_i32 = arith.constant 0 : i32
    %c0_i32_0 = arith.constant 0 : i32
    %c0_i32_1 = arith.constant 0 : i32
    return %c0_i32, %c0_i32_0 : i32, i32
  }
  func.func @transform_7(%arg0: i32) -> (i32, i32) {
    %c0_i32 = arith.constant 0 : i32
    %c0_i32_0 = arith.constant 0 : i32
    %c0_i32_1 = arith.constant 0 : i32
    return %c0_i32, %c0_i32_0 : i32, i32
  }
  func.func @transform_8(%arg0: i32) -> (i32, i32, i32) {
    %c0_i32 = arith.constant 0 : i32
    %c0_i32_0 = arith.constant 0 : i32
    %c0_i32_1 = arith.constant 0 : i32
    %c0_i32_2 = arith.constant 0 : i32
    return %c0_i32, %c0_i32_0, %c0_i32_1 : i32, i32, i32
  }
  func.func @transform_9(%arg0: i32) -> (i32, i32) {
    %c0_i32 = arith.constant 0 : i32
    %c0_i32_0 = arith.constant 0 : i32
    %c0_i32_1 = arith.constant 0 : i32
    return %c0_i32, %c0_i32_0 : i32, i32
  }
  func.func @transform_10(%arg0: i32) -> (i32, i32) {
    %c0_i32 = arith.constant 0 : i32
    %c0_i32_0 = arith.constant 0 : i32
    %c0_i32_1 = arith.constant 0 : i32
    return %c0_i32, %c0_i32_0 : i32, i32
  }
}

</mosaic_0001>

<bundles_post_ra>
// kernel: fp32_gcn_forward.1
= control target key start
LH: loop header
LB: loop body
LE: loop exit
PB: predicated region body
PF: predicated region fallthrough
CT: control target
= control target key end

     0   :  { %vm81_vm0 = vcmask 392192   ;;  %s6426_s0 = inlined_call_operand.vmem [shape: f32[128,48], index: 0, kind: input, shape index: {}]   ;;  %s6427_s1 = inlined_call_operand.vmem [shape: f32[128,128], index: 1, kind: input, shape index: {}]   ;;  %s6428_s2 = inlined_call_operand.vmem [shape: f32[48,32], index: 2, kind: input, shape index: {}]   ;;  %s6429_s3 = inlined_call_operand.vmem [shape: f32[1,32], index: 3, kind: input, shape index: {}]   ;;  %s6430_s4 = inlined_call_operand.vmem [shape: f32[32,32], index: 4, kind: input, shape index: {}]   ;;  %s6431_s5 = inlined_call_operand.vmem [shape: f32[1,32], index: 5, kind: input, shape index: {}]   ;;  %s6432_s6 = inlined_call_operand.vmem [shape: f32[32,16], index: 6, kind: input, shape index: {}]   ;;  %s6433_s7 = inlined_call_operand.vmem [shape: f32[1,16], index: 7, kind: input, shape index: {}]   ;;  %s6434_s8 = inlined_call_operand.vmem [shape: f32[64,16,10], index: 8, kind: input, shape index: {}]   ;;  %s6435_s9 = inlined_call_operand.vmem [shape: f32[1,10], index: 9, kind: input, shape index: {}]   ;;  %s6436_s10 = inlined_call_operand.hbm [shape: f32[2,10], index: 10, kind: output, shape index: {}]  }
   0x1   :  { %v73_v0 = vld [vmem:[%s6428_s2 + $0x28] sm:$0xff]  ;;  %v72_v1 = vld [vmem:[%s6428_s2 + $0x20] sm:$0xff]  ;;  %v71_v2 = vld [vmem:[%s6428_s2 + $0x18] sm:$0xff] }
   0x2   :  { %3718 = vmatprep.subr.mxu0 %v73_v0  ;;  %v36_v3 = vld [vmem:[%s6426_s0] sm:$0xff]  ;;  %v70_v4 = vld [vmem:[%s6428_s2 + $0x10] sm:$0xff]  ;;  %v69_v5 = vld [vmem:[%s6428_s2 + $0x8] sm:$0xff] }
   0x3   :  { %3719 = vmatpush3.msra.mxu0 %v73_v0  ;;  %3730 = vmatprep.mubr.msk.f32.mxu0 %vm81_vm0, %v36_v3 }
   0x4   :  { %3720 = vmatprep.subr.mxu0 %v72_v1 }
   0x5   :  { %3721 = vmatpush3.msra.mxu0 %v72_v1 }
   0x6   :  { %3722 = vmatprep.subr.mxu0 %v71_v2 }
   0x7   :  { %3723 = vmatpush3.msra.mxu0 %v71_v2 }
   0x8   :  { %3724 = vmatprep.subr.mxu0 %v70_v4 }
   0x9   :  { %15 = vsyncpa [#allocation3], 0  ;;  %3725 = vmatpush3.msra.mxu0 %v70_v4  ;;  %v68_v6 = vld [vmem:[%s6428_s2] sm:$0xff]  ;;  %v37_v7 = vld [vmem:[%s6426_s0 + $0x8] sm:$0xff]  ;;  %vm447_vm1 = vcmask 261120   ;;  %vm2127_vm2 = vcmask 80896  }
   0xa   :  { %3726 = vmatprep.subr.mxu0 %v69_v5  ;;  %v38_v8 = vld [vmem:[%s6426_s0 + $0x10] sm:$0xff]  ;;  %v39_v9 = vld [vmem:[%s6426_s0 + $0x18] sm:$0xff]  ;;  %v40_v10 = vld [vmem:[%s6426_s0 + $0x20] sm:$0xff]  ;;  %vm3482_vm3 = vcmask 1040384   ;;  %s4119_s13 = smov [#allocation2]   ;;  %vm3492_vm4 = vcmask 74752  }
   0xb   :  { %3727 = vmatpush3.msra.mxu0 %v69_v5  ;;  %v41_v11 = vld [vmem:[%s6426_s0 + $0x28] sm:$0xff]  ;;  %v42_v12 = vld [vmem:[%s6426_s0 + $0x30] sm:$0xff]  ;;  %v43_v13 = vld [vmem:[%s6426_s0 + $0x38] sm:$0xff]  ;;  %s3500_s14 = sshll.u32 %s4119_s13, 4  ;;  %s3501_s14 = int_to_ptr.vmem [resolvable:$true] %s3500_s14 }
   0xc   :  { %3728 = vmatprep.subr.mxu0 %v68_v6  ;;  %v44_v14 = vld [vmem:[%s6426_s0 + $0x40] sm:$0xff]  ;;  %v45_v15 = vld [vmem:[%s6426_s0 + $0x48] sm:$0xff]  ;;  %v46_v16 = vld [vmem:[%s6426_s0 + $0x50] sm:$0xff]  ;;  %s4097_s15 = scalar_lea.vmem %s3501_s14, 32  ;;  %p4102_p1 = scmp.lt.s32.totalorder %s3501_s14, %s3501_s14 }
   0xd   :  { %3729 = vmatpush3.msra.mxu0 %v68_v6  ;;  %v47_v17 = vld [vmem:[%s6426_s0 + $0x58] sm:$0xff]  ;;  %v48_v18 = vld [vmem:[%s6426_s0 + $0x60] sm:$0xff]  ;;  %v49_v19 = vld [vmem:[%s6426_s0 + $0x68] sm:$0xff]  ;;  %p4098_p0 = scmp.ne.s32.totalorder %s3501_s14, %s4097_s15  ;;  %p4103_p2 = scmp.lt.s32.totalorder %s4097_s15, %s4097_s15 }
   0xe   :  { %3731 = vmatmul.mubr.msk.f32.vlgmr.msra.gmra.mxu0 %vm81_vm0, %v37_v7  ;;  %v50_v20 = vld [vmem:[%s6426_s0 + $0x70] sm:$0xff]  ;;  %v51_v21 = vld [vmem:[%s6426_s0 + $0x78] sm:$0xff]  ;;  %v4260_v22 = vld [vmem:[%s6427_s1] sm:$0xff] }
   0xf   :  { %3733 = vmatprep.mubr.msk.f32.mxu0 %vm81_vm0, %v38_v8  ;;  %3786 = vmatprep.mubr.f32.mxu1 %v4260_v22  ;;  %v439_v23 = vld [vmem:[%s6430_s4 + $0x18] sm:$0xff]  ;;  %v438_v24 = vld [vmem:[%s6430_s4 + $0x10] sm:$0xff]  ;;  %v437_v25 = vld [vmem:[%s6430_s4 + $0x8] sm:$0xff]  ;;  %p4104_p3 = por %p4103_p2, %p4102_p1 }
  0x10   :  { %3810 = vmatprep.subr.mxu0 %v439_v23  ;;  %v436_v26 = vld [vmem:[%s6430_s4] sm:$0xff]  ;;  %v4281_v60 = vld [vmem:[%s6427_s1 + $0x8] sm:$0xff]  ;;  %v4286_v61 = vld [vmem:[%s6427_s1 + $0x10] sm:$0xff] }
  0x11   :  { %3811 = vmatpush3.msra.mxu0 %v439_v23  ;;  %v3508_v41 = vld [vmem:[%s6429_s3] ss:$0 sm:$0xff]  ;;  %v4293_v62 = vld [vmem:[%s6427_s1 + $0x18] sm:$0xff]  ;;  %v4305_v0 = vld [vmem:[%s6427_s1 + $0x28] sm:$0xff]  ;;  %p4105_p4 = pnand %p4104_p3, %p4098_p0 }
  0x12   :  { %3734 = vmatmul.mubr.msk.f32.gmra.mxu0 %vm81_vm0, %v39_v9  ;;  %3812 = vmatprep.subr.mxu0 %v438_v24  ;;  %v4298_v63 = vld [vmem:[%s6427_s1 + $0x20] sm:$0xff]  ;;  %v4310_v1 = vld [vmem:[%s6427_s1 + $0x30] sm:$0xff]  ;;  %v4317_v2 = vld [vmem:[%s6427_s1 + $0x38] sm:$0xff] }
  0x13   :  { %3736 = vmatprep.mubr.msk.f32.mxu0 %vm81_vm0, %v40_v10  ;;  %3813 = vmatpush3.msra.mxu0 %v438_v24  ;;  %v4322_v3 = vld [vmem:[%s6427_s1 + $0x40] sm:$0xff]  ;;  %v4329_v4 = vld [vmem:[%s6427_s1 + $0x48] sm:$0xff]  ;;  %v4334_v5 = vld [vmem:[%s6427_s1 + $0x50] sm:$0xff] }
  0x14   :  { %3814 = vmatprep.subr.mxu0 %v437_v25  ;;  %v4341_v6 = vld [vmem:[%s6427_s1 + $0x58] sm:$0xff]  ;;  %v4346_v7 = vld [vmem:[%s6427_s1 + $0x60] sm:$0xff]  ;;  %v4353_v8 = vld [vmem:[%s6427_s1 + $0x68] sm:$0xff] }
  0x15   :  { %3815 = vmatpush3.msra.mxu0 %v437_v25  ;;  %v4358_v9 = vld [vmem:[%s6427_s1 + $0x70] sm:$0xff]  ;;  %v4365_v10 = vld [vmem:[%s6427_s1 + $0x78] sm:$0xff] }
  0x16   :  { %3737 = vmatmul.mubr.msk.f32.gmra.mxu0 %vm81_vm0, %v41_v11  ;;  %3816 = vmatprep.subr.mxu0 %v436_v26 }
  0x17   :  { %3739 = vmatprep.mubr.msk.f32.mxu0 %vm81_vm0, %v42_v12  ;;  %3817 = vmatpush3.msra.mxu0 %v436_v26 }
  0x1a   :  { %3740 = vmatmul.mubr.msk.f32.gmra.mxu0 %vm81_vm0, %v43_v13 }
  0x1b   :  { %3742 = vmatprep.mubr.msk.f32.mxu0 %vm81_vm0, %v44_v14 }
  0x1e   :  { %3743 = vmatmul.mubr.msk.f32.gmra.mxu0 %vm81_vm0, %v45_v15 }
  0x1f   :  { %3745 = vmatprep.mubr.msk.f32.mxu0 %vm81_vm0, %v46_v16 }
  0x22   :  { %3746 = vmatmul.mubr.msk.f32.gmra.mxu0 %vm81_vm0, %v47_v17 }
  0x23   :  { %3748 = vmatprep.mubr.msk.f32.mxu0 %vm81_vm0, %v48_v18 }
  0x26   :  { %3749 = vmatmul.mubr.msk.f32.gmra.mxu0 %vm81_vm0, %v49_v19 }
  0x27   :  { %3751 = vmatprep.mubr.msk.f32.mxu0 %vm81_vm0, %v50_v20 }
  0x2a   :  { %3752 = vmatmul.mubr.msk.f32.gmra.mxu0 %vm81_vm0, %v51_v21 }
  0xce   :  { %v3732_v27 = vpop.f32.mrf.mxu0 }
  0xcf   :  { %v202_v58 = vadd.f32 %v3732_v27, %v3508_v41 }
  0xd0   :  { %v196_v28 = vpop.f32.mrf.mxu0 }
  0xd1   :  { %v197_v59 = vadd.f32 %v3508_v41, %v196_v28 }
  0xd2   :  { %v3735_v29 = vpop.f32.mrf.mxu0 }
  0xd3   :  { %v212_v56 = vadd.f32 %v3735_v29, %v3508_v41 }
  0xd4   :  { %v206_v30 = vpop.f32.mrf.mxu0 }
  0xd5   :  { %v207_v57 = vadd.f32 %v3508_v41, %v206_v30 }
  0xd6   :  { %v3738_v31 = vpop.f32.mrf.mxu0 }
  0xd7   :  { %v222_v54 = vadd.f32 %v3738_v31, %v3508_v41 }
  0xd8   :  { %v216_v32 = vpop.f32.mrf.mxu0 }
  0xd9   :  { %v217_v55 = vadd.f32 %v3508_v41, %v216_v32 }
  0xda   :  { %v3741_v33 = vpop.f32.mrf.mxu0 }
  0xdb   :  { %v232_v52 = vadd.f32 %v3741_v33, %v3508_v41 }
  0xdc   :  { %v226_v34 = vpop.f32.mrf.mxu0 }
  0xdd   :  { %v227_v53 = vadd.f32 %v3508_v41, %v226_v34 }
  0xde   :  { %v3744_v35 = vpop.f32.mrf.mxu0 }
  0xdf   :  { %v242_v50 = vadd.f32 %v3744_v35, %v3508_v41 }
  0xe0   :  { %v236_v36 = vpop.f32.mrf.mxu0 }
  0xe1   :  { %v237_v51 = vadd.f32 %v3508_v41, %v236_v36 }
  0xe2   :  { %v3747_v37 = vpop.f32.mrf.mxu0 }
  0xe3   :  { %v252_v48 = vadd.f32 %v3747_v37, %v3508_v41 }
  0xe4   :  { %v246_v38 = vpop.f32.mrf.mxu0 }
  0xe5   :  { %v247_v49 = vadd.f32 %v3508_v41, %v246_v38 }
  0xe6   :  { %v3750_v39 = vpop.f32.mrf.mxu0 }
  0xe7   :  { %v262_v46 = vadd.f32 %v3750_v39, %v3508_v41 }
  0xe8   :  { %v256_v40 = vpop.f32.mrf.mxu0 }
  0xe9   :  { %v257_v47 = vadd.f32 %v3508_v41, %v256_v40 }
  0xea   :  { %v3753_v42 = vpop.f32.mrf.mxu0 }
  0xeb   :  { %v272_v43 = vadd.f32 %v3753_v42, %v3508_v41 }
  0xec   :  { %v266_v44 = vpop.f32.mrf.mxu0 }
  0xed   :  { %v267_v45 = vadd.f32 %v3508_v41, %v266_v44  ;;  %3754 = vmatprep.subr.mxu1 %v272_v43  ;;  %v805_v44 = vld [vmem:[%s6432_s6 + $0x18] sm:$0xff] }
  0xee   :  { %3755 = vmatpush3.msra.mxu1 %v272_v43  ;;  %3898 = vmatprep.subr.mxu0 %v805_v44 }
  0xef   :  { %3756 = vmatprep.subr.mxu1 %v267_v45 }
  0xf0   :  { %3757 = vmatpush3.msra.mxu1 %v267_v45  ;;  %v804_v45 = vld [vmem:[%s6432_s6 + $0x10] sm:$0xff] }
  0xf1   :  { %3758 = vmatprep.subr.mxu1 %v262_v46 }
  0xf2   :  { %3759 = vmatpush3.msra.mxu1 %v262_v46  ;;  %v803_v46 = vld [vmem:[%s6432_s6 + $0x8] sm:$0xff] }
  0xf3   :  { %3760 = vmatprep.subr.mxu1 %v257_v47 }
  0xf4   :  { %3761 = vmatpush3.msra.mxu1 %v257_v47  ;;  %v802_v47 = vld [vmem:[%s6432_s6] sm:$0xff] }
  0xf5   :  { %3762 = vmatprep.subr.mxu1 %v252_v48 }
  0xf6   :  { %3763 = vmatpush3.msra.mxu1 %v252_v48 }
  0xf7   :  { %3764 = vmatprep.subr.mxu1 %v247_v49 }
  0xf8   :  { %3765 = vmatpush3.msra.mxu1 %v247_v49 }
  0xf9   :  { %3766 = vmatprep.subr.mxu1 %v242_v50 }
  0xfa   :  { %3767 = vmatpush3.msra.mxu1 %v242_v50 }
  0xfb   :  { %3768 = vmatprep.subr.mxu1 %v237_v51 }
  0xfc   :  { %3769 = vmatpush3.msra.mxu1 %v237_v51 }
  0xfd   :  { %3770 = vmatprep.subr.mxu1 %v232_v52 }
  0xfe   :  { %3771 = vmatpush3.msra.mxu1 %v232_v52 }
  0xff   :  { %3772 = vmatprep.subr.mxu1 %v227_v53 }
 0x100   :  { %3773 = vmatpush3.msra.mxu1 %v227_v53 }
 0x101   :  { %3774 = vmatprep.subr.mxu1 %v222_v54 }
 0x102   :  { %3775 = vmatpush3.msra.mxu1 %v222_v54 }
 0x103   :  { %3776 = vmatprep.subr.mxu1 %v217_v55 }
 0x104   :  { %3777 = vmatpush3.msra.mxu1 %v217_v55 }
 0x105   :  { %3778 = vmatprep.subr.mxu1 %v212_v56 }
 0x106   :  { %3779 = vmatpush3.msra.mxu1 %v212_v56 }
 0x107   :  { %3780 = vmatprep.subr.mxu1 %v207_v57 }
 0x108   :  { %3781 = vmatpush3.msra.mxu1 %v207_v57 }
 0x109   :  { %3782 = vmatprep.subr.mxu1 %v202_v58 }
 0x10a   :  { %3783 = vmatpush3.msra.mxu1 %v202_v58 }
 0x10b   :  { %3784 = vmatprep.subr.mxu1 %v197_v59 }
 0x10c   :  { %3785 = vmatpush3.msra.mxu1 %v197_v59 }
 0x10d   :  { %3787 = vmatmul.mubr.f32.vlgmr.msra.gmra.mxu1 %v4281_v60 }
 0x10e   :  { %3789 = vmatprep.mubr.f32.mxu1 %v4286_v61 }
 0x111   :  { %3790 = vmatmul.mubr.f32.gmra.mxu1 %v4293_v62 }
 0x112   :  { %3792 = vmatprep.mubr.f32.mxu1 %v4298_v63 }
 0x115   :  { %3793 = vmatmul.mubr.f32.gmra.mxu1 %v4305_v0 }
 0x116   :  { %3795 = vmatprep.mubr.f32.mxu1 %v4310_v1 }
 0x119   :  { %3796 = vmatmul.mubr.f32.gmra.mxu1 %v4317_v2 }
 0x11a   :  { %3798 = vmatprep.mubr.f32.mxu1 %v4322_v3 }
 0x11d   :  { %3799 = vmatmul.mubr.f32.gmra.mxu1 %v4329_v4 }
 0x11e   :  { %3801 = vmatprep.mubr.f32.mxu1 %v4334_v5 }
 0x121   :  { %3802 = vmatmul.mubr.f32.gmra.mxu1 %v4341_v6 }
 0x122   :  { %3804 = vmatprep.mubr.f32.mxu1 %v4346_v7 }
 0x125   :  { %3805 = vmatmul.mubr.f32.gmra.mxu1 %v4353_v8 }
 0x126   :  { %3807 = vmatprep.mubr.f32.mxu1 %v4358_v9 }
 0x129   :  { %3808 = vmatmul.mubr.f32.gmra.mxu1 %v4365_v10 }
 0x12a   :  { %3874 = vmatprep.mubr.f32.mxu1 %v4260_v22 }
 0x1cd   :  { %v3788_v11 = vpop.f32.mrf.mxu1 }
 0x1ce   :  { %v421_v14 = vmax.f32 %v3788_v11, 0.0 }
 0x1cf   :  { %v341_v12 = vpop.f32.mrf.mxu1 }
 0x1d0   :  { %v420_v13 = vmax.f32 %v341_v12, 0.0 }
 0x1d1   :  { %v3791_v15 = vpop.f32.mrf.mxu1 }
 0x1d2   :  { %3818 = vmatprep.mubr.msk.f32.mxu0 %vm447_vm1, %v420_v13  ;;  %v423_v18 = vmax.f32 %v3791_v15, 0.0  ;;  %v3525_v13 = vld [vmem:[%s6431_s5] ss:$0 sm:$0xff] }
 0x1d3   :  { %v351_v16 = vpop.f32.mrf.mxu1  ;;  %3819 = vmatmul.mubr.msk.f32.vlgmr.msra.gmra.mxu0 %vm447_vm1, %v421_v14 }
 0x1d4   :  { %v422_v17 = vmax.f32 %v351_v16, 0.0  ;;  %3899 = vmatpush3.msra.mxu0 %v805_v44 }
 0x1d5   :  { %v3794_v19 = vpop.f32.mrf.mxu1  ;;  %3900 = vmatprep.subr.mxu0 %v804_v45 }
 0x1d6   :  { %3821 = vmatprep.mubr.msk.f32.mxu0 %vm447_vm1, %v422_v17  ;;  %v425_v23 = vmax.f32 %v3794_v19, 0.0  ;;  %3901 = vmatpush3.msra.mxu0 %v804_v45 }
 0x1d7   :  { %v361_v20 = vpop.f32.mrf.mxu1  ;;  %3822 = vmatmul.mubr.msk.f32.gmra.mxu0 %vm447_vm1, %v423_v18  ;;  %3902 = vmatprep.subr.mxu0 %v803_v46 }
 0x1d8   :  { %v424_v21 = vmax.f32 %v361_v20, 0.0  ;;  %3903 = vmatpush3.msra.mxu0 %v803_v46 }
 0x1d9   :  { %v3797_v24 = vpop.f32.mrf.mxu1  ;;  %3904 = vmatprep.subr.mxu0 %v802_v47 }
 0x1da   :  { %3824 = vmatprep.mubr.msk.f32.mxu0 %vm447_vm1, %v424_v21  ;;  %v427_v27 = vmax.f32 %v3797_v24, 0.0  ;;  %3905 = vmatpush3.msra.mxu0 %v802_v47 }
 0x1db   :  { %v371_v25 = vpop.f32.mrf.mxu1  ;;  %3825 = vmatmul.mubr.msk.f32.gmra.mxu0 %vm447_vm1, %v425_v23 }
 0x1dc   :  { %v426_v26 = vmax.f32 %v371_v25, 0.0 }
 0x1dd   :  { %v3800_v28 = vpop.f32.mrf.mxu1 }
 0x1de   :  { %3827 = vmatprep.mubr.msk.f32.mxu0 %vm447_vm1, %v426_v26  ;;  %v429_v31 = vmax.f32 %v3800_v28, 0.0 }
 0x1df   :  { %v381_v29 = vpop.f32.mrf.mxu1  ;;  %3828 = vmatmul.mubr.msk.f32.gmra.mxu0 %vm447_vm1, %v427_v27 }
 0x1e0   :  { %v428_v30 = vmax.f32 %v381_v29, 0.0 }
 0x1e1   :  { %v3803_v32 = vpop.f32.mrf.mxu1 }
 0x1e2   :  { %3830 = vmatprep.mubr.msk.f32.mxu0 %vm447_vm1, %v428_v30  ;;  %v431_v35 = vmax.f32 %v3803_v32, 0.0 }
 0x1e3   :  { %v391_v33 = vpop.f32.mrf.mxu1  ;;  %3831 = vmatmul.mubr.msk.f32.gmra.mxu0 %vm447_vm1, %v429_v31 }
 0x1e4   :  { %v430_v34 = vmax.f32 %v391_v33, 0.0 }
 0x1e5   :  { %v3806_v36 = vpop.f32.mrf.mxu1 }
 0x1e6   :  { %3833 = vmatprep.mubr.msk.f32.mxu0 %vm447_vm1, %v430_v34  ;;  %v433_v39 = vmax.f32 %v3806_v36, 0.0 }
 0x1e7   :  { %v401_v37 = vpop.f32.mrf.mxu1  ;;  %3834 = vmatmul.mubr.msk.f32.gmra.mxu0 %vm447_vm1, %v431_v35 }
 0x1e8   :  { %v432_v38 = vmax.f32 %v401_v37, 0.0 }
 0x1e9   :  { %v3809_v40 = vpop.f32.mrf.mxu1 }
 0x1ea   :  { %3836 = vmatprep.mubr.msk.f32.mxu0 %vm447_vm1, %v432_v38  ;;  %v435_v43 = vmax.f32 %v3809_v40, 0.0 }
 0x1eb   :  { %v411_v41 = vpop.f32.mrf.mxu1  ;;  %3837 = vmatmul.mubr.msk.f32.gmra.mxu0 %vm447_vm1, %v433_v39 }
 0x1ec   :  { %v434_v42 = vmax.f32 %v411_v41, 0.0 }
 0x1ee   :  { %3839 = vmatprep.mubr.msk.f32.mxu0 %vm447_vm1, %v434_v42 }
 0x1ef   :  { %3840 = vmatmul.mubr.msk.f32.gmra.mxu0 %vm447_vm1, %v435_v43 }
 0x293   :  { %v3820_v48 = vpop.f32.mrf.mxu0 }
 0x294   :  { %v568_v31 = vadd.f32 %v3820_v48, %v3525_v13 }
 0x295   :  { %v562_v49 = vpop.f32.mrf.mxu0 }
 0x296   :  { %v563_v32 = vadd.f32 %v3525_v13, %v562_v49 }
 0x297   :  { %v3823_v50 = vpop.f32.mrf.mxu0 }
 0x298   :  { %v578_v29 = vadd.f32 %v3823_v50, %v3525_v13 }
 0x299   :  { %v572_v51 = vpop.f32.mrf.mxu0 }
 0x29a   :  { %v573_v30 = vadd.f32 %v3525_v13, %v572_v51 }
 0x29b   :  { %v3826_v52 = vpop.f32.mrf.mxu0 }
 0x29c   :  { %v588_v27 = vadd.f32 %v3826_v52, %v3525_v13 }
 0x29d   :  { %v582_v53 = vpop.f32.mrf.mxu0 }
 0x29e   :  { %v583_v28 = vadd.f32 %v3525_v13, %v582_v53 }
 0x29f   :  { %v3829_v54 = vpop.f32.mrf.mxu0 }
 0x2a0   :  { %v598_v25 = vadd.f32 %v3829_v54, %v3525_v13 }
 0x2a1   :  { %v592_v55 = vpop.f32.mrf.mxu0 }
 0x2a2   :  { %v593_v26 = vadd.f32 %v3525_v13, %v592_v55 }
 0x2a3   :  { %v3832_v56 = vpop.f32.mrf.mxu0 }
 0x2a4   :  { %v608_v23 = vadd.f32 %v3832_v56, %v3525_v13 }
 0x2a5   :  { %v602_v57 = vpop.f32.mrf.mxu0 }
 0x2a6   :  { %v603_v24 = vadd.f32 %v3525_v13, %v602_v57 }
 0x2a7   :  { %v3835_v58 = vpop.f32.mrf.mxu0 }
 0x2a8   :  { %v618_v20 = vadd.f32 %v3835_v58, %v3525_v13 }
 0x2a9   :  { %v612_v59 = vpop.f32.mrf.mxu0 }
 0x2aa   :  { %v613_v21 = vadd.f32 %v3525_v13, %v612_v59 }
 0x2ab   :  { %v3838_v11 = vpop.f32.mrf.mxu0 }
 0x2ac   :  { %v628_v18 = vadd.f32 %v3838_v11, %v3525_v13 }
 0x2ad   :  { %v622_v12 = vpop.f32.mrf.mxu0 }
 0x2ae   :  { %v623_v19 = vadd.f32 %v3525_v13, %v622_v12 }
 0x2af   :  { %v3841_v14 = vpop.f32.mrf.mxu0 }
 0x2b0   :  { %v638_v15 = vadd.f32 %v3841_v14, %v3525_v13 }
 0x2b1   :  { %v632_v16 = vpop.f32.mrf.mxu0 }
 0x2b2   :  { %v633_v17 = vadd.f32 %v3525_v13, %v632_v16  ;;  %3842 = vmatprep.subr.mxu1 %v638_v15 }
 0x2b3   :  { %3843 = vmatpush3.msra.mxu1 %v638_v15 }
 0x2b4   :  { %3844 = vmatprep.subr.mxu1 %v633_v17 }
 0x2b5   :  { %3845 = vmatpush3.msra.mxu1 %v633_v17 }
 0x2b6   :  { %3846 = vmatprep.subr.mxu1 %v628_v18 }
 0x2b7   :  { %3847 = vmatpush3.msra.mxu1 %v628_v18 }
 0x2b8   :  { %3848 = vmatprep.subr.mxu1 %v623_v19 }
 0x2b9   :  { %3849 = vmatpush3.msra.mxu1 %v623_v19 }
 0x2ba   :  { %3850 = vmatprep.subr.mxu1 %v618_v20 }
 0x2bb   :  { %3851 = vmatpush3.msra.mxu1 %v618_v20 }
 0x2bc   :  { %3852 = vmatprep.subr.mxu1 %v613_v21 }
 0x2bd   :  { %3853 = vmatpush3.msra.mxu1 %v613_v21 }
 0x2be   :  { %3854 = vmatprep.subr.mxu1 %v608_v23 }
 0x2bf   :  { %3855 = vmatpush3.msra.mxu1 %v608_v23 }
 0x2c0   :  { %3856 = vmatprep.subr.mxu1 %v603_v24 }
 0x2c1   :  { %3857 = vmatpush3.msra.mxu1 %v603_v24 }
 0x2c2   :  { %3858 = vmatprep.subr.mxu1 %v598_v25 }
 0x2c3   :  { %3859 = vmatpush3.msra.mxu1 %v598_v25 }
 0x2c4   :  { %3860 = vmatprep.subr.mxu1 %v593_v26 }
 0x2c5   :  { %3861 = vmatpush3.msra.mxu1 %v593_v26 }
 0x2c6   :  { %3862 = vmatprep.subr.mxu1 %v588_v27 }
 0x2c7   :  { %3863 = vmatpush3.msra.mxu1 %v588_v27 }
 0x2c8   :  { %3864 = vmatprep.subr.mxu1 %v583_v28 }
 0x2c9   :  { %3865 = vmatpush3.msra.mxu1 %v583_v28 }
 0x2ca   :  { %3866 = vmatprep.subr.mxu1 %v578_v29 }
 0x2cb   :  { %3867 = vmatpush3.msra.mxu1 %v578_v29 }
 0x2cc   :  { %3868 = vmatprep.subr.mxu1 %v573_v30 }
 0x2cd   :  { %3869 = vmatpush3.msra.mxu1 %v573_v30 }
 0x2ce   :  { %3870 = vmatprep.subr.mxu1 %v568_v31 }
 0x2cf   :  { %3871 = vmatpush3.msra.mxu1 %v568_v31 }
 0x2d0   :  { %3872 = vmatprep.subr.mxu1 %v563_v32 }
 0x2d1   :  { %3873 = vmatpush3.msra.mxu1 %v563_v32 }
 0x2d2   :  { %3875 = vmatmul.mubr.f32.vlgmr.msra.gmra.mxu1 %v4281_v60 }
 0x2d3   :  { %3877 = vmatprep.mubr.f32.mxu1 %v4286_v61 }
 0x2d6   :  { %3878 = vmatmul.mubr.f32.gmra.mxu1 %v4293_v62 }
 0x2d7   :  { %3880 = vmatprep.mubr.f32.mxu1 %v4298_v63 }
 0x2da   :  { %3881 = vmatmul.mubr.f32.gmra.mxu1 %v4305_v0 }
 0x2db   :  { %3883 = vmatprep.mubr.f32.mxu1 %v4310_v1 }
 0x2de   :  { %3884 = vmatmul.mubr.f32.gmra.mxu1 %v4317_v2 }
 0x2df   :  { %3886 = vmatprep.mubr.f32.mxu1 %v4322_v3 }
 0x2e2   :  { %3887 = vmatmul.mubr.f32.gmra.mxu1 %v4329_v4 }
 0x2e3   :  { %3889 = vmatprep.mubr.f32.mxu1 %v4334_v5 }
 0x2e6   :  { %3890 = vmatmul.mubr.f32.gmra.mxu1 %v4341_v6 }
 0x2e7   :  { %3892 = vmatprep.mubr.f32.mxu1 %v4346_v7 }
 0x2ea   :  { %3893 = vmatmul.mubr.f32.gmra.mxu1 %v4353_v8 }
 0x2eb   :  { %3895 = vmatprep.mubr.f32.mxu1 %v4358_v9 }
 0x2ee   :  { %3896 = vmatmul.mubr.f32.gmra.mxu1 %v4365_v10 }
 0x2ef   :  { %3968 = vmatprep.mubr.f32.mxu1 %v4298_v63 }
 0x392   :  { %v3876_v33 = vpop.f32.mrf.mxu1 }
 0x393   :  { %v787_v36 = vmax.f32 %v3876_v33, 0.0 }
 0x394   :  { %v707_v34 = vpop.f32.mrf.mxu1 }
 0x395   :  { %v786_v35 = vmax.f32 %v707_v34, 0.0 }
 0x396   :  { %v3879_v37 = vpop.f32.mrf.mxu1 }
 0x397   :  { %3906 = vmatprep.mubr.msk.f32.mxu0 %vm447_vm1, %v786_v35  ;;  %v789_v40 = vmax.f32 %v3879_v37, 0.0 }
 0x398   :  { %v717_v38 = vpop.f32.mrf.mxu1  ;;  %3907 = vmatmul.mubr.msk.f32.vlgmr.msra.gmra.mxu0 %vm447_vm1, %v787_v36 }
 0x399   :  { %v788_v39 = vmax.f32 %v717_v38, 0.0 }
 0x39a   :  { %v3882_v41 = vpop.f32.mrf.mxu1 }
 0x39b   :  { %3909 = vmatprep.mubr.msk.f32.mxu0 %vm447_vm1, %v788_v39  ;;  %v791_v63 = vmax.f32 %v3882_v41, 0.0 }
 0x39c   :  { %v727_v42 = vpop.f32.mrf.mxu1  ;;  %3910 = vmatmul.mubr.msk.f32.gmra.mxu0 %vm447_vm1, %v789_v40 }
 0x39d   :  { %v790_v43 = vmax.f32 %v727_v42, 0.0 }
 0x39e   :  { %v3885_v44 = vpop.f32.mrf.mxu1 }
 0x39f   :  { %3912 = vmatprep.mubr.msk.f32.mxu0 %vm447_vm1, %v790_v43  ;;  %v793_v47 = vmax.f32 %v3885_v44, 0.0 }
 0x3a0   :  { %v737_v45 = vpop.f32.mrf.mxu1  ;;  %3913 = vmatmul.mubr.msk.f32.gmra.mxu0 %vm447_vm1, %v791_v63 }
 0x3a1   :  { %v792_v46 = vmax.f32 %v737_v45, 0.0 }
 0x3a2   :  { %v3888_v48 = vpop.f32.mrf.mxu1 }
 0x3a3   :  { %3915 = vmatprep.mubr.msk.f32.mxu0 %vm447_vm1, %v792_v46  ;;  %v795_v51 = vmax.f32 %v3888_v48, 0.0 }
 0x3a4   :  { %v747_v49 = vpop.f32.mrf.mxu1  ;;  %3916 = vmatmul.mubr.msk.f32.gmra.mxu0 %vm447_vm1, %v793_v47 }
 0x3a5   :  { %v794_v50 = vmax.f32 %v747_v49, 0.0 }
 0x3a6   :  { %v3891_v52 = vpop.f32.mrf.mxu1 }
 0x3a7   :  { %3918 = vmatprep.mubr.msk.f32.mxu0 %vm447_vm1, %v794_v50  ;;  %v797_v55 = vmax.f32 %v3891_v52, 0.0 }
 0x3a8   :  { %v757_v53 = vpop.f32.mrf.mxu1  ;;  %3919 = vmatmul.mubr.msk.f32.gmra.mxu0 %vm447_vm1, %v795_v51 }
 0x3a9   :  { %v796_v54 = vmax.f32 %v757_v53, 0.0 }
 0x3aa   :  { %v3894_v56 = vpop.f32.mrf.mxu1 }
 0x3ab   :  { %3921 = vmatprep.mubr.msk.f32.mxu0 %vm447_vm1, %v796_v54  ;;  %v799_v59 = vmax.f32 %v3894_v56, 0.0 }
 0x3ac   :  { %v767_v57 = vpop.f32.mrf.mxu1  ;;  %3922 = vmatmul.mubr.msk.f32.gmra.mxu0 %vm447_vm1, %v797_v55 }
 0x3ad   :  { %v798_v58 = vmax.f32 %v767_v57, 0.0 }
 0x3ae   :  { %v3897_v11 = vpop.f32.mrf.mxu1 }
 0x3af   :  { %3924 = vmatprep.mubr.msk.f32.mxu0 %vm447_vm1, %v798_v58  ;;  %v801_v14 = vmax.f32 %v3897_v11, 0.0 }
 0x3b0   :  { %v777_v12 = vpop.f32.mrf.mxu1  ;;  %3925 = vmatmul.mubr.msk.f32.gmra.mxu0 %vm447_vm1, %v799_v59 }
 0x3b1   :  { %v800_v13 = vmax.f32 %v777_v12, 0.0 }
 0x3b3   :  { %3927 = vmatprep.mubr.msk.f32.mxu0 %vm447_vm1, %v800_v13 }
 0x3b4   :  { %3928 = vmatmul.mubr.msk.f32.gmra.mxu0 %vm447_vm1, %v801_v14 }
 0x3b5   :  { %3962 = vmatprep.mubr.f32.mxu0 %v4260_v22  ;;  %v4446_v22 = vld [vmem:[%s6433_s7] ss:$0 sm:$0xff] }
 0x458   :  { %v4433_v15 = vpop.f32.mrf.mxu0 }
 0x459   :  { %v933_v45 = vadd.f32 %v4433_v15, %v4446_v22 }
 0x45a   :  { %v4435_v16 = vpop.f32.mrf.mxu0 }
 0x45b   :  { %v928_v46 = vadd.f32 %v4446_v22, %v4435_v16 }
 0x45c   :  { %v4437_v17 = vpop.f32.mrf.mxu0 }
 0x45d   :  { %v943_v63 = vadd.f32 %v4437_v17, %v4446_v22 }
 0x45e   :  { %v4439_v18 = vpop.f32.mrf.mxu0 }
 0x45f   :  { %v938_v44 = vadd.f32 %v4446_v22, %v4439_v18 }
 0x460   :  { %v3914_v19 = vpop.f32.mrf.mxu0 }
 0x461   :  { %v953_v42 = vadd.f32 %v3914_v19, %v4446_v22 }
 0x462   :  { %v4441_v20 = vpop.f32.mrf.mxu0 }
 0x463   :  { %v948_v43 = vadd.f32 %v4446_v22, %v4441_v20 }
 0x464   :  { %v3917_v21 = vpop.f32.mrf.mxu0 }
 0x465   :  { %v963_v40 = vadd.f32 %v3917_v21, %v4446_v22 }
 0x466   :  { %v957_v23 = vpop.f32.mrf.mxu0 }
 0x467   :  { %v958_v41 = vadd.f32 %v4446_v22, %v957_v23 }
 0x468   :  { %v3920_v24 = vpop.f32.mrf.mxu0 }
 0x469   :  { %v973_v38 = vadd.f32 %v3920_v24, %v4446_v22 }
 0x46a   :  { %v967_v25 = vpop.f32.mrf.mxu0 }
 0x46b   :  { %v968_v39 = vadd.f32 %v4446_v22, %v967_v25 }
 0x46c   :  { %v3923_v26 = vpop.f32.mrf.mxu0 }
 0x46d   :  { %v983_v36 = vadd.f32 %v3923_v26, %v4446_v22 }
 0x46e   :  { %v977_v27 = vpop.f32.mrf.mxu0 }
 0x46f   :  { %v978_v37 = vadd.f32 %v4446_v22, %v977_v27 }
 0x470   :  { %v3926_v28 = vpop.f32.mrf.mxu0 }
 0x471   :  { %v993_v34 = vadd.f32 %v3926_v28, %v4446_v22 }
 0x472   :  { %v987_v29 = vpop.f32.mrf.mxu0 }
 0x473   :  { %v988_v35 = vadd.f32 %v4446_v22, %v987_v29 }
 0x474   :  { %v3929_v30 = vpop.f32.mrf.mxu0 }
 0x475   :  { %v1003_v31 = vadd.f32 %v3929_v30, %v4446_v22 }
 0x476   :  { %v997_v32 = vpop.f32.mrf.mxu0 }
 0x477   :  { %v998_v33 = vadd.f32 %v4446_v22, %v997_v32  ;;  %3930 = vmatprep.subr.mxu0 %v1003_v31  ;;  %3986 = vmatprep.subr.mxu1 %v1003_v31 }
 0x478   :  { %3931 = vmatpush3.msra.mxu0 %v1003_v31  ;;  %4002 = vmatpush3.msra.mxu1 %v1003_v31 }
 0x479   :  { %3932 = vmatprep.subr.mxu0 %v998_v33  ;;  %3987 = vmatprep.subr.mxu1 %v998_v33 }
 0x47a   :  { %3933 = vmatpush3.msra.mxu0 %v998_v33  ;;  %4003 = vmatpush3.msra.mxu1 %v998_v33 }
 0x47b   :  { %3934 = vmatprep.subr.mxu0 %v993_v34  ;;  %3988 = vmatprep.subr.mxu1 %v993_v34 }
 0x47c   :  { %3935 = vmatpush3.msra.mxu0 %v993_v34  ;;  %4004 = vmatpush3.msra.mxu1 %v993_v34 }
 0x47d   :  { %3936 = vmatprep.subr.mxu0 %v988_v35  ;;  %3989 = vmatprep.subr.mxu1 %v988_v35 }
 0x47e   :  { %3937 = vmatpush3.msra.mxu0 %v988_v35  ;;  %4005 = vmatpush3.msra.mxu1 %v988_v35 }
 0x47f   :  { %3938 = vmatprep.subr.mxu0 %v983_v36  ;;  %3990 = vmatprep.subr.mxu1 %v983_v36 }
 0x480   :  { %3939 = vmatpush3.msra.mxu0 %v983_v36  ;;  %4006 = vmatpush3.msra.mxu1 %v983_v36 }
 0x481   :  { %3940 = vmatprep.subr.mxu0 %v978_v37  ;;  %3991 = vmatprep.subr.mxu1 %v978_v37 }
 0x482   :  { %3941 = vmatpush3.msra.mxu0 %v978_v37  ;;  %4007 = vmatpush3.msra.mxu1 %v978_v37 }
 0x483   :  { %3942 = vmatprep.subr.mxu0 %v973_v38  ;;  %3992 = vmatprep.subr.mxu1 %v973_v38 }
 0x484   :  { %3943 = vmatpush3.msra.mxu0 %v973_v38  ;;  %4008 = vmatpush3.msra.mxu1 %v973_v38 }
 0x485   :  { %3944 = vmatprep.subr.mxu0 %v968_v39  ;;  %3993 = vmatprep.subr.mxu1 %v968_v39 }
 0x486   :  { %3945 = vmatpush3.msra.mxu0 %v968_v39  ;;  %4009 = vmatpush3.msra.mxu1 %v968_v39 }
 0x487   :  { %3946 = vmatprep.subr.mxu0 %v963_v40  ;;  %3994 = vmatprep.subr.mxu1 %v963_v40 }
 0x488   :  { %3947 = vmatpush3.msra.mxu0 %v963_v40  ;;  %4010 = vmatpush3.msra.mxu1 %v963_v40 }
 0x489   :  { %3948 = vmatprep.subr.mxu0 %v958_v41  ;;  %3995 = vmatprep.subr.mxu1 %v958_v41 }
 0x48a   :  { %3949 = vmatpush3.msra.mxu0 %v958_v41  ;;  %4011 = vmatpush3.msra.mxu1 %v958_v41 }
 0x48b   :  { %3950 = vmatprep.subr.mxu0 %v953_v42  ;;  %3996 = vmatprep.subr.mxu1 %v953_v42 }
 0x48c   :  { %3951 = vmatpush3.msra.mxu0 %v953_v42  ;;  %4012 = vmatpush3.msra.mxu1 %v953_v42 }
 0x48d   :  { %3952 = vmatprep.subr.mxu0 %v948_v43  ;;  %3997 = vmatprep.subr.mxu1 %v948_v43 }
 0x48e   :  { %3953 = vmatpush3.msra.mxu0 %v948_v43  ;;  %4013 = vmatpush3.msra.mxu1 %v948_v43 }
 0x48f   :  { %3954 = vmatprep.subr.mxu0 %v943_v63  ;;  %3998 = vmatprep.subr.mxu1 %v943_v63 }
 0x490   :  { %3955 = vmatpush3.msra.mxu0 %v943_v63  ;;  %4014 = vmatpush3.msra.mxu1 %v943_v63 }
 0x491   :  { %3956 = vmatprep.subr.mxu0 %v938_v44  ;;  %3999 = vmatprep.subr.mxu1 %v938_v44 }
 0x492   :  { %3957 = vmatpush3.msra.mxu0 %v938_v44  ;;  %4015 = vmatpush3.msra.mxu1 %v938_v44 }
 0x493   :  { %3958 = vmatprep.subr.mxu0 %v933_v45  ;;  %4000 = vmatprep.subr.mxu1 %v933_v45 }
 0x494   :  { %3959 = vmatpush3.msra.mxu0 %v933_v45  ;;  %4016 = vmatpush3.msra.mxu1 %v933_v45 }
 0x495   :  { %3960 = vmatprep.subr.mxu0 %v928_v46  ;;  %4001 = vmatprep.subr.mxu1 %v928_v46 }
 0x496   :  { %3961 = vmatpush3.msra.mxu0 %v928_v46  ;;  %4017 = vmatpush3.msra.mxu1 %v928_v46 }
 0x497   :  { %3963 = vmatmul.mubr.f32.vlgmr.msra.gmra.mxu0 %v4281_v60  ;;  %3969 = vmatmul.mubr.f32.vlgmr.msra.gmra.mxu1 %v4305_v0  ;;  %v1295_v60 = vlaneseq }
 0x498   :  { %3965 = vmatprep.mubr.f32.mxu0 %v4286_v61  ;;  %3971 = vmatprep.mubr.f32.mxu1 %v4310_v1 }
 0x499   :  { %v1296_v61 = vshrl.u32 %v1295_v60, 7 }
 0x49b   :  { %3966 = vmatmul.mubr.f32.gmra.mxu0 %v4293_v62  ;;  %3972 = vmatmul.mubr.f32.gmra.mxu1 %v4317_v2  ;;  %v4483_v62 = vsub.s32 0, %v1296_v61  ;;  %v4498_v47 = vsub.s32 5, %v1296_v61  ;;  %v4501_v49 = vsub.s32 6, %v1296_v61  ;;  %v4504_v51 = vsub.s32 7, %v1296_v61 }
 0x49c   :  { %3974 = vmatprep.mubr.f32.mxu1 %v4322_v3  ;;  %v4486_v3 = vsub.s32 1, %v1296_v61 }
 0x49f   :  { %3975 = vmatmul.mubr.f32.gmra.mxu1 %v4329_v4 }
 0x4a0   :  { %3977 = vmatprep.mubr.f32.mxu1 %v4334_v5  ;;  %v4489_v5 = vsub.s32 2, %v1296_v61 }
 0x4a3   :  { %3978 = vmatmul.mubr.f32.gmra.mxu1 %v4341_v6 }
 0x4a4   :  { %3980 = vmatprep.mubr.f32.mxu1 %v4346_v7  ;;  %v4492_v7 = vsub.s32 3, %v1296_v61 }
 0x4a7   :  { %3981 = vmatmul.mubr.f32.gmra.mxu1 %v4353_v8 }
 0x4a8   :  { %3983 = vmatprep.mubr.f32.mxu1 %v4358_v9  ;;  %v4495_v9 = vsub.s32 4, %v1296_v61 }
 0x4ab   :  { %3984 = vmatmul.mubr.f32.gmra.mxu1 %v4365_v10 }
 0x557   :  { %v3964_v0 = vpop.f32.mrf.mxu0  ;;  %v3970_v52 = vpop.f32.mrf.mxu1 }
 0x558   :  { %v1152_v1 = vmax.f32 %v3964_v0, 0.0  ;;  %v1156_v53 = vmax.f32 %v3970_v52, 0.0 }
 0x559   :  { %v1072_v59 = vpop.f32.mrf.mxu0  ;;  %v1092_v24 = vpop.f32.mrf.mxu1 }
 0x55a   :  { %v1386_v2 = vrot.slane %v1152_v1, %v4483_v62  ;;  %v1397_v4 = vrot.slane %v1152_v1, %v4486_v3  ;;  %v1408_v6 = vrot.slane %v1152_v1, %v4489_v5  ;;  %v1419_v8 = vrot.slane %v1152_v1, %v4492_v7 }
 0x55b   :  { %v1430_v10 = vrot.slane %v1152_v1, %v4495_v9  ;;  %v1441_v48 = vrot.slane %v1152_v1, %v4498_v47  ;;  %v1452_v50 = vrot.slane %v1152_v1, %v4501_v49  ;;  %v1463_v54 = vrot.slane %v1152_v1, %v4504_v51  ;;  %v3967_v33 = vpop.f32.mrf.mxu0 }
 0x55c   :  { %1392 = vbcast.lane.b32.xlu1 %v1386_v2, 264  ;;  %1388 = vbcast.lane.b32.xlu0 %v1386_v2, 256  ;;  %v1738_v55 = vrot.slane %v1156_v53, %v4483_v62  ;;  %v1749_v56 = vrot.slane %v1156_v53, %v4486_v3  ;;  %v1760_v57 = vrot.slane %v1156_v53, %v4489_v5  ;;  %v1151_v11 = vmax.f32 %v1072_v59, 0.0 }
 0x55d   :  { %v1771_v58 = vrot.slane %v1156_v53, %v4492_v7  ;;  %v1782_v12 = vrot.slane %v1156_v53, %v4495_v9  ;;  %v1793_v13 = vrot.slane %v1156_v53, %v4498_v47  ;;  %v1804_v15 = vrot.slane %v1156_v53, %v4501_v49 }
 0x55e   :  { %v1309_v14 = vrot.slane %v1151_v11, %v4486_v3  ;;  %v1320_v16 = vrot.slane %v1151_v11, %v4489_v5  ;;  %v1331_v17 = vrot.slane %v1151_v11, %v4492_v7  ;;  %v1815_v18 = vrot.slane %v1156_v53, %v4504_v51 }
 0x55f   :  { %v1342_v19 = vrot.slane %v1151_v11, %v4495_v9  ;;  %v1353_v20 = vrot.slane %v1151_v11, %v4498_v47  ;;  %v1364_v21 = vrot.slane %v1151_v11, %v4501_v49  ;;  %v1298_v23 = vrot.slane %v1151_v11, %v4483_v62 }
 0x560   :  { %1403 = vbcast.lane.b32.xlu1 %v1397_v4, 264  ;;  %1399 = vbcast.lane.b32.xlu0 %v1397_v4, 256  ;;  %v1155_v25 = vmax.f32 %v1092_v24, 0.0  ;;  %v1375_v26 = vrot.slane %v1151_v11, %v4504_v51  ;;  %v1154_v34 = vmax.f32 %v3967_v33, 0.0 }
 0x562   :  { %v1650_v27 = vrot.slane %v1155_v25, %v4483_v62  ;;  %v1661_v28 = vrot.slane %v1155_v25, %v4486_v3  ;;  %v1672_v29 = vrot.slane %v1155_v25, %v4489_v5  ;;  %v1683_v22 = vrot.slane %v1155_v25, %v4492_v7 }
 0x563   :  { %v1694_v30 = vrot.slane %v1155_v25, %v4495_v9  ;;  %v1705_v31 = vrot.slane %v1155_v25, %v4498_v47  ;;  %v1716_v32 = vrot.slane %v1155_v25, %v4501_v49  ;;  %v1727_v35 = vrot.slane %v1155_v25, %v4504_v51 }
 0x564   :  { %1414 = vbcast.lane.b32.xlu1 %v1408_v6, 264  ;;  %1410 = vbcast.lane.b32.xlu0 %v1408_v6, 256  ;;  %v1562_v36 = vrot.slane %v1154_v34, %v4483_v62  ;;  %v1573_v41 = vrot.slane %v1154_v34, %v4486_v3  ;;  %v1584_v63 = vrot.slane %v1154_v34, %v4489_v5 }
 0x565   :  { %v1595_v46 = vrot.slane %v1154_v34, %v4492_v7  ;;  %v1606_v0 = vrot.slane %v1154_v34, %v4495_v9  ;;  %v1617_v4 = vrot.slane %v1154_v34, %v4498_v47 }
 0x568   :  { %1425 = vbcast.lane.b32.xlu1 %v1419_v8, 264  ;;  %1421 = vbcast.lane.b32.xlu0 %v1419_v8, 256 }
 0x56c   :  { %1436 = vbcast.lane.b32.xlu1 %v1430_v10, 264  ;;  %1432 = vbcast.lane.b32.xlu0 %v1430_v10, 256  ;;  %v1628_v10 = vrot.slane %v1154_v34, %v4501_v49 }
 0x570   :  { %1447 = vbcast.lane.b32.xlu1 %v1441_v48, 264  ;;  %1443 = vbcast.lane.b32.xlu0 %v1441_v48, 256  ;;  %v1082_v48 = vpop.f32.mrf.mxu0 }
 0x574   :  { %1458 = vbcast.lane.b32.xlu1 %v1452_v50, 264  ;;  %1454 = vbcast.lane.b32.xlu0 %v1452_v50, 256  ;;  %v1153_v50 = vmax.f32 %v1082_v48, 0.0 }
 0x576   :  { %v1485_v11 = vrot.slane %v1153_v50, %v4486_v3  ;;  %v1529_v25 = vrot.slane %v1153_v50, %v4498_v47  ;;  %v1551_v33 = vrot.slane %v1153_v50, %v4504_v51 }
 0x578   :  { %1469 = vbcast.lane.b32.xlu1 %v1463_v54, 264  ;;  %1465 = vbcast.lane.b32.xlu0 %v1463_v54, 256  ;;  %v1639_v54 = vrot.slane %v1154_v34, %v4504_v51 }
 0x57c   :  { %1744 = vbcast.lane.b32.xlu1 %v1738_v55, 264  ;;  %1740 = vbcast.lane.b32.xlu0 %v1738_v55, 256 }
 0x580   :  { %1755 = vbcast.lane.b32.xlu1 %v1749_v56, 264  ;;  %1751 = vbcast.lane.b32.xlu0 %v1749_v56, 256 }
 0x584   :  { %1766 = vbcast.lane.b32.xlu1 %v1760_v57, 264  ;;  %1762 = vbcast.lane.b32.xlu0 %v1760_v57, 256  ;;  %v1474_v57 = vrot.slane %v1153_v50, %v4483_v62 }
 0x588   :  { %1777 = vbcast.lane.b32.xlu1 %v1771_v58, 264  ;;  %1773 = vbcast.lane.b32.xlu0 %v1771_v58, 256 }
 0x58c   :  { %1788 = vbcast.lane.b32.xlu1 %v1782_v12, 264  ;;  %1784 = vbcast.lane.b32.xlu0 %v1782_v12, 256 }
 0x590   :  { %1795 = vbcast.lane.b32.xlu0 %v1793_v13, 256  ;;  %1311 = vbcast.lane.b32.xlu1 %v1309_v14, 256 }
 0x594   :  { %1799 = vbcast.lane.b32.xlu0 %v1793_v13, 264  ;;  %1315 = vbcast.lane.b32.xlu1 %v1309_v14, 264  ;;  %v1496_v14 = vrot.slane %v1153_v50, %v4489_v5 }
 0x598   :  { %1806 = vbcast.lane.b32.xlu0 %v1804_v15, 256  ;;  %1326 = vbcast.lane.b32.xlu1 %v1320_v16, 264 }
 0x59c   :  { %1810 = vbcast.lane.b32.xlu0 %v1804_v15, 264  ;;  %1337 = vbcast.lane.b32.xlu1 %v1331_v17, 264 }
 0x5a0   :  { %1817 = vbcast.lane.b32.xlu0 %v1815_v18, 256  ;;  %1348 = vbcast.lane.b32.xlu1 %v1342_v19, 264 }
 0x5a4   :  { %1821 = vbcast.lane.b32.xlu0 %v1815_v18, 264  ;;  %1359 = vbcast.lane.b32.xlu1 %v1353_v20, 264 }
 0x5a8   :  { %1370 = vbcast.lane.b32.xlu1 %v1364_v21, 264  ;;  %1300 = vbcast.lane.b32.xlu0 %v1298_v23, 256 }
 0x5ac   :  { %1381 = vbcast.lane.b32.xlu1 %v1375_v26, 264  ;;  %1304 = vbcast.lane.b32.xlu0 %v1298_v23, 264 }
 0x5b0   :  { %1656 = vbcast.lane.b32.xlu1 %v1650_v27, 264  ;;  %1322 = vbcast.lane.b32.xlu0 %v1320_v16, 256 }
 0x5b4   :  { %1667 = vbcast.lane.b32.xlu1 %v1661_v28, 264  ;;  %1333 = vbcast.lane.b32.xlu0 %v1331_v17, 256  ;;  %v1507_v17 = vrot.slane %v1153_v50, %v4492_v7 }
 0x5b8   :  { %1678 = vbcast.lane.b32.xlu1 %v1672_v29, 264  ;;  %1344 = vbcast.lane.b32.xlu0 %v1342_v19, 256 }
 0x5bc   :  { %1689 = vbcast.lane.b32.xlu1 %v1683_v22, 264  ;;  %1355 = vbcast.lane.b32.xlu0 %v1353_v20, 256  ;;  %v1518_v20 = vrot.slane %v1153_v50, %v4495_v9 }
 0x5c0   :  { %1700 = vbcast.lane.b32.xlu1 %v1694_v30, 264  ;;  %1366 = vbcast.lane.b32.xlu0 %v1364_v21, 256  ;;  %v4596_v21 = vpop.f32.mrf.mxu1 }
 0x5c1   :  { %6456 = vst [vmem:[#allocation15_spill] sm:$0xff] %v4596_v21 }
 0x5c4   :  { %1711 = vbcast.lane.b32.xlu1 %v1705_v31, 264  ;;  %1377 = vbcast.lane.b32.xlu0 %v1375_v26, 256  ;;  %v1102_v26 = vpop.f32.mrf.mxu1 }
 0x5c8   :  { %1722 = vbcast.lane.b32.xlu1 %v1716_v32, 264  ;;  %1652 = vbcast.lane.b32.xlu0 %v1650_v27, 256 }
 0x5cc   :  { %1733 = vbcast.lane.b32.xlu1 %v1727_v35, 264  ;;  %1663 = vbcast.lane.b32.xlu0 %v1661_v28, 256 }
 0x5ce   :  { %v4532_v37 = vpop.permute.xlu1 %1392  ;;  %v4534_v38 = vpop.permute.xlu0 %1388 }
 0x5d0   :  { %1674 = vbcast.lane.b32.xlu0 %v1672_v29, 256  ;;  %1568 = vbcast.lane.b32.xlu1 %v1562_v36, 264  ;;  %v1540_v29 = vrot.slane %v1153_v50, %v4501_v49  ;;  %v1167_v50 = vld [vmem:[%s6434_s8] sm:$0xff] }
 0x5d2   :  { %v4536_v39 = vpop.permute.xlu1 %1403  ;;  %v4538_v40 = vpop.permute.xlu0 %1399 }
 0x5d4   :  { %1685 = vbcast.lane.b32.xlu0 %v1683_v22, 256  ;;  %1579 = vbcast.lane.b32.xlu1 %v1573_v41, 264  ;;  %v3976_v22 = vpop.f32.mrf.mxu1 }
 0x5d6   :  { %v4541_v42 = vpop.permute.xlu1 %1414  ;;  %v4543_v43 = vpop.permute.xlu0 %1410 }
 0x5d8   :  { %1696 = vbcast.lane.b32.xlu0 %v1694_v30, 256  ;;  %1590 = vbcast.lane.b32.xlu1 %v1584_v63, 264  ;;  %v4604_v30 = vmax.f32 %v3976_v22, 0.0 }
 0x5da   :  { %v4546_v44 = vpop.permute.xlu1 %1425  ;;  %v4548_v45 = vpop.permute.xlu0 %1421  ;;  %v4611_v34 = vrot.slane %v4604_v30, %v4483_v62  ;;  %v4659_v21 = vrot.slane %v4604_v30, %v4495_v9 }
 0x5dc   :  { %1707 = vbcast.lane.b32.xlu0 %v1705_v31, 256  ;;  %1601 = vbcast.lane.b32.xlu1 %v1595_v46, 264 }
 0x5de   :  { %v4551_v60 = vpop.permute.xlu1 %1436  ;;  %v4553_v61 = vpop.permute.xlu0 %1432 }
 0x5e0   :  { %1718 = vbcast.lane.b32.xlu0 %v1716_v32, 256  ;;  %1612 = vbcast.lane.b32.xlu1 %v1606_v0, 264 }
 0x5e2   :  { %v4556_v1 = vpop.permute.xlu1 %1447  ;;  %v4558_v2 = vpop.permute.xlu0 %1443 }
 0x5e4   :  { %1729 = vbcast.lane.b32.xlu0 %v1727_v35, 256  ;;  %1623 = vbcast.lane.b32.xlu1 %v1617_v4, 264 }
 0x5e6   :  { %v4561_v6 = vpop.permute.xlu1 %1458  ;;  %v4563_v8 = vpop.permute.xlu0 %1454 }
 0x5e8   :  { %1634 = vbcast.lane.b32.xlu1 %v1628_v10, 264  ;;  %1564 = vbcast.lane.b32.xlu0 %v1562_v36, 256 }
 0x5ea   :  { %v4566_v52 = vpop.permute.xlu1 %1469  ;;  %v4568_v53 = vpop.permute.xlu0 %1465 }
 0x5ec   :  { %1645 = vbcast.lane.b32.xlu1 %v1639_v54, 264  ;;  %1575 = vbcast.lane.b32.xlu0 %v1573_v41, 256 }
 0x5ee   :  { %v4571_v55 = vpop.permute.xlu1 %1744  ;;  %v4573_v56 = vpop.permute.xlu0 %1740 }
 0x5ef   :  { %6446 = vst [vmem:[#allocation5_spill] sm:$0xff] %v4571_v55  ;;  %6447 = vst [vmem:[#allocation6_spill] sm:$0xff] %v4573_v56 }
 0x5f0   :  { %1586 = vbcast.lane.b32.xlu0 %v1584_v63, 256  ;;  %1480 = vbcast.lane.b32.xlu1 %v1474_v57, 264 }
 0x5f2   :  { %v4576_v58 = vpop.permute.xlu1 %1755  ;;  %v4578_v59 = vpop.permute.xlu0 %1751 }
 0x5f3   :  { %6448 = vst [vmem:[#allocation7_spill] sm:$0xff] %v4576_v58  ;;  %6449 = vst [vmem:[#allocation8_spill] sm:$0xff] %v4578_v59 }
 0x5f4   :  { %1597 = vbcast.lane.b32.xlu0 %v1595_v46, 256  ;;  %1491 = vbcast.lane.b32.xlu1 %v1485_v11, 264  ;;  %v4624_v46 = vrot.slane %v4604_v30, %v4486_v3 }
 0x5f6   :  { %v4581_v12 = vpop.permute.xlu1 %1766  ;;  %v4583_v13 = vpop.permute.xlu0 %1762 }
 0x5f7   :  { %6450 = vst [vmem:[#allocation9_spill] sm:$0xff] %v4581_v12  ;;  %6451 = vst [vmem:[#allocation10_spill] sm:$0xff] %v4583_v13 }
 0x5f8   :  { %1608 = vbcast.lane.b32.xlu0 %v1606_v0, 256  ;;  %1502 = vbcast.lane.b32.xlu1 %v1496_v14, 264 }
 0x5fa   :  { %v4586_v15 = vpop.permute.xlu1 %1777  ;;  %v4588_v16 = vpop.permute.xlu0 %1773 }
 0x5fb   :  { %6452 = vst [vmem:[#allocation11_spill] sm:$0xff] %v4586_v15  ;;  %6453 = vst [vmem:[#allocation12_spill] sm:$0xff] %v4588_v16 }
 0x5fc   :  { %1619 = vbcast.lane.b32.xlu0 %v1617_v4, 256  ;;  %1513 = vbcast.lane.b32.xlu1 %v1507_v17, 264 }
 0x5fe   :  { %v4591_v18 = vpop.permute.xlu1 %1788  ;;  %v4593_v19 = vpop.permute.xlu0 %1784 }
 0x5ff   :  { %6454 = vst [vmem:[#allocation13_spill] sm:$0xff] %v4591_v18  ;;  %6455 = vst [vmem:[#allocation14_spill] sm:$0xff] %v4593_v19  ;;  %v1176_v19 = vld [vmem:[%s6434_s8 + $0x48] sm:$0xff] }
 0x600   :  { %1630 = vbcast.lane.b32.xlu0 %v1628_v10, 256  ;;  %1524 = vbcast.lane.b32.xlu1 %v1518_v20, 264  ;;  %v4633_v10 = vrot.slane %v4604_v30, %v4489_v5 }
 0x602   :  { %v4598_v23 = vpop.permute.xlu0 %1795  ;;  %v1312_v24 = vpop.permute.xlu1 %1311 }
 0x603   :  { %6457 = vst [vmem:[#allocation16_spill] sm:$0xff] %v4598_v23 }
 0x604   :  { %1641 = vbcast.lane.b32.xlu0 %v1639_v54, 256  ;;  %1535 = vbcast.lane.b32.xlu1 %v1529_v25, 264 }
 0x606   :  { %v4601_v27 = vpop.permute.xlu0 %1799  ;;  %v1316_v28 = vpop.permute.xlu1 %1315 }
 0x607   :  { %6458 = vst [vmem:[#allocation17_spill] sm:$0xff] %v4601_v27  ;;  %v4667_v27 = vmax.f32 %v1102_v26, 0.0  ;;  %v1173_v26 = vld [vmem:[%s6434_s8 + $0x30] sm:$0xff] }
 0x608   :  { %1546 = vbcast.lane.b32.xlu1 %v1540_v29, 264  ;;  %1476 = vbcast.lane.b32.xlu0 %v1474_v57, 256  ;;  %v4643_v57 = vrot.slane %v4604_v30, %v4492_v7 }
 0x60a   :  { %v4606_v31 = vpop.permute.xlu0 %1806  ;;  %v1327_v32 = vpop.permute.xlu1 %1326 }
 0x60b   :  { %6459 = vst [vmem:[#allocation18_spill] sm:$0xff] %v4606_v31 }
 0x60c   :  { %1557 = vbcast.lane.b32.xlu1 %v1551_v33, 264  ;;  %1487 = vbcast.lane.b32.xlu0 %v1485_v11, 256  ;;  %v1169_v11 = vld [vmem:[%s6434_s8 + $0x10] sm:$0xff] }
 0x60e   :  { %v4613_v35 = vpop.permute.xlu0 %1810  ;;  %v4615_v36 = vpop.permute.xlu1 %1337 }
 0x60f   :  { %6460 = vst [vmem:[#allocation19_spill] sm:$0xff] %v4613_v35 }
 0x610   :  { %2482 = vbcast.lane.b32.xlu1 %v4611_v34, 256  ;;  %1498 = vbcast.lane.b32.xlu0 %v1496_v14, 256  ;;  %v1168_v14 = vld [vmem:[%s6434_s8 + $0x8] sm:$0xff] }
 0x612   :  { %v4618_v41 = vpop.permute.xlu0 %1817  ;;  %v4620_v63 = vpop.permute.xlu1 %1348 }
 0x613   :  { %6461 = vst [vmem:[#allocation20_spill] sm:$0xff] %v4618_v41  ;;  %v2001_v41 = vmul.f32 %v1312_v24, %v1169_v11  ;;  %v1172_v24 = vld [vmem:[%s6434_s8 + $0x28] sm:$0xff] }
 0x614   :  { %2493 = vbcast.lane.b32.xlu1 %v4624_v46, 256  ;;  %1509 = vbcast.lane.b32.xlu0 %v1507_v17, 256 }
 0x616   :  { %v4627_v0 = vpop.permute.xlu0 %1821  ;;  %v4629_v4 = vpop.permute.xlu1 %1359 }
 0x617   :  { %6462 = vst [vmem:[#allocation21_spill] sm:$0xff] %v4627_v0 }
 0x618   :  { %2504 = vbcast.lane.b32.xlu1 %v4633_v10, 256  ;;  %1520 = vbcast.lane.b32.xlu0 %v1518_v20, 256  ;;  %v1170_v20 = vld [vmem:[%s6434_s8 + $0x18] sm:$0xff] }
 0x61a   :  { %v4636_v48 = vpop.permute.xlu1 %1370  ;;  %v1301_v54 = vpop.permute.xlu0 %1300 }
 0x61b   :  { %v1999_v17 = vmul.f32 %v1301_v54, %v1167_v50  ;;  %v2002_v50 = vmul.f32 %v1316_v28, %v1170_v20  ;;  %v2131_v28 = vsel %vm2127_vm2, %v2001_v41, 0.0 }
 0x61c   :  { %2515 = vbcast.lane.b32.xlu1 %v4643_v57, 256  ;;  %1531 = vbcast.lane.b32.xlu0 %v1529_v25, 256  ;;  %v1171_v25 = vld [vmem:[%s6434_s8 + $0x20] sm:$0xff] }
 0x61d   :  { %v2128_v54 = vsel %vm2127_vm2, %v1999_v17, 0.0 }
 0x61e   :  { %v4655_v22 = vpop.permute.xlu1 %1381  ;;  %v1305_v0 = vpop.permute.xlu0 %1304 }
 0x61f   :  { %v2000_v35 = vmul.f32 %v1305_v0, %v1168_v14 }
 0x620   :  { %2526 = vbcast.lane.b32.xlu1 %v4659_v21, 256  ;;  %1542 = vbcast.lane.b32.xlu0 %v1540_v29, 256  ;;  %v4676_v29 = vrot.slane %v4604_v30, %v4498_v47 }
 0x621   :  { %v2129_v31 = vsel %vm2127_vm2, %v2000_v35, 0.0  ;;  %v2004_v35 = vmul.f32 %v1327_v32, %v1172_v24  ;;  %v1175_v24 = vld [vmem:[%s6434_s8 + $0x40] sm:$0xff] }
 0x622   :  { %v2130_v0 = vadd.f32 %v2129_v31, %v2128_v54  ;;  %v4672_v11 = vpop.permute.xlu1 %1656  ;;  %v1323_v14 = vpop.permute.xlu0 %1322  ;;  %v2133_v31 = vsel %vm2127_vm2, %v2002_v50, 0.0  ;;  %v1174_v54 = vld [vmem:[%s6434_s8 + $0x38] sm:$0xff] }
 0x623   :  { %v2003_v20 = vmul.f32 %v1323_v14, %v1171_v25  ;;  %v4691_v25 = vrot.slane %v4604_v30, %v4501_v49 }
 0x624   :  { %v2132_v17 = vadd.f32 %v2131_v28, %v2130_v0  ;;  %2537 = vbcast.lane.b32.xlu1 %v4676_v29, 256  ;;  %1553 = vbcast.lane.b32.xlu0 %v1551_v33, 256  ;;  %v1826_v33 = vrot.slane %v4667_v27, %v4483_v62  ;;  %v1112_v0 = vpop.f32.mrf.mxu1  ;;  %v2137_v28 = vsel %vm2127_vm2, %v2004_v35, 0.0 }
 0x625   :  { %v2135_v14 = vsel %vm2127_vm2, %v2003_v20, 0.0 }
 0x626   :  { %v2134_v23 = vadd.f32 %v2133_v31, %v2132_v17  ;;  %v4687_v18 = vpop.permute.xlu1 %1667  ;;  %v1334_v41 = vpop.permute.xlu0 %1333  ;;  %v2006_v17 = vmul.f32 %v4615_v36, %v1174_v54  ;;  %v4702_v31 = vmax.f32 %v1112_v0, 0.0  ;;  %v1177_v36 = vld [vmem:[%s6434_s8 + $0x50] sm:$0xff]  ;;  %v2008_v0 = vmul.f32 %v4620_v63, %v1176_v19  ;;  %v1179_v19 = vld [vmem:[%s6434_s8 + $0x60] sm:$0xff] }
 0x627   :  { %v2005_v50 = vmul.f32 %v1334_v41, %v1173_v26  ;;  %v4711_v41 = vrot.slane %v4604_v30, %v4504_v51  ;;  %v1178_v30 = vld [vmem:[%s6434_s8 + $0x58] sm:$0xff] }
 0x628   :  { %v2136_v32 = vadd.f32 %v2135_v14, %v2134_v23  ;;  %2548 = vbcast.lane.b32.xlu1 %v4691_v25, 256  ;;  %1828 = vbcast.lane.b32.xlu0 %v1826_v33, 256  ;;  %v2141_v54 = vsel %vm2127_vm2, %v2006_v17, 0.0  ;;  %v2145_v63 = vsel %vm2127_vm2, %v2008_v0, 0.0 }
 0x629   :  { %v2139_v14 = vsel %vm2127_vm2, %v2005_v50, 0.0 }
 0x62a   :  { %v2138_v20 = vadd.f32 %v2137_v28, %v2136_v32  ;;  %v4707_v26 = vpop.permute.xlu1 %1678  ;;  %v1345_v23 = vpop.permute.xlu0 %1344 }
 0x62b   :  { %6463 = vst [vmem:[#allocation22_spill] sm:$0xff] %v4707_v26  ;;  %v2007_v15 = vmul.f32 %v1345_v23, %v1175_v24  ;;  %v4727_v24 = vrot.slane %v4702_v31, %v4483_v62 }
 0x62c   :  { %v2140_v35 = vadd.f32 %v2139_v14, %v2138_v20  ;;  %2559 = vbcast.lane.b32.xlu1 %v4711_v41, 256  ;;  %1832 = vbcast.lane.b32.xlu0 %v1826_v33, 264  ;;  %v1837_v33 = vrot.slane %v4667_v27, %v4486_v3  ;;  %v2010_v14 = vmul.f32 %v4629_v4, %v1178_v30  ;;  %v1181_v4 = vld [vmem:[%s6434_s8 + $0x70] sm:$0xff] }
 0x62d   :  { %v2143_v20 = vsel %vm2127_vm2, %v2007_v15, 0.0 }
 0x62e   :  { %v2142_v32 = vadd.f32 %v2141_v54, %v2140_v35  ;;  %v4723_v28 = vpop.permute.xlu1 %1689  ;;  %v1356_v50 = vpop.permute.xlu0 %1355  ;;  %v1180_v35 = vld [vmem:[%s6434_s8 + $0x68] sm:$0xff]  ;;  %v2149_v0 = vsel %vm2127_vm2, %v2010_v14, 0.0 }
 0x62f   :  { %6464 = vst [vmem:[#allocation23_spill] sm:$0xff] %v4723_v28  ;;  %v2009_v17 = vmul.f32 %v1356_v50, %v1177_v36  ;;  %v4745_v36 = vrot.slane %v4702_v31, %v4486_v3  ;;  %v2012_v30 = vmul.f32 %v4636_v48, %v1180_v35  ;;  %v1183_v48 = vld [vmem:[%s6434_s8 + $0x80] sm:$0xff] }
 0x630   :  { %v2144_v23 = vadd.f32 %v2143_v20, %v2142_v32  ;;  %2394 = vbcast.lane.b32.xlu1 %v4727_v24, 256  ;;  %1839 = vbcast.lane.b32.xlu0 %v1837_v33, 256 }
 0x631   :  { %v2147_v32 = vsel %vm2127_vm2, %v2009_v17, 0.0 }
 0x632   :  { %v2146_v54 = vadd.f32 %v2145_v63, %v2144_v23  ;;  %v4741_v16 = vpop.permute.xlu1 %1700  ;;  %v1367_v15 = vpop.permute.xlu0 %1366  ;;  %v1182_v23 = vld [vmem:[%s6434_s8 + $0x78] sm:$0xff] }
 0x633   :  { %6465 = vst [vmem:[#allocation24_spill] sm:$0xff] %v4741_v16  ;;  %v2011_v50 = vmul.f32 %v1367_v15, %v1179_v19  ;;  %v4761_v19 = vrot.slane %v4702_v31, %v4489_v5  ;;  %v2153_v15 = vsel %vm2127_vm2, %v2012_v30, 0.0 }
 0x634   :  { %v2148_v20 = vadd.f32 %v2147_v32, %v2146_v54  ;;  %2405 = vbcast.lane.b32.xlu1 %v4745_v36, 256  ;;  %1843 = vbcast.lane.b32.xlu0 %v1837_v33, 264  ;;  %v4765_v33 = vrot.slane %v4667_v27, %v4489_v5  ;;  %v2014_v32 = vmul.f32 %v4655_v22, %v1182_v23 }
 0x635   :  { %v2151_v14 = vsel %vm2127_vm2, %v2011_v50, 0.0  ;;  %v4781_v50 = vrot.slane %v4702_v31, %v4492_v7 }
 0x636   :  { %v2150_v63 = vadd.f32 %v2149_v0, %v2148_v20  ;;  %v4757_v12 = vpop.permute.xlu1 %1711  ;;  %v1378_v17 = vpop.permute.xlu0 %1377  ;;  %v2157_v22 = vsel %vm2127_vm2, %v2014_v32, 0.0 }
 0x637   :  { %6466 = vst [vmem:[#allocation25_spill] sm:$0xff] %v4757_v12  ;;  %v2013_v54 = vmul.f32 %v1378_v17, %v1181_v4  ;;  %v2015_v4 = vmul.f32 %v4534_v38, %v1183_v48  ;;  %v1184_v17 = vld [vmem:[%s6434_s8 + $0x88] sm:$0xff]  ;;  %v4797_v38 = vrot.slane %v4702_v31, %v4495_v9 }
 0x638   :  { %v2152_v35 = vadd.f32 %v2151_v14, %v2150_v63  ;;  %2416 = vbcast.lane.b32.xlu1 %v4761_v19, 256  ;;  %1850 = vbcast.lane.b32.xlu0 %v4765_v33, 256 }
 0x639   :  { %v2155_v63 = vsel %vm2127_vm2, %v2013_v54, 0.0  ;;  %v2016_v54 = vmul.f32 %v4532_v37, %v1184_v17  ;;  %v2159_v48 = vsel %vm2127_vm2, %v2015_v4, 0.0  ;;  %v1186_v17 = vld [vmem:[%s6434_s8 + $0x98] sm:$0xff] }
 0x63a   :  { %v2154_v20 = vadd.f32 %v2153_v15, %v2152_v35  ;;  %v4775_v0 = vpop.permute.xlu1 %1722  ;;  %v4777_v13 = vpop.permute.xlu0 %1652  ;;  %v1185_v15 = vld [vmem:[%s6434_s8 + $0x90] sm:$0xff] }
 0x63b   :  { %6467 = vst [vmem:[#allocation26_spill] sm:$0xff] %v4775_v0  ;;  %v2161_v37 = vsel %vm2127_vm2, %v2016_v54, 0.0  ;;  %v2017_v4 = vmul.f32 %v4538_v40, %v1185_v15  ;;  %v2018_v54 = vmul.f32 %v4536_v39, %v1186_v17  ;;  %v1187_v15 = vld [vmem:[%s6434_s8 + $0xa0] sm:$0xff]  ;;  %v4844_v39 = vrot.slane %v4702_v31, %v4504_v51 }
 0x63c   :  { %v2156_v30 = vadd.f32 %v2155_v63, %v2154_v20  ;;  %2427 = vbcast.lane.b32.xlu1 %v4781_v50, 256  ;;  %2486 = vbcast.lane.b32.xlu0 %v4611_v34, 264  ;;  %v4812_v63 = vrot.slane %v4702_v31, %v4498_v47  ;;  %v2019_v17 = vmul.f32 %v4543_v43, %v1187_v15  ;;  %v1189_v15 = vld [vmem:[%s6434_s8 + $0xb0] sm:$0xff] }
 0x63d   :  { %v2163_v40 = vsel %vm2127_vm2, %v2017_v4, 0.0  ;;  %v2165_v4 = vsel %vm2127_vm2, %v2018_v54, 0.0 }
 0x63e   :  { %v2158_v23 = vadd.f32 %v2157_v22, %v2156_v30  ;;  %v4791_v14 = vpop.permute.xlu1 %1733  ;;  %v4793_v35 = vpop.permute.xlu0 %1663  ;;  %v2167_v43 = vsel %vm2127_vm2, %v2019_v17, 0.0  ;;  %v2021_v17 = vmul.f32 %v4548_v45, %v1189_v15  ;;  %v1191_v15 = vld [vmem:[%s6434_s8 + $0xc0] sm:$0xff] }
 0x63f   :  { %6468 = vst [vmem:[#allocation27_spill] sm:$0xff] %v4791_v14 }
 0x640   :  { %v2160_v34 = vadd.f32 %v2159_v48, %v2158_v23  ;;  %2438 = vbcast.lane.b32.xlu1 %v4797_v38, 256  ;;  %2497 = vbcast.lane.b32.xlu0 %v4624_v46, 264  ;;  %v4827_v23 = vrot.slane %v4702_v31, %v4501_v49  ;;  %v3979_v48 = vpop.f32.mrf.mxu1  ;;  %v2171_v45 = vsel %vm2127_vm2, %v2021_v17, 0.0  ;;  %v2023_v17 = vmul.f32 %v4553_v61, %v1191_v15  ;;  %v1193_v15 = vld [vmem:[%s6434_s8 + $0xd0] sm:$0xff] }
 0x642   :  { %v4806_v32 = vpop.permute.xlu0 %1674  ;;  %v4808_v20 = vpop.permute.xlu1 %1568  ;;  %v2162_v30 = vadd.f32 %v2161_v37, %v2160_v34  ;;  %v2175_v61 = vsel %vm2127_vm2, %v2023_v17, 0.0  ;;  %v2025_v17 = vmul.f32 %v4558_v2, %v1193_v15 }
 0x643   :  { %6469 = vst [vmem:[#allocation28_spill] sm:$0xff] %v4806_v32  ;;  %v1122_v15 = vpop.f32.mrf.mxu1 }
 0x644   :  { %2449 = vbcast.lane.b32.xlu1 %v4812_v63, 256  ;;  %2508 = vbcast.lane.b32.xlu0 %v4633_v10, 264  ;;  %v2164_v34 = vadd.f32 %v2163_v40, %v2162_v30  ;;  %v4836_v10 = vmax.f32 %v3979_v48, 0.0  ;;  %v1188_v30 = vld [vmem:[%s6434_s8 + $0xa8] sm:$0xff]  ;;  %v2179_v2 = vsel %vm2127_vm2, %v2025_v17, 0.0 }
 0x645   :  { %v2020_v54 = vmul.f32 %v4541_v42, %v1188_v30  ;;  %v1190_v30 = vld [vmem:[%s6434_s8 + $0xb8] sm:$0xff] }
 0x646   :  { %v4821_v46 = vpop.permute.xlu0 %1685  ;;  %v4823_v22 = vpop.permute.xlu1 %1579  ;;  %v2166_v40 = vadd.f32 %v2165_v4, %v2164_v34  ;;  %v4874_v59 = vrot.slane %v4836_v10, %v4486_v3  ;;  %v4889_v55 = vrot.slane %v4836_v10, %v4489_v5  ;;  %v4904_v56 = vrot.slane %v4836_v10, %v4492_v7 }
 0x647   :  { %6470 = vst [vmem:[#allocation29_spill] sm:$0xff] %v4821_v46  ;;  %v2169_v42 = vsel %vm2127_vm2, %v2020_v54, 0.0  ;;  %v2022_v54 = vmul.f32 %v4546_v44, %v1190_v30  ;;  %v1192_v30 = vld [vmem:[%s6434_s8 + $0xc8] sm:$0xff]  ;;  %v4919_v14 = vrot.slane %v4836_v10, %v4495_v9  ;;  %v4947_v0 = vrot.slane %v4836_v10, %v4501_v49 }
 0x648   :  { %2460 = vbcast.lane.b32.xlu1 %v4827_v23, 256  ;;  %2519 = vbcast.lane.b32.xlu0 %v4643_v57, 264  ;;  %v4855_v57 = vrot.slane %v4836_v10, %v4483_v62  ;;  %v2168_v34 = vadd.f32 %v2167_v43, %v2166_v40 }
 0x649   :  { %v2173_v44 = vsel %vm2127_vm2, %v2022_v54, 0.0  ;;  %v2024_v54 = vmul.f32 %v4551_v60, %v1192_v30  ;;  %v1194_v30 = vld [vmem:[%s6434_s8 + $0xd8] sm:$0xff] }
 0x64a   :  { %v4838_v37 = vpop.permute.xlu0 %1696  ;;  %v4840_v58 = vpop.permute.xlu1 %1590  ;;  %v2170_v40 = vadd.f32 %v2169_v42, %v2168_v34 }
 0x64b   :  { %6471 = vst [vmem:[#allocation30_spill] sm:$0xff] %v4838_v37  ;;  %v2177_v60 = vsel %vm2127_vm2, %v2024_v54, 0.0  ;;  %v2026_v54 = vmul.f32 %v4556_v1, %v1194_v30  ;;  %v4964_v1 = vrot.slane %v4836_v10, %v4504_v51 }
 0x64c   :  { %2471 = vbcast.lane.b32.xlu1 %v4844_v39, 256  ;;  %2530 = vbcast.lane.b32.xlu0 %v4659_v21, 264  ;;  %v2172_v34 = vadd.f32 %v2171_v45, %v2170_v40 }
 0x64d   :  { %v2181_v17 = vsel %vm2127_vm2, %v2026_v54, 0.0 }
 0x64e   :  { %v4857_v48 = vpop.permute.xlu0 %1707  ;;  %v4859_v31 = vpop.permute.xlu1 %1601 }
 0x64f   :  { %6472 = vst [vmem:[#allocation31_spill] sm:$0xff] %v4857_v48  ;;  %v1196_v48 = vld [vmem:[%s6434_s8 + $0xe8] sm:$0xff] }
 0x650   :  { %2658 = vbcast.lane.b32.xlu1 %v4855_v57, 256  ;;  %2541 = vbcast.lane.b32.xlu0 %v4676_v29, 264  ;;  %v2028_v54 = vmul.f32 %v4561_v6, %v1196_v48 }
 0x652   :  { %v4868_v21 = vpop.permute.xlu0 %1718  ;;  %v4870_v4 = vpop.permute.xlu1 %1612  ;;  %v2185_v6 = vsel %vm2127_vm2, %v2028_v54, 0.0 }
 0x653   :  { %6473 = vst [vmem:[#allocation32_spill] sm:$0xff] %v4868_v21  ;;  %v1195_v21 = vld [vmem:[%s6434_s8 + $0xe0] sm:$0xff] }
 0x654   :  { %2669 = vbcast.lane.b32.xlu1 %v4874_v59, 256  ;;  %2552 = vbcast.lane.b32.xlu0 %v4691_v25, 264  ;;  %v2027_v30 = vmul.f32 %v4563_v8, %v1195_v21  ;;  %v1197_v21 = vld [vmem:[%s6434_s8 + $0xf0] sm:$0xff] }
 0x655   :  { %v2029_v48 = vmul.f32 %v4568_v53, %v1197_v21 }
 0x656   :  { %v4883_v29 = vpop.permute.xlu0 %1729  ;;  %v4885_v43 = vpop.permute.xlu1 %1623  ;;  %v2183_v8 = vsel %vm2127_vm2, %v2027_v30, 0.0  ;;  %v1198_v30 = vld [vmem:[%s6434_s8 + $0xf8] sm:$0xff] }
 0x657   :  { %6474 = vst [vmem:[#allocation33_spill] sm:$0xff] %v4883_v29  ;;  %v4932_v29 = vrot.slane %v4836_v10, %v4498_v47  ;;  %v2030_v54 = vmul.f32 %v4566_v52, %v1198_v30  ;;  %v2187_v53 = vsel %vm2127_vm2, %v2029_v48, 0.0 }
 0x658   :  { %2680 = vbcast.lane.b32.xlu1 %v4889_v55, 256  ;;  %2563 = vbcast.lane.b32.xlu0 %v4711_v41, 264  ;;  %v2174_v41 = vadd.f32 %v2173_v44, %v2172_v34 }
 0x659   :  { %v2189_v48 = vsel %vm2127_vm2, %v2030_v54, 0.0 }
 0x65a   :  { %v4898_v25 = vpop.permute.xlu1 %1634  ;;  %v4900_v42 = vpop.permute.xlu0 %1564 }
 0x65c   :  { %2691 = vbcast.lane.b32.xlu1 %v4904_v56, 256  ;;  %2398 = vbcast.lane.b32.xlu0 %v4727_v24, 264  ;;  %v2176_v24 = vadd.f32 %v2175_v61, %v2174_v41 }
 0x65e   :  { %v4913_v40 = vpop.permute.xlu1 %1645  ;;  %v4915_v45 = vpop.permute.xlu0 %1575 }
 0x660   :  { %2702 = vbcast.lane.b32.xlu1 %v4919_v14, 256  ;;  %2409 = vbcast.lane.b32.xlu0 %v4745_v36, 264  ;;  %v2178_v36 = vadd.f32 %v2177_v60, %v2176_v24  ;;  %v4956_v24 = vmax.f32 %v1122_v15, 0.0 }
 0x662   :  { %v4928_v34 = vpop.permute.xlu0 %1586  ;;  %v1481_v44 = vpop.permute.xlu1 %1480  ;;  %v4979_v10 = vrot.slane %v4956_v24, %v4483_v62  ;;  %v5009_v16 = vrot.slane %v4956_v24, %v4489_v5  ;;  %v5025_v52 = vrot.slane %v4956_v24, %v4492_v7 }
 0x664   :  { %2713 = vbcast.lane.b32.xlu1 %v4932_v29, 256  ;;  %2420 = vbcast.lane.b32.xlu0 %v4761_v19, 264  ;;  %v2180_v19 = vadd.f32 %v2179_v2, %v2178_v36 }
 0x666   :  { %v4941_v41 = vpop.permute.xlu0 %1597  ;;  %v4943_v61 = vpop.permute.xlu1 %1491 }
 0x668   :  { %2724 = vbcast.lane.b32.xlu1 %v4947_v0, 256  ;;  %2431 = vbcast.lane.b32.xlu0 %v4781_v50, 264  ;;  %v2182_v50 = vadd.f32 %v2181_v17, %v2180_v19  ;;  %v4994_v17 = vrot.slane %v4956_v24, %v4486_v3 }
 0x66a   :  { %v4958_v60 = vpop.permute.xlu0 %1608  ;;  %v4960_v12 = vpop.permute.xlu1 %1502 }
 0x66c   :  { %2735 = vbcast.lane.b32.xlu1 %v4964_v1, 256  ;;  %2442 = vbcast.lane.b32.xlu0 %v4797_v38, 264  ;;  %v2184_v38 = vadd.f32 %v2183_v8, %v2182_v50 }
 0x66e   :  { %v4973_v36 = vpop.permute.xlu0 %1619  ;;  %v4975_v2 = vpop.permute.xlu1 %1513 }
 0x670   :  { %2570 = vbcast.lane.b32.xlu1 %v4979_v10, 256  ;;  %2453 = vbcast.lane.b32.xlu0 %v4812_v63, 264  ;;  %v2186_v63 = vadd.f32 %v2185_v6, %v2184_v38  ;;  %v1200_v38 = vld [vmem:[%s6434_s8 + $0x108] sm:$0xff] }
 0x672   :  { %v4988_v15 = vpop.permute.xlu0 %1630  ;;  %v4990_v19 = vpop.permute.xlu1 %1524  ;;  %v2188_v21 = vadd.f32 %v2187_v53, %v2186_v63  ;;  %v1201_v63 = vld [vmem:[%s6434_s8 + $0x110] sm:$0xff]  ;;  %v1202_v53 = vld [vmem:[%s6434_s8 + $0x118] sm:$0xff] }
 0x674   :  { %2581 = vbcast.lane.b32.xlu1 %v4994_v17, 256  ;;  %2464 = vbcast.lane.b32.xlu0 %v4827_v23, 264  ;;  %v1199_v23 = vld [vmem:[%s6434_s8 + $0x100] sm:$0xff]  ;;  %v2190_v28 = vadd.f32 %v2189_v48, %v2188_v21  ;;  %v1204_v21 = vld [vmem:[%s6434_s8 + $0x128] sm:$0xff] }
 0x676   :  { %v5003_v50 = vpop.permute.xlu0 %1641  ;;  %v5005_v8 = vpop.permute.xlu1 %1535 }
 0x678   :  { %2592 = vbcast.lane.b32.xlu1 %v5009_v16, 256  ;;  %2475 = vbcast.lane.b32.xlu0 %v4844_v39, 264  ;;  %v2032_v39 = vmul.f32 %v1481_v44, %v1200_v38  ;;  %v5041_v44 = vrot.slane %v4956_v24, %v4495_v9 }
 0x67a   :  { %v5021_v6 = vpop.permute.xlu1 %1546  ;;  %v1477_v37 = vpop.permute.xlu0 %1476 }
 0x67b   :  { %v2031_v30 = vmul.f32 %v1477_v37, %v1199_v23  ;;  %v2034_v23 = vmul.f32 %v4943_v61, %v1202_v53  ;;  %v5058_v61 = vrot.slane %v4956_v24, %v4498_v47  ;;  %v2036_v53 = vmul.f32 %v4960_v12, %v1204_v21  ;;  %v3982_v21 = vpop.f32.mrf.mxu1 }
 0x67c   :  { %2603 = vbcast.lane.b32.xlu1 %v5025_v52, 256  ;;  %2662 = vbcast.lane.b32.xlu0 %v4855_v57, 264  ;;  %v2193_v57 = vsel %vm2127_vm2, %v2032_v39, 0.0  ;;  %v5075_v12 = vrot.slane %v4956_v24, %v4501_v49 }
 0x67d   :  { %v2191_v46 = vsel %vm2127_vm2, %v2031_v30, 0.0 }
 0x67e   :  { %v2192_v26 = vadd.f32 %v2191_v46, %v2190_v28  ;;  %v5037_v32 = vpop.permute.xlu1 %1557  ;;  %v1488_v37 = vpop.permute.xlu0 %1487  ;;  %v1203_v28 = vld [vmem:[%s6434_s8 + $0x120] sm:$0xff] }
 0x67f   :  { %v2033_v54 = vmul.f32 %v1488_v37, %v1201_v63  ;;  %v2197_v63 = vsel %vm2127_vm2, %v2034_v23, 0.0 }
 0x680   :  { %2614 = vbcast.lane.b32.xlu1 %v5041_v44, 256  ;;  %2673 = vbcast.lane.b32.xlu0 %v4874_v59, 264  ;;  %v2194_v46 = vadd.f32 %v2193_v57, %v2192_v26  ;;  %v1205_v26 = vld [vmem:[%s6434_s8 + $0x130] sm:$0xff] }
 0x681   :  { %v2195_v38 = vsel %vm2127_vm2, %v2033_v54, 0.0  ;;  %v1206_v54 = vld [vmem:[%s6434_s8 + $0x138] sm:$0xff] }
 0x682   :  { %v5054_v48 = vpop.permute.xlu1 %2482  ;;  %v1499_v30 = vpop.permute.xlu0 %1498  ;;  %v2196_v39 = vadd.f32 %v2195_v38, %v2194_v46  ;;  %v2201_v38 = vsel %vm2127_vm2, %v2036_v53, 0.0 }
 0x683   :  { %v2035_v59 = vmul.f32 %v1499_v30, %v1203_v28  ;;  %v2038_v30 = vmul.f32 %v4975_v2, %v1206_v54  ;;  %v5094_v54 = vrot.slane %v4956_v24, %v4504_v51 }
 0x684   :  { %2625 = vbcast.lane.b32.xlu1 %v5058_v61, 256  ;;  %2684 = vbcast.lane.b32.xlu0 %v4889_v55, 264  ;;  %v2198_v37 = vadd.f32 %v2197_v63, %v2196_v39  ;;  %v5081_v39 = vmax.f32 %v3982_v21, 0.0 }
 0x685   :  { %v2199_v57 = vsel %vm2127_vm2, %v2035_v59, 0.0  ;;  %v1207_v59 = vld [vmem:[%s6434_s8 + $0x140] sm:$0xff] }
 0x686   :  { %v5071_v28 = vpop.permute.xlu1 %2493  ;;  %v1510_v23 = vpop.permute.xlu0 %1509  ;;  %v2200_v46 = vadd.f32 %v2199_v57, %v2198_v37 }
 0x687   :  { %v2037_v55 = vmul.f32 %v1510_v23, %v1205_v26  ;;  %v1208_v26 = vld [vmem:[%s6434_s8 + $0x148] sm:$0xff]  ;;  %v2205_v23 = vsel %vm2127_vm2, %v2038_v30, 0.0 }
 0x688   :  { %2636 = vbcast.lane.b32.xlu1 %v5075_v12, 256  ;;  %2695 = vbcast.lane.b32.xlu0 %v4904_v56, 264  ;;  %v2202_v63 = vadd.f32 %v2201_v38, %v2200_v46  ;;  %v2040_v21 = vmul.f32 %v4990_v19, %v1208_v26  ;;  %v1209_v46 = vld [vmem:[%s6434_s8 + $0x150] sm:$0xff]  ;;  %v1210_v38 = vld [vmem:[%s6434_s8 + $0x158] sm:$0xff] }
 0x689   :  { %v2203_v37 = vsel %vm2127_vm2, %v2037_v55, 0.0  ;;  %v5105_v55 = vrot.slane %v5081_v39, %v4483_v62 }
 0x68a   :  { %v5090_v53 = vpop.permute.xlu1 %2504  ;;  %v1521_v2 = vpop.permute.xlu0 %1520  ;;  %v2204_v56 = vadd.f32 %v2203_v37, %v2202_v63  ;;  %v2209_v26 = vsel %vm2127_vm2, %v2040_v21, 0.0  ;;  %v2042_v37 = vmul.f32 %v5005_v8, %v1210_v38  ;;  %v5128_v8 = vrot.slane %v5081_v39, %v4486_v3 }
 0x68b   :  { %v2039_v57 = vmul.f32 %v1521_v2, %v1207_v59  ;;  %v1211_v2 = vld [vmem:[%s6434_s8 + $0x160] sm:$0xff] }
 0x68c   :  { %2647 = vbcast.lane.b32.xlu1 %v5094_v54, 256  ;;  %2706 = vbcast.lane.b32.xlu0 %v4919_v14, 264  ;;  %v2206_v24 = vadd.f32 %v2205_v23, %v2204_v56  ;;  %v2213_v38 = vsel %vm2127_vm2, %v2042_v37, 0.0  ;;  %v1215_v37 = vld [vmem:[%s6434_s8 + $0x180] sm:$0xff] }
 0x68d   :  { %v2207_v30 = vsel %vm2127_vm2, %v2039_v57, 0.0  ;;  %v1212_v57 = vld [vmem:[%s6434_s8 + $0x168] sm:$0xff] }
 0x68e   :  { %v5111_v19 = vpop.permute.xlu1 %2515  ;;  %v1532_v59 = vpop.permute.xlu0 %1531  ;;  %v2208_v63 = vadd.f32 %v2207_v30, %v2206_v24  ;;  %v2044_v30 = vmul.f32 %v5021_v6, %v1212_v57 }
 0x68f   :  { %v2041_v14 = vmul.f32 %v1532_v59, %v1209_v46  ;;  %v1213_v59 = vld [vmem:[%s6434_s8 + $0x170] sm:$0xff] }
 0x690   :  { %2834 = vbcast.lane.b32.xlu1 %v5105_v55, 256  ;;  %2717 = vbcast.lane.b32.xlu0 %v4932_v29, 264  ;;  %v2210_v56 = vadd.f32 %v2209_v26, %v2208_v63 }
 0x691   :  { %v2211_v23 = vsel %vm2127_vm2, %v2041_v14, 0.0  ;;  %v1214_v14 = vld [vmem:[%s6434_s8 + $0x178] sm:$0xff] }
 0x692   :  { %v5124_v46 = vpop.permute.xlu1 %2526  ;;  %v1543_v21 = vpop.permute.xlu0 %1542  ;;  %v2212_v24 = vadd.f32 %v2211_v23, %v2210_v56  ;;  %v2217_v23 = vsel %vm2127_vm2, %v2044_v30, 0.0 }
 0x693   :  { %v2043_v29 = vmul.f32 %v1543_v21, %v1211_v2  ;;  %v2046_v21 = vmul.f32 %v5037_v32, %v1214_v14 }
 0x694   :  { %2845 = vbcast.lane.b32.xlu1 %v5128_v8, 256  ;;  %2728 = vbcast.lane.b32.xlu0 %v4947_v0, 264  ;;  %v2214_v63 = vadd.f32 %v2213_v38, %v2212_v24  ;;  %v5148_v0 = vrot.slane %v5081_v39, %v4489_v5  ;;  %v1216_v24 = vld [vmem:[%s6434_s8 + $0x188] sm:$0xff]  ;;  %v2047_v38 = vmul.f32 %v4900_v42, %v1215_v37  ;;  %v1218_v42 = vld [vmem:[%s6434_s8 + $0x198] sm:$0xff] }
 0x695   :  { %v2215_v26 = vsel %vm2127_vm2, %v2043_v29, 0.0 }
 0x696   :  { %v5144_v6 = vpop.permute.xlu1 %2537  ;;  %v1554_v2 = vpop.permute.xlu0 %1553  ;;  %v2216_v56 = vadd.f32 %v2215_v26, %v2214_v63  ;;  %v5168_v63 = vrot.slane %v5081_v39, %v4492_v7  ;;  %v2221_v26 = vsel %vm2127_vm2, %v2046_v21, 0.0 }
 0x697   :  { %6475 = vst [vmem:[#allocation34_spill] sm:$0xff] %v5144_v6  ;;  %v2045_v57 = vmul.f32 %v1554_v2, %v1213_v59  ;;  %v1217_v59 = vld [vmem:[%s6434_s8 + $0x190] sm:$0xff]  ;;  %v2223_v2 = vsel %vm2127_vm2, %v2047_v38, 0.0 }
 0x698   :  { %2856 = vbcast.lane.b32.xlu1 %v5148_v0, 256  ;;  %2739 = vbcast.lane.b32.xlu0 %v4964_v1, 264  ;;  %v2218_v29 = vadd.f32 %v2217_v23, %v2216_v56  ;;  %v2048_v1 = vmul.f32 %v4808_v20, %v1216_v24  ;;  %v2049_v56 = vmul.f32 %v4915_v45, %v1217_v59  ;;  %v1220_v45 = vld [vmem:[%s6434_s8 + $0x1a8] sm:$0xff] }
 0x699   :  { %v2219_v6 = vsel %vm2127_vm2, %v2045_v57, 0.0  ;;  %v5188_v23 = vrot.slane %v5081_v39, %v4495_v9  ;;  %v2050_v24 = vmul.f32 %v4823_v22, %v1218_v42 }
 0x69a   :  { %v5162_v30 = vpop.permute.xlu1 %2548  ;;  %v5164_v32 = vpop.permute.xlu0 %1828  ;;  %v2220_v14 = vadd.f32 %v2219_v6, %v2218_v29  ;;  %v1219_v6 = vld [vmem:[%s6434_s8 + $0x1a0] sm:$0xff]  ;;  %v2227_v38 = vsel %vm2127_vm2, %v2049_v56, 0.0 }
 0x69b   :  { %v2051_v59 = vmul.f32 %v4928_v34, %v1219_v6  ;;  %v1222_v34 = vld [vmem:[%s6434_s8 + $0x1b8] sm:$0xff] }
 0x69c   :  { %2867 = vbcast.lane.b32.xlu1 %v5168_v63, 256  ;;  %2574 = vbcast.lane.b32.xlu0 %v4979_v10, 264  ;;  %v2222_v37 = vadd.f32 %v2221_v26, %v2220_v14  ;;  %v2225_v10 = vsel %vm2127_vm2, %v2048_v1, 0.0  ;;  %v1221_v14 = vld [vmem:[%s6434_s8 + $0x1b0] sm:$0xff]  ;;  %v2887_v26 = vrot.slane %v5081_v39, %v4498_v47 }
 0x69d   :  { %v2231_v56 = vsel %vm2127_vm2, %v2051_v59, 0.0  ;;  %v2053_v6 = vmul.f32 %v4941_v41, %v1221_v14  ;;  %v1225_v14 = vld [vmem:[%s6434_s8 + $0x1d0] sm:$0xff] }
 0x69e   :  { %v5182_v20 = vpop.permute.xlu1 %2559  ;;  %v5184_v57 = vpop.permute.xlu0 %1832  ;;  %v2224_v21 = vadd.f32 %v2223_v2, %v2222_v37  ;;  %v2229_v37 = vsel %vm2127_vm2, %v2050_v24, 0.0 }
 0x6a0   :  { %2878 = vbcast.lane.b32.xlu1 %v5188_v23, 256  ;;  %2585 = vbcast.lane.b32.xlu0 %v4994_v17, 264  ;;  %v2226_v29 = vadd.f32 %v2225_v10, %v2224_v21  ;;  %v2052_v17 = vmul.f32 %v4840_v58, %v1220_v45  ;;  %v1223_v21 = vld [vmem:[%s6434_s8 + $0x1c0] sm:$0xff] }
 0x6a1   :  { %v2055_v59 = vmul.f32 %v4958_v60, %v1223_v21  ;;  %v1226_v60 = vld [vmem:[%s6434_s8 + $0x1d8] sm:$0xff] }
 0x6a2   :  { %v5202_v1 = vpop.permute.xlu1 %2394  ;;  %v5204_v22 = vpop.permute.xlu0 %1839  ;;  %v2228_v42 = vadd.f32 %v2227_v38, %v2226_v29  ;;  %v2233_v45 = vsel %vm2127_vm2, %v2052_v17, 0.0  ;;  %v2054_v29 = vmul.f32 %v4859_v31, %v1222_v34  ;;  %v2235_v38 = vsel %vm2127_vm2, %v2053_v6, 0.0  ;;  %v1227_v6 = vld [vmem:[%s6434_s8 + $0x1e0] sm:$0xff] }
 0x6a3   :  { %v2898_v31 = vrot.slane %v5081_v39, %v4501_v49 }
 0x6a4   :  { %2889 = vbcast.lane.b32.xlu1 %v2887_v26, 256  ;;  %2596 = vbcast.lane.b32.xlu0 %v5009_v16, 264  ;;  %v2230_v2 = vadd.f32 %v2229_v37, %v2228_v42  ;;  %v1224_v16 = vld [vmem:[%s6434_s8 + $0x1c8] sm:$0xff] }
 0x6a6   :  { %v5219_v10 = vpop.permute.xlu1 %2405  ;;  %v5221_v24 = vpop.permute.xlu0 %1843  ;;  %v2232_v58 = vadd.f32 %v2231_v56, %v2230_v2  ;;  %v2239_v2 = vsel %vm2127_vm2, %v2055_v59, 0.0  ;;  %v2057_v56 = vmul.f32 %v4973_v36, %v1225_v14 }
 0x6a7   :  { %6476 = vst [vmem:[#allocation35_spill] sm:$0xff] %v5221_v24 }
 0x6a8   :  { %2893 = vbcast.lane.b32.xlu1 %v2887_v26, 264  ;;  %2607 = vbcast.lane.b32.xlu0 %v5025_v52, 264  ;;  %v2234_v41 = vadd.f32 %v2233_v45, %v2232_v58  ;;  %v2237_v26 = vsel %vm2127_vm2, %v2054_v29, 0.0  ;;  %v2056_v52 = vmul.f32 %v4870_v4, %v1224_v16  ;;  %v2058_v29 = vmul.f32 %v4885_v43, %v1226_v60 }
 0x6a9   :  { %v2243_v16 = vsel %vm2127_vm2, %v2057_v56, 0.0  ;;  %v2909_v43 = vrot.slane %v5081_v39, %v4504_v51 }
 0x6aa   :  { %v5234_v42 = vpop.permute.xlu1 %2416  ;;  %v5236_v37 = vpop.permute.xlu0 %1850  ;;  %v2236_v17 = vadd.f32 %v2235_v38, %v2234_v41  ;;  %v2241_v45 = vsel %vm2127_vm2, %v2056_v52, 0.0  ;;  %v2059_v41 = vmul.f32 %v4988_v15, %v1227_v6  ;;  %v1229_v38 = vld [vmem:[%s6434_s8 + $0x1f0] sm:$0xff]  ;;  %v1230_v15 = vld [vmem:[%s6434_s8 + $0x1f8] sm:$0xff] }
 0x6ab   :  { %6477 = vst [vmem:[#allocation36_spill] sm:$0xff] %v5236_v37 }
 0x6ac   :  { %2900 = vbcast.lane.b32.xlu1 %v2898_v31, 256  ;;  %2618 = vbcast.lane.b32.xlu0 %v5041_v44, 264  ;;  %v2238_v34 = vadd.f32 %v2237_v26, %v2236_v17  ;;  %v1228_v44 = vld [vmem:[%s6434_s8 + $0x1e8] sm:$0xff]  ;;  %v1132_v26 = vpop.f32.mrf.mxu1  ;;  %v2247_v60 = vsel %vm2127_vm2, %v2059_v41, 0.0 }
 0x6ae   :  { %v5251_v21 = vpop.permute.xlu1 %2427  ;;  %v5253_v58 = vpop.permute.xlu0 %2486  ;;  %v2240_v4 = vadd.f32 %v2239_v2, %v2238_v34  ;;  %v2061_v34 = vmul.f32 %v5003_v50, %v1229_v38  ;;  %v5280_v2 = vmax.f32 %v1132_v26, 0.0  ;;  %v1232_v50 = vld [vmem:[%s6434_s8 + $0x208] sm:$0xff] }
 0x6b0   :  { %2904 = vbcast.lane.b32.xlu1 %v2898_v31, 264  ;;  %2629 = vbcast.lane.b32.xlu0 %v5058_v61, 264  ;;  %v2242_v36 = vadd.f32 %v2241_v45, %v2240_v4  ;;  %v2245_v31 = vsel %vm2127_vm2, %v2058_v29, 0.0  ;;  %v2060_v61 = vmul.f32 %v4898_v25, %v1228_v44  ;;  %v2062_v4 = vmul.f32 %v4913_v40, %v1230_v15 }
 0x6b1   :  { %v2251_v29 = vsel %vm2127_vm2, %v2061_v34, 0.0  ;;  %v5303_v41 = vrot.slane %v5280_v2, %v4483_v62 }
 0x6b2   :  { %v5266_v59 = vpop.permute.xlu1 %2438  ;;  %v5268_v14 = vpop.permute.xlu0 %2497  ;;  %v2244_v17 = vadd.f32 %v2243_v16, %v2242_v36  ;;  %v2249_v6 = vsel %vm2127_vm2, %v2060_v61, 0.0  ;;  %v2253_v38 = vsel %vm2127_vm2, %v2062_v4, 0.0  ;;  %v6478_v4 = vld [vmem:[#allocation28_spill] sm:$0xff] }
 0x6b4   :  { %2911 = vbcast.lane.b32.xlu1 %v2909_v43, 256  ;;  %2640 = vbcast.lane.b32.xlu0 %v5075_v12, 264  ;;  %v2246_v52 = vadd.f32 %v2245_v31, %v2244_v17  ;;  %v1231_v12 = vld [vmem:[%s6434_s8 + $0x200] sm:$0xff]  ;;  %v1234_v17 = vld [vmem:[%s6434_s8 + $0x218] sm:$0xff] }
 0x6b5   :  { %v2063_v44 = vmul.f32 %v4777_v13, %v1231_v12  ;;  %v1236_v12 = vld [vmem:[%s6434_s8 + $0x228] sm:$0xff] }
 0x6b6   :  { %v5282_v39 = vpop.permute.xlu1 %2449  ;;  %v5284_v56 = vpop.permute.xlu0 %2508  ;;  %v2248_v25 = vadd.f32 %v2247_v60, %v2246_v52  ;;  %v1235_v60 = vld [vmem:[%s6434_s8 + $0x220] sm:$0xff] }
 0x6b7   :  { %v2255_v31 = vsel %vm2127_vm2, %v2063_v44, 0.0  ;;  %v5344_v44 = vrot.slane %v5280_v2, %v4489_v5 }
 0x6b8   :  { %2915 = vbcast.lane.b32.xlu1 %v2909_v43, 264  ;;  %2651 = vbcast.lane.b32.xlu0 %v5094_v54, 264  ;;  %v2250_v45 = vadd.f32 %v2249_v6, %v2248_v25  ;;  %v1233_v54 = vld [vmem:[%s6434_s8 + $0x210] sm:$0xff]  ;;  %v2064_v43 = vmul.f32 %v4672_v11, %v1232_v50  ;;  %v5323_v11 = vrot.slane %v5280_v2, %v4486_v3 }
 0x6b9   :  { %v2065_v61 = vmul.f32 %v4793_v35, %v1233_v54  ;;  %v2066_v35 = vmul.f32 %v4687_v18, %v1234_v17  ;;  %v1237_v18 = vld [vmem:[%s6434_s8 + $0x230] sm:$0xff]  ;;  %v1238_v17 = vld [vmem:[%s6434_s8 + $0x238] sm:$0xff] }
 0x6ba   :  { %v5297_v36 = vpop.permute.xlu1 %2460  ;;  %v5299_v16 = vpop.permute.xlu0 %2519  ;;  %v2252_v40 = vadd.f32 %v2251_v29, %v2250_v45  ;;  %v2257_v34 = vsel %vm2127_vm2, %v2064_v43, 0.0  ;;  %v2067_v45 = vmul.f32 %v6478_v4, %v1235_v60 }
 0x6bb   :  { %v2259_v6 = vsel %vm2127_vm2, %v2065_v61, 0.0  ;;  %v2261_v54 = vsel %vm2127_vm2, %v2066_v35, 0.0  ;;  %v6481_v61 = vld [vmem:[#allocation29_spill] sm:$0xff]  ;;  %v5363_v35 = vrot.slane %v5280_v2, %v4492_v7 }
 0x6bc   :  { %2746 = vbcast.lane.b32.xlu1 %v5303_v41, 256  ;;  %1854 = vbcast.lane.b32.xlu0 %v4765_v33, 264  ;;  %v2254_v13 = vadd.f32 %v2253_v38, %v2252_v40  ;;  %v1859_v33 = vrot.slane %v4667_v27, %v4492_v7  ;;  %v6480_v38 = vld [vmem:[#allocation22_spill] sm:$0xff] }
 0x6bd   :  { %v2068_v43 = vmul.f32 %v6480_v38, %v1236_v12 }
 0x6be   :  { %v5317_v26 = vpop.permute.xlu1 %2471  ;;  %v5319_v15 = vpop.permute.xlu0 %2530  ;;  %v2256_v52 = vadd.f32 %v2255_v31, %v2254_v13  ;;  %v2263_v31 = vsel %vm2127_vm2, %v2067_v45, 0.0 }
 0x6bf   :  { %v2265_v12 = vsel %vm2127_vm2, %v2068_v43, 0.0  ;;  %v5383_v43 = vrot.slane %v5280_v2, %v4495_v9 }
 0x6c0   :  { %2757 = vbcast.lane.b32.xlu1 %v5323_v11, 256  ;;  %1861 = vbcast.lane.b32.xlu0 %v1859_v33, 256  ;;  %v2258_v25 = vadd.f32 %v2257_v34, %v2256_v52  ;;  %v2069_v52 = vmul.f32 %v6481_v61, %v1237_v18  ;;  %v1240_v18 = vld [vmem:[%s6434_s8 + $0x248] sm:$0xff] }
 0x6c2   :  { %v5338_v50 = vpop.permute.xlu1 %2658  ;;  %v5340_v29 = vpop.permute.xlu0 %2541  ;;  %v2260_v40 = vadd.f32 %v2259_v6, %v2258_v25  ;;  %v6483_v6 = vld [vmem:[#allocation23_spill] sm:$0xff] }
 0x6c3   :  { %6479 = vst [vmem:[#allocation28_spill] sm:$0xff] %v5338_v50  ;;  %v2070_v4 = vmul.f32 %v6483_v6, %v1238_v17  ;;  %v4019_v6 = vld [vmem:[%s6434_s8] sm:$0xff] }
 0x6c4   :  { %2768 = vbcast.lane.b32.xlu1 %v5344_v44, 256  ;;  %1865 = vbcast.lane.b32.xlu0 %v1859_v33, 264  ;;  %v2262_v13 = vadd.f32 %v2261_v54, %v2260_v40  ;;  %v1239_v33 = vld [vmem:[%s6434_s8 + $0x240] sm:$0xff]  ;;  %v2267_v40 = vsel %vm2127_vm2, %v2069_v52, 0.0  ;;  %v6484_v54 = vld [vmem:[#allocation30_spill] sm:$0xff]  ;;  %v1242_v52 = vld [vmem:[%s6434_s8 + $0x258] sm:$0xff] }
 0x6c5   :  { %v2071_v38 = vmul.f32 %v6484_v54, %v1239_v33  ;;  %v3093_v54 = vmul.f32 %v4019_v6, %v5202_v1  ;;  %v4020_v1 = vld [vmem:[%s6434_s8 + $0x10] sm:$0xff] }
 0x6c6   :  { %v5357_v60 = vpop.permute.xlu1 %2669  ;;  %v5359_v34 = vpop.permute.xlu0 %2552  ;;  %v2264_v25 = vadd.f32 %v2263_v31, %v2262_v13  ;;  %v2269_v31 = vsel %vm2127_vm2, %v2070_v4, 0.0  ;;  %v6487_v4 = vld [vmem:[#allocation31_spill] sm:$0xff] }
 0x6c7   :  { %6482 = vst [vmem:[#allocation22_spill] sm:$0xff] %v5357_v60 }
 0x6c8   :  { %2779 = vbcast.lane.b32.xlu1 %v5363_v35, 256  ;;  %2838 = vbcast.lane.b32.xlu0 %v5105_v55, 264  ;;  %v2266_v45 = vadd.f32 %v2265_v12, %v2264_v25  ;;  %v1241_v55 = vld [vmem:[%s6434_s8 + $0x250] sm:$0xff]  ;;  %v6486_v25 = vld [vmem:[#allocation24_spill] sm:$0xff] }
 0x6c9   :  { %v2072_v12 = vmul.f32 %v6486_v25, %v1240_v18 }
 0x6ca   :  { %v5377_v61 = vpop.permute.xlu1 %2680  ;;  %v5379_v13 = vpop.permute.xlu0 %2563  ;;  %v2268_v17 = vadd.f32 %v2267_v40, %v2266_v45  ;;  %v2271_v45 = vsel %vm2127_vm2, %v2071_v38, 0.0  ;;  %v2073_v40 = vmul.f32 %v6487_v4, %v1241_v55  ;;  %v3095_v38 = vmul.f32 %v4020_v1, %v5219_v10  ;;  %v4021_v55 = vld [vmem:[%s6434_s8 + $0x8] sm:$0xff]  ;;  %v6490_v1 = vld [vmem:[#allocation32_spill] sm:$0xff] }
 0x6cb   :  { %6485 = vst [vmem:[#allocation29_spill] sm:$0xff] %v5377_v61  ;;  %v5405_v61 = vrot.slane %v5280_v2, %v4498_v47  ;;  %v2273_v4 = vsel %vm2127_vm2, %v2072_v12, 0.0 }
 0x6cc   :  { %2790 = vbcast.lane.b32.xlu1 %v5383_v43, 256  ;;  %2849 = vbcast.lane.b32.xlu0 %v5128_v8, 264  ;;  %v2270_v33 = vadd.f32 %v2269_v31, %v2268_v17  ;;  %v1243_v8 = vld [vmem:[%s6434_s8 + $0x260] sm:$0xff] }
 0x6cd   :  { %v6489_v31 = vld [vmem:[#allocation25_spill] sm:$0xff] }
 0x6ce   :  { %v5401_v18 = vpop.permute.xlu1 %2691  ;;  %v2399_v25 = vpop.permute.xlu0 %2398  ;;  %v2272_v17 = vadd.f32 %v2271_v45, %v2270_v33  ;;  %v2074_v60 = vmul.f32 %v6489_v31, %v1242_v52  ;;  %v1244_v52 = vld [vmem:[%s6434_s8 + $0x268] sm:$0xff]  ;;  %v3221_v45 = vsel %vm2127_vm2, %v3093_v54, 0.0  ;;  %v2275_v31 = vsel %vm2127_vm2, %v2073_v40, 0.0 }
 0x6cf   :  { %6488 = vst [vmem:[#allocation23_spill] sm:$0xff] %v5401_v18  ;;  %v3094_v6 = vmul.f32 %v4021_v55, %v2399_v25  ;;  %v2075_v18 = vmul.f32 %v6490_v1, %v1243_v8  ;;  %v3224_v40 = vsel %vm2127_vm2, %v3095_v38, 0.0  ;;  %v4022_v8 = vld [vmem:[%s6434_s8 + $0x20] sm:$0xff]  ;;  %v3985_v1 = vpop.f32.mrf.mxu1 }
 0x6d0   :  { %2801 = vbcast.lane.b32.xlu1 %v5405_v61, 256  ;;  %2860 = vbcast.lane.b32.xlu0 %v5148_v0, 264  ;;  %v2274_v33 = vadd.f32 %v2273_v4, %v2272_v17  ;;  %v5432_v0 = vrot.slane %v5280_v2, %v4501_v49  ;;  %v5437_v17 = vld [vmem:[%s6434_s8 + $0x270] sm:$0xff]  ;;  %v3097_v4 = vmul.f32 %v4022_v8, %v5234_v42 }
 0x6d1   :  { %v3222_v10 = vsel %vm2127_vm2, %v3094_v6, 0.0  ;;  %v2277_v6 = vsel %vm2127_vm2, %v2074_v60, 0.0  ;;  %v5451_v60 = vmax.f32 %v3985_v1, 0.0  ;;  %v2279_v42 = vsel %vm2127_vm2, %v2075_v18, 0.0  ;;  %v4024_v18 = vld [vmem:[%s6434_s8 + $0x30] sm:$0xff] }
 0x6d2   :  { %v3223_v25 = vadd.f32 %v3222_v10, %v3221_v45  ;;  %v5428_v55 = vpop.permute.xlu1 %2702  ;;  %v2410_v12 = vpop.permute.xlu0 %2409  ;;  %v2276_v54 = vadd.f32 %v2275_v31, %v2274_v33  ;;  %v4023_v45 = vld [vmem:[%s6434_s8 + $0x18] sm:$0xff]  ;;  %v6493_v31 = vld [vmem:[#allocation33_spill] sm:$0xff] }
 0x6d3   :  { %6491 = vst [vmem:[#allocation30_spill] sm:$0xff] %v5428_v55  ;;  %v3096_v10 = vmul.f32 %v4023_v45, %v2410_v12  ;;  %v6492_v55 = vld [vmem:[#allocation26_spill] sm:$0xff]  ;;  %v2077_v8 = vmul.f32 %v6493_v31, %v5437_v17 }
 0x6d4   :  { %v2076_v37 = vmul.f32 %v6492_v55, %v1244_v52  ;;  %v3225_v50 = vadd.f32 %v3224_v40, %v3223_v25  ;;  %2812 = vbcast.lane.b32.xlu1 %v5432_v0, 256  ;;  %2871 = vbcast.lane.b32.xlu0 %v5168_v63, 264  ;;  %v2278_v38 = vadd.f32 %v2277_v6, %v2276_v54  ;;  %v5466_v63 = vld [vmem:[%s6434_s8 + $0x278] sm:$0xff]  ;;  %v3228_v55 = vsel %vm2127_vm2, %v3097_v4, 0.0  ;;  %v4025_v54 = vld [vmem:[%s6434_s8 + $0x28] sm:$0xff] }
 0x6d5   :  { %v3226_v33 = vsel %vm2127_vm2, %v3096_v10, 0.0  ;;  %v5461_v52 = vrot.slane %v5280_v2, %v4504_v51  ;;  %v3008_v4 = vrot.slane %v5451_v60, %v4483_v62 }
 0x6d6   :  { %v3227_v24 = vadd.f32 %v3226_v33, %v3225_v50  ;;  %v5457_v12 = vpop.permute.xlu1 %2713  ;;  %v2421_v45 = vpop.permute.xlu0 %2420  ;;  %v2280_v25 = vadd.f32 %v2279_v42, %v2278_v38  ;;  %v3099_v50 = vmul.f32 %v4024_v18, %v5251_v21  ;;  %v2281_v6 = vsel %vm2127_vm2, %v2076_v37, 0.0  ;;  %v6494_v38 = vld [vmem:[#allocation27_spill] sm:$0xff]  ;;  %v5488_v37 = vld [vmem:[%s6434_s8 + $0x280] sm:$0xff] }
 0x6d7   :  { %v3098_v2 = vmul.f32 %v4025_v54, %v2421_v45  ;;  %v2283_v21 = vsel %vm2127_vm2, %v2077_v8, 0.0  ;;  %v2078_v33 = vmul.f32 %v6494_v38, %v5466_v63 }
 0x6d8   :  { %v3229_v40 = vadd.f32 %v3228_v55, %v3227_v24  ;;  %2823 = vbcast.lane.b32.xlu1 %v5461_v52, 256  ;;  %2882 = vbcast.lane.b32.xlu0 %v5188_v23, 264  ;;  %v2282_v10 = vadd.f32 %v2281_v6, %v2280_v25  ;;  %v3232_v45 = vsel %vm2127_vm2, %v3099_v50, 0.0  ;;  %v4026_v25 = vld [vmem:[%s6434_s8 + $0x40] sm:$0xff]  ;;  %v4027_v55 = vld [vmem:[%s6434_s8 + $0x38] sm:$0xff] }
 0x6d9   :  { %v3230_v1 = vsel %vm2127_vm2, %v3098_v2, 0.0  ;;  %v3101_v8 = vmul.f32 %v4026_v25, %v5266_v59  ;;  %v6495_v2 = vld [vmem:[#allocation6_spill] sm:$0xff] }
 0x6da   :  { %v3231_v24 = vadd.f32 %v3230_v1, %v3229_v40  ;;  %v5490_v42 = vpop.permute.xlu1 %2724  ;;  %v2432_v23 = vpop.permute.xlu0 %2431  ;;  %v2284_v31 = vadd.f32 %v2283_v21, %v2282_v10  ;;  %v2079_v6 = vmul.f32 %v6495_v2, %v5488_v37  ;;  %v2285_v40 = vsel %vm2127_vm2, %v2078_v33, 0.0  ;;  %v5510_v21 = vld [vmem:[%s6434_s8 + $0x288] sm:$0xff] }
 0x6db   :  { %v3100_v18 = vmul.f32 %v4027_v55, %v2432_v23  ;;  %v4029_v33 = vld [vmem:[%s6434_s8 + $0x48] sm:$0xff] }
 0x6dc   :  { %v3233_v54 = vadd.f32 %v3232_v45, %v3231_v24  ;;  %3010 = vbcast.lane.b32.xlu1 %v3008_v4, 256  ;;  %2750 = vbcast.lane.b32.xlu0 %v5303_v41, 264  ;;  %v2286_v38 = vadd.f32 %v2285_v40, %v2284_v31  ;;  %v3236_v24 = vsel %vm2127_vm2, %v3101_v8, 0.0  ;;  %v4028_v41 = vld [vmem:[%s6434_s8 + $0x50] sm:$0xff]  ;;  %v2287_v55 = vsel %vm2127_vm2, %v2079_v6, 0.0  ;;  %v6496_v8 = vld [vmem:[#allocation5_spill] sm:$0xff] }
 0x6dd   :  { %v3234_v50 = vsel %vm2127_vm2, %v3100_v18, 0.0  ;;  %v3103_v23 = vmul.f32 %v4028_v41, %v5282_v39  ;;  %v2080_v18 = vmul.f32 %v6496_v8, %v5510_v21  ;;  %v5528_v39 = vld [vmem:[%s6434_s8 + $0x290] sm:$0xff]  ;;  %v4030_v40 = vld [vmem:[%s6434_s8 + $0x60] sm:$0xff] }
 0x6de   :  { %v3235_v10 = vadd.f32 %v3234_v50, %v3233_v54  ;;  %v5505_v1 = vpop.permute.xlu1 %2735  ;;  %v2443_v59 = vpop.permute.xlu0 %2442 }
 0x6df   :  { %v3102_v45 = vmul.f32 %v4029_v33, %v2443_v59  ;;  %v3240_v6 = vsel %vm2127_vm2, %v3103_v23, 0.0  ;;  %v4031_v59 = vld [vmem:[%s6434_s8 + $0x58] sm:$0xff] }
 0x6e0   :  { %v3237_v25 = vadd.f32 %v3236_v24, %v3235_v10  ;;  %3014 = vbcast.lane.b32.xlu1 %v3008_v4, 264  ;;  %2761 = vbcast.lane.b32.xlu0 %v5323_v11, 264  ;;  %v3019_v4 = vrot.slane %v5451_v60, %v4486_v3  ;;  %v2288_v11 = vadd.f32 %v2287_v55, %v2286_v38  ;;  %v6497_v33 = vld [vmem:[#allocation8_spill] sm:$0xff] }
 0x6e1   :  { %v3238_v31 = vsel %vm2127_vm2, %v3102_v45, 0.0  ;;  %v3105_v10 = vmul.f32 %v4030_v40, %v5297_v36  ;;  %v2081_v38 = vmul.f32 %v6497_v33, %v5528_v39  ;;  %v2289_v45 = vsel %vm2127_vm2, %v2080_v18, 0.0  ;;  %v4033_v18 = vld [vmem:[%s6434_s8 + $0x68] sm:$0xff] }
 0x6e2   :  { %v3239_v54 = vadd.f32 %v3238_v31, %v3237_v25  ;;  %v5530_v2 = vpop.permute.xlu1 %2570  ;;  %v2454_v50 = vpop.permute.xlu0 %2453  ;;  %v5552_v31 = vld [vmem:[%s6434_s8 + $0x298] sm:$0xff]  ;;  %v2290_v8 = vadd.f32 %v2289_v45, %v2288_v11 }
 0x6e3   :  { %v3104_v24 = vmul.f32 %v4031_v59, %v2454_v50  ;;  %v2291_v59 = vsel %vm2127_vm2, %v2081_v38, 0.0  ;;  %v4034_v38 = vld [vmem:[%s6434_s8 + $0x80] sm:$0xff] }
 0x6e4   :  { %v3241_v41 = vadd.f32 %v3240_v6, %v3239_v54  ;;  %3021 = vbcast.lane.b32.xlu1 %v3019_v4, 256  ;;  %2772 = vbcast.lane.b32.xlu0 %v5344_v44, 264  ;;  %v3244_v54 = vsel %vm2127_vm2, %v3105_v10, 0.0  ;;  %v4032_v44 = vld [vmem:[%s6434_s8 + $0x70] sm:$0xff]  ;;  %v3109_v45 = vmul.f32 %v4034_v38, %v5054_v48 }
 0x6e5   :  { %v3242_v23 = vsel %vm2127_vm2, %v3104_v24, 0.0  ;;  %v3107_v50 = vmul.f32 %v4032_v44, %v5317_v26  ;;  %v6498_v10 = vld [vmem:[#allocation7_spill] sm:$0xff]  ;;  %v6499_v48 = vld [vmem:[#allocation10_spill] sm:$0xff] }
 0x6e6   :  { %v3243_v25 = vadd.f32 %v3242_v23, %v3241_v41  ;;  %v5547_v55 = vpop.permute.xlu1 %2581  ;;  %v2465_v36 = vpop.permute.xlu0 %2464  ;;  %v2082_v24 = vmul.f32 %v6498_v10, %v5552_v31  ;;  %v3030_v23 = vrot.slane %v5451_v60, %v4489_v5 }
 0x6e7   :  { %v3106_v6 = vmul.f32 %v4033_v18, %v2465_v36  ;;  %v4035_v36 = vld [vmem:[%s6434_s8 + $0x78] sm:$0xff] }
 0x6e8   :  { %v3245_v40 = vadd.f32 %v3244_v54, %v3243_v25  ;;  %3025 = vbcast.lane.b32.xlu1 %v3019_v4, 264  ;;  %2783 = vbcast.lane.b32.xlu0 %v5363_v35, 264  ;;  %v5574_v4 = vld [vmem:[%s6434_s8 + $0x2a0] sm:$0xff]  ;;  %v2292_v35 = vadd.f32 %v2291_v59, %v2290_v8  ;;  %v3248_v25 = vsel %vm2127_vm2, %v3107_v50, 0.0  ;;  %v4036_v8 = vld [vmem:[%s6434_s8 + $0x88] sm:$0xff] }
 0x6e9   :  { %v3246_v11 = vsel %vm2127_vm2, %v3106_v6, 0.0  ;;  %v3110_v18 = vmul.f32 %v4036_v8, %v5253_v58  ;;  %v2083_v50 = vmul.f32 %v6499_v48, %v5574_v4  ;;  %v3252_v58 = vsel %vm2127_vm2, %v3109_v45, 0.0  ;;  %v4039_v48 = vld [vmem:[%s6434_s8 + $0xa0] sm:$0xff] }
 0x6ea   :  { %v3247_v41 = vadd.f32 %v3246_v11, %v3245_v40  ;;  %v5567_v33 = vpop.permute.xlu1 %2592  ;;  %v2476_v26 = vpop.permute.xlu0 %2475  ;;  %v2293_v40 = vsel %vm2127_vm2, %v2082_v24, 0.0 }
 0x6eb   :  { %v3108_v54 = vmul.f32 %v4035_v36, %v2476_v26  ;;  %v4037_v26 = vld [vmem:[%s6434_s8 + $0x90] sm:$0xff]  ;;  %v4038_v36 = vld [vmem:[%s6434_s8 + $0x98] sm:$0xff]  ;;  %v2295_v45 = vsel %vm2127_vm2, %v2083_v50, 0.0  ;;  %v3113_v50 = vmul.f32 %v4039_v48, %v5090_v53 }
 0x6ec   :  { %v3249_v44 = vadd.f32 %v3248_v25, %v3247_v41  ;;  %3032 = vbcast.lane.b32.xlu1 %v3030_v23, 256  ;;  %2794 = vbcast.lane.b32.xlu0 %v5383_v43, 264  ;;  %v5600_v43 = vld [vmem:[%s6434_s8 + $0x2a8] sm:$0xff]  ;;  %v2294_v41 = vadd.f32 %v2293_v40, %v2292_v35  ;;  %v3111_v38 = vmul.f32 %v4037_v26, %v5071_v28  ;;  %v3254_v25 = vsel %vm2127_vm2, %v3110_v18, 0.0  ;;  %v1142_v40 = vpop.f32.mrf.mxu1 }
 0x6ed   :  { %v3250_v6 = vsel %vm2127_vm2, %v3108_v54, 0.0  ;;  %v3112_v35 = vmul.f32 %v4038_v36, %v5268_v14  ;;  %v6500_v54 = vld [vmem:[#allocation9_spill] sm:$0xff]  ;;  %v5641_v36 = vmax.f32 %v1142_v40, 0.0  ;;  %v4042_v40 = vld [vmem:[%s6434_s8 + $0xb8] sm:$0xff] }
 0x6ee   :  { %v3251_v59 = vadd.f32 %v3250_v6, %v3249_v44  ;;  %v5593_v11 = vpop.permute.xlu1 %2603  ;;  %v5595_v10 = vpop.permute.xlu0 %2662  ;;  %v2084_v44 = vmul.f32 %v6500_v54, %v5600_v43  ;;  %v2296_v18 = vadd.f32 %v2295_v45, %v2294_v41  ;;  %v3256_v14 = vsel %vm2127_vm2, %v3111_v38, 0.0  ;;  %v4040_v26 = vld [vmem:[%s6434_s8 + $0xa8] sm:$0xff]  ;;  %v6501_v38 = vld [vmem:[#allocation12_spill] sm:$0xff] }
 0x6ef   :  { %v3114_v41 = vmul.f32 %v4040_v26, %v5284_v56  ;;  %v3260_v56 = vsel %vm2127_vm2, %v3113_v50, 0.0 }
 0x6f0   :  { %v3253_v24 = vadd.f32 %v3252_v58, %v3251_v59  ;;  %3036 = vbcast.lane.b32.xlu1 %v3030_v23, 264  ;;  %2805 = vbcast.lane.b32.xlu0 %v5405_v61, 264  ;;  %v3041_v61 = vrot.slane %v5451_v60, %v4492_v7  ;;  %v5625_v23 = vld [vmem:[%s6434_s8 + $0x2b0] sm:$0xff]  ;;  %v3258_v58 = vsel %vm2127_vm2, %v3112_v35, 0.0 }
 0x6f1   :  { %v3262_v48 = vsel %vm2127_vm2, %v3114_v41, 0.0 }
 0x6f2   :  { %v3255_v8 = vadd.f32 %v3254_v25, %v3253_v24  ;;  %v5616_v6 = vpop.permute.xlu1 %2614  ;;  %v5618_v28 = vpop.permute.xlu0 %2673  ;;  %v2085_v24 = vmul.f32 %v6501_v38, %v5625_v23  ;;  %v2297_v25 = vsel %vm2127_vm2, %v2084_v44, 0.0 }
 0x6f3   :  { %v2298_v35 = vadd.f32 %v2297_v25, %v2296_v18  ;;  %v3116_v18 = vmul.f32 %v4042_v40, %v5299_v16  ;;  %v5677_v16 = vld [vmem:[%s6434_s8 + $0x2c0] sm:$0xff] }
 0x6f4   :  { %v3257_v59 = vadd.f32 %v3256_v14, %v3255_v8  ;;  %3043 = vbcast.lane.b32.xlu1 %v3041_v61, 256  ;;  %2816 = vbcast.lane.b32.xlu0 %v5432_v0, 264  ;;  %v5650_v0 = vld [vmem:[%s6434_s8 + $0x2b8] sm:$0xff]  ;;  %v4041_v8 = vld [vmem:[%s6434_s8 + $0xb0] sm:$0xff]  ;;  %v2299_v50 = vsel %vm2127_vm2, %v2085_v24, 0.0  ;;  %6504 = vst [vmem:[#allocation31_spill] sm:$0xff] %v5677_v16 }
 0x6f5   :  { %6502 = vst [vmem:[#allocation24_spill] sm:$0xff] %v5650_v0  ;;  %v3115_v44 = vmul.f32 %v4041_v8, %v5111_v19  ;;  %v2300_v41 = vadd.f32 %v2299_v50, %v2298_v35  ;;  %v4043_v25 = vld [vmem:[%s6434_s8 + $0xc0] sm:$0xff]  ;;  %v3266_v8 = vsel %vm2127_vm2, %v3116_v18, 0.0  ;;  %v6505_v35 = vld [vmem:[#allocation14_spill] sm:$0xff] }
 0x6f6   :  { %v3259_v53 = vadd.f32 %v3258_v58, %v3257_v59  ;;  %v5643_v45 = vpop.permute.xlu1 %2625  ;;  %v5645_v54 = vpop.permute.xlu0 %2684  ;;  %v6503_v59 = vld [vmem:[#allocation11_spill] sm:$0xff]  ;;  %v5699_v18 = vld [vmem:[%s6434_s8 + $0x2c8] sm:$0xff] }
 0x6f7   :  { %v2086_v58 = vmul.f32 %v6503_v59, %v5650_v0  ;;  %v3264_v24 = vsel %vm2127_vm2, %v3115_v44, 0.0  ;;  %v2087_v44 = vmul.f32 %v6505_v35, %v5677_v16  ;;  %6506 = vst [vmem:[#allocation25_spill] sm:$0xff] %v5699_v18 }
 0x6f8   :  { %v3261_v14 = vadd.f32 %v3260_v56, %v3259_v53  ;;  %3047 = vbcast.lane.b32.xlu1 %v3041_v61, 264  ;;  %2827 = vbcast.lane.b32.xlu0 %v5461_v52, 264  ;;  %v2920_v52 = vrot.slane %v5641_v36, %v4483_v62  ;;  %v1870_v61 = vrot.slane %v4667_v27, %v4495_v9 }
 0x6f9   :  { %v3117_v53 = vmul.f32 %v4043_v25, %v5124_v46  ;;  %v2301_v40 = vsel %vm2127_vm2, %v2086_v58, 0.0  ;;  %v6507_v25 = vld [vmem:[#allocation34_spill] sm:$0xff] }
 0x6fa   :  { %v3263_v26 = vadd.f32 %v3262_v48, %v3261_v14  ;;  %v5666_v38 = vpop.permute.xlu1 %2636  ;;  %v5668_v19 = vpop.permute.xlu0 %2695  ;;  %v4044_v14 = vld [vmem:[%s6434_s8 + $0xc8] sm:$0xff] }
 0x6fb   :  { %v3118_v48 = vmul.f32 %v4044_v14, %v5319_v15  ;;  %v4045_v15 = vld [vmem:[%s6434_s8 + $0xd0] sm:$0xff] }
 0x6fc   :  { %v3265_v56 = vadd.f32 %v3264_v24, %v3263_v26  ;;  %2922 = vbcast.lane.b32.xlu1 %v2920_v52, 256  ;;  %1872 = vbcast.lane.b32.xlu0 %v1870_v61, 256  ;;  %v2302_v26 = vadd.f32 %v2301_v40, %v2300_v41  ;;  %v3268_v24 = vsel %vm2127_vm2, %v3117_v53, 0.0  ;;  %v3119_v14 = vmul.f32 %v4045_v15, %v6507_v25  ;;  %v6508_v53 = vld [vmem:[#allocation13_spill] sm:$0xff] }
 0x6fd   :  { %v2303_v41 = vsel %vm2127_vm2, %v2087_v44, 0.0  ;;  %v2088_v40 = vmul.f32 %v6508_v53, %v5699_v18 }
 0x6fe   :  { %v3267_v50 = vadd.f32 %v3266_v8, %v3265_v56  ;;  %v5692_v59 = vpop.permute.xlu1 %2647  ;;  %v5694_v46 = vpop.permute.xlu0 %2706  ;;  %v3270_v56 = vsel %vm2127_vm2, %v3118_v48, 0.0  ;;  %v4046_v8 = vld [vmem:[%s6434_s8 + $0xd8] sm:$0xff]  ;;  %v2304_v48 = vadd.f32 %v2303_v41, %v2302_v26  ;;  %v3272_v44 = vsel %vm2127_vm2, %v3119_v14, 0.0 }
 0x6ff   :  { %v3120_v35 = vmul.f32 %v4046_v8, %v5340_v29  ;;  %v5725_v29 = vld [vmem:[%s6434_s8 + $0x2d0] sm:$0xff]  ;;  %v6510_v26 = vld [vmem:[#allocation16_spill] sm:$0xff]  ;;  %v2305_v41 = vsel %vm2127_vm2, %v2088_v40, 0.0 }
 0x700   :  { %v3269_v58 = vadd.f32 %v3268_v24, %v3267_v50  ;;  %2926 = vbcast.lane.b32.xlu1 %v2920_v52, 264  ;;  %1876 = vbcast.lane.b32.xlu0 %v1870_v61, 264  ;;  %v2931_v52 = vrot.slane %v5641_v36, %v4486_v3  ;;  %v1881_v61 = vrot.slane %v4667_v27, %v4498_v47  ;;  %v4047_v50 = vld [vmem:[%s6434_s8 + $0xe0] sm:$0xff] }
 0x701   :  { %6509 = vst [vmem:[#allocation32_spill] sm:$0xff] %v5725_v29  ;;  %v3121_v24 = vmul.f32 %v4047_v50, %v5162_v30  ;;  %v2089_v14 = vmul.f32 %v6510_v26, %v5725_v29 }
 0x702   :  { %v3271_v16 = vadd.f32 %v3270_v56, %v3269_v58  ;;  %v5714_v0 = vpop.permute.xlu1 %2834  ;;  %v5716_v15 = vpop.permute.xlu0 %2717  ;;  %v3274_v58 = vsel %vm2127_vm2, %v3120_v35, 0.0  ;;  %v4048_v56 = vld [vmem:[%s6434_s8 + $0xe8] sm:$0xff]  ;;  %v2306_v35 = vadd.f32 %v2305_v41, %v2304_v48 }
 0x703   :  { %v3122_v8 = vmul.f32 %v4048_v56, %v5359_v34  ;;  %v4049_v34 = vld [vmem:[%s6434_s8 + $0xf0] sm:$0xff]  ;;  %v2307_v48 = vsel %vm2127_vm2, %v2089_v14, 0.0 }
 0x704   :  { %v3273_v25 = vadd.f32 %v3272_v44, %v3271_v16  ;;  %2933 = vbcast.lane.b32.xlu1 %v2931_v52, 256  ;;  %1883 = vbcast.lane.b32.xlu0 %v1881_v61, 256  ;;  %v5747_v16 = vld [vmem:[%s6434_s8 + $0x2d8] sm:$0xff]  ;;  %v3276_v44 = vsel %vm2127_vm2, %v3121_v24, 0.0  ;;  %v3123_v50 = vmul.f32 %v4049_v34, %v5182_v20  ;;  %v6512_v24 = vld [vmem:[#allocation17_spill] sm:$0xff] }
 0x705   :  { %6511 = vst [vmem:[#allocation26_spill] sm:$0xff] %v5747_v16  ;;  %v2090_v26 = vmul.f32 %v6512_v24, %v5747_v16 }
 0x706   :  { %v3275_v53 = vadd.f32 %v3274_v58, %v3273_v25  ;;  %v5740_v18 = vpop.permute.xlu1 %2845  ;;  %v5742_v30 = vpop.permute.xlu0 %2728  ;;  %v3278_v25 = vsel %vm2127_vm2, %v3122_v8, 0.0  ;;  %v4050_v58 = vld [vmem:[%s6434_s8 + $0xf8] sm:$0xff]  ;;  %v2308_v8 = vadd.f32 %v2307_v48, %v2306_v35  ;;  %v3280_v14 = vsel %vm2127_vm2, %v3123_v50, 0.0  ;;  %v5789_v48 = vld [vmem:[%s6434_s8 + $0x2e8] sm:$0xff] }
 0x707   :  { %v3124_v56 = vmul.f32 %v4050_v58, %v5379_v13  ;;  %v5773_v13 = vld [vmem:[%s6434_s8 + $0x2e0] sm:$0xff]  ;;  %v6514_v58 = vld [vmem:[#allocation18_spill] sm:$0xff]  ;;  %6516 = vst [vmem:[#allocation6_spill] sm:$0xff] %v5789_v48 }
 0x708   :  { %v3277_v40 = vadd.f32 %v3276_v44, %v3275_v53  ;;  %2937 = vbcast.lane.b32.xlu1 %v2931_v52, 264  ;;  %1887 = vbcast.lane.b32.xlu0 %v1881_v61, 264  ;;  %v2942_v52 = vrot.slane %v5641_v36, %v4489_v5  ;;  %v1892_v61 = vrot.slane %v4667_v27, %v4501_v49  ;;  %v4051_v53 = vld [vmem:[%s6434_s8 + $0x100] sm:$0xff] }
 0x709   :  { %6513 = vst [vmem:[#allocation33_spill] sm:$0xff] %v5773_v13  ;;  %v3125_v44 = vmul.f32 %v4051_v53, %v5530_v2  ;;  %v2091_v24 = vmul.f32 %v6514_v58, %v5773_v13 }
 0x70a   :  { %v3279_v41 = vadd.f32 %v3278_v25, %v3277_v40  ;;  %v5762_v29 = vpop.permute.xlu1 %2856  ;;  %v5764_v20 = vpop.permute.xlu0 %2739  ;;  %v3282_v40 = vsel %vm2127_vm2, %v3124_v56, 0.0  ;;  %v2309_v25 = vsel %vm2127_vm2, %v2090_v26, 0.0  ;;  %v4052_v56 = vld [vmem:[%s6434_s8 + $0x110] sm:$0xff] }
 0x70b   :  { %v2310_v2 = vadd.f32 %v2309_v25, %v2308_v8  ;;  %v3127_v26 = vmul.f32 %v4052_v56, %v5547_v55  ;;  %v2311_v8 = vsel %vm2127_vm2, %v2091_v24, 0.0  ;;  %v2953_v55 = vrot.slane %v5641_v36, %v4492_v7  ;;  %v4054_v24 = vld [vmem:[%s6434_s8 + $0x120] sm:$0xff]  ;;  %v4055_v56 = vld [vmem:[%s6434_s8 + $0x118] sm:$0xff] }
 0x70c   :  { %v3281_v34 = vadd.f32 %v3280_v14, %v3279_v41  ;;  %2944 = vbcast.lane.b32.xlu1 %v2942_v52, 256  ;;  %1894 = vbcast.lane.b32.xlu0 %v1892_v61, 256  ;;  %v3284_v41 = vsel %vm2127_vm2, %v3125_v44, 0.0  ;;  %v4053_v14 = vld [vmem:[%s6434_s8 + $0x108] sm:$0xff]  ;;  %v6517_v44 = vld [vmem:[#allocation19_spill] sm:$0xff] }
 0x70d   :  { %v2092_v25 = vmul.f32 %v6517_v44, %v5789_v48 }
 0x70e   :  { %v3283_v16 = vadd.f32 %v3282_v40, %v3281_v34  ;;  %v5784_v35 = vpop.permute.xlu1 %2867  ;;  %v2575_v50 = vpop.permute.xlu0 %2574 }
 0x70f   :  { %6515 = vst [vmem:[#allocation27_spill] sm:$0xff] %v5784_v35  ;;  %v3126_v53 = vmul.f32 %v4053_v14, %v2575_v50  ;;  %v1903_v50 = vrot.slane %v4667_v27, %v4504_v51 }
 0x710   :  { %v3285_v34 = vadd.f32 %v3284_v41, %v3283_v16  ;;  %2948 = vbcast.lane.b32.xlu1 %v2942_v52, 264  ;;  %1898 = vbcast.lane.b32.xlu0 %v1892_v61, 264  ;;  %v5812_v16 = vld [vmem:[%s6434_s8 + $0x2f0] sm:$0xff]  ;;  %v2312_v52 = vadd.f32 %v2311_v8, %v2310_v2  ;;  %v3288_v61 = vsel %vm2127_vm2, %v3127_v26, 0.0  ;;  %v3129_v41 = vmul.f32 %v4054_v24, %v5567_v33  ;;  %v6519_v26 = vld [vmem:[#allocation20_spill] sm:$0xff] }
 0x711   :  { %v3286_v40 = vsel %vm2127_vm2, %v3126_v53, 0.0  ;;  %6518 = vst [vmem:[#allocation5_spill] sm:$0xff] %v5812_v16  ;;  %v2313_v2 = vsel %vm2127_vm2, %v2092_v25, 0.0  ;;  %v4056_v25 = vld [vmem:[%s6434_s8 + $0x130] sm:$0xff] }
 0x712   :  { %v3287_v58 = vadd.f32 %v3286_v40, %v3285_v34  ;;  %v5803_v13 = vpop.permute.xlu1 %2878  ;;  %v2586_v35 = vpop.permute.xlu0 %2585  ;;  %v2093_v34 = vmul.f32 %v6519_v26, %v5812_v16  ;;  %v6520_v40 = vld [vmem:[#allocation15_spill] sm:$0xff] }
 0x713   :  { %v3128_v14 = vmul.f32 %v4055_v56, %v2586_v35  ;;  %v5827_v8 = vmax.f32 %v6520_v40, 0.0  ;;  %v5834_v35 = vld [vmem:[%s6434_s8 + $0x2f8] sm:$0xff]  ;;  %v3131_v56 = vmul.f32 %v4056_v25, %v5593_v11  ;;  %v2964_v11 = vrot.slane %v5641_v36, %v4495_v9 }
 0x714   :  { %v3289_v27 = vadd.f32 %v3288_v61, %v3287_v58  ;;  %2955 = vbcast.lane.b32.xlu1 %v2953_v55, 256  ;;  %1905 = vbcast.lane.b32.xlu0 %v1903_v50, 256  ;;  %v2314_v58 = vadd.f32 %v2313_v2, %v2312_v52  ;;  %v3292_v61 = vsel %vm2127_vm2, %v3129_v41, 0.0  ;;  %v2315_v52 = vsel %vm2127_vm2, %v2093_v34, 0.0  ;;  %v6521_v41 = vld [vmem:[#allocation21_spill] sm:$0xff]  ;;  %v4059_v25 = vld [vmem:[%s6434_s8 + $0x138] sm:$0xff] }
 0x715   :  { %v3290_v53 = vsel %vm2127_vm2, %v3128_v14, 0.0  ;;  %v4057_v14 = vld [vmem:[%s6434_s8 + $0x128] sm:$0xff]  ;;  %v2094_v2 = vmul.f32 %v6521_v41, %v5834_v35  ;;  %v3296_v34 = vsel %vm2127_vm2, %v3131_v56, 0.0 }
 0x716   :  { %v3291_v44 = vadd.f32 %v3290_v53, %v3289_v27  ;;  %v5829_v33 = vpop.permute.xlu1 %2889  ;;  %v2597_v24 = vpop.permute.xlu0 %2596  ;;  %v5876_v41 = vld [vmem:[%s6434_s8 + $0x308] sm:$0xff] }
 0x717   :  { %v3130_v27 = vmul.f32 %v4057_v14, %v2597_v24  ;;  %v1914_v24 = vrot.slane %v5827_v8, %v4483_v62 }
 0x718   :  { %v3293_v53 = vadd.f32 %v3292_v61, %v3291_v44  ;;  %2959 = vbcast.lane.b32.xlu1 %v2953_v55, 264  ;;  %1909 = vbcast.lane.b32.xlu0 %v1903_v50, 264  ;;  %v5857_v55 = vld [vmem:[%s6434_s8 + $0x300] sm:$0xff]  ;;  %v2316_v50 = vadd.f32 %v2315_v52, %v2314_v58  ;;  %v2317_v58 = vsel %vm2127_vm2, %v2094_v2, 0.0 }
 0x719   :  { %v3294_v26 = vsel %vm2127_vm2, %v3130_v27, 0.0  ;;  %v4058_v44 = vld [vmem:[%s6434_s8 + $0x140] sm:$0xff]  ;;  %v2095_v56 = vmul.f32 %v5164_v32, %v5857_v55  ;;  %v4061_v32 = vld [vmem:[%s6434_s8 + $0x148] sm:$0xff] }
 0x71a   :  { %v3295_v40 = vadd.f32 %v3294_v26, %v3293_v53  ;;  %v5848_v16 = vpop.permute.xlu1 %2893  ;;  %v2608_v48 = vpop.permute.xlu0 %2607  ;;  %v3133_v61 = vmul.f32 %v4058_v44, %v5616_v6  ;;  %v2318_v6 = vadd.f32 %v2317_v58, %v2316_v50  ;;  %v1925_v58 = vrot.slane %v5827_v8, %v4486_v3 }
 0x71b   :  { %v3132_v14 = vmul.f32 %v4059_v25, %v2608_v48  ;;  %v2319_v25 = vsel %vm2127_vm2, %v2095_v56, 0.0 }
 0x71c   :  { %v3297_v62 = vadd.f32 %v3296_v34, %v3295_v40  ;;  %2966 = vbcast.lane.b32.xlu1 %v2964_v11, 256  ;;  %1916 = vbcast.lane.b32.xlu0 %v1914_v24, 256  ;;  %v3300_v48 = vsel %vm2127_vm2, %v3133_v61, 0.0  ;;  %v4060_v40 = vld [vmem:[%s6434_s8 + $0x150] sm:$0xff]  ;;  %v2096_v61 = vmul.f32 %v5184_v57, %v5876_v41  ;;  %v4062_v57 = vld [vmem:[%s6434_s8 + $0x160] sm:$0xff] }
 0x71d   :  { %v3298_v27 = vsel %vm2127_vm2, %v3132_v14, 0.0  ;;  %v3135_v2 = vmul.f32 %v4060_v40, %v5643_v45  ;;  %v2975_v45 = vrot.slane %v5641_v36, %v4498_v47  ;;  %v3137_v56 = vmul.f32 %v4062_v57, %v5666_v38 }
 0x71e   :  { %v3299_v53 = vadd.f32 %v3298_v27, %v3297_v62  ;;  %v5871_v26 = vpop.permute.xlu1 %2900  ;;  %v2619_v52 = vpop.permute.xlu0 %2618  ;;  %v2321_v40 = vsel %vm2127_vm2, %v2096_v61, 0.0 }
 0x71f   :  { %v3134_v34 = vmul.f32 %v4061_v32, %v2619_v52  ;;  %v4063_v52 = vld [vmem:[%s6434_s8 + $0x158] sm:$0xff] }
 0x720   :  { %v3301_v44 = vadd.f32 %v3300_v48, %v3299_v53  ;;  %2970 = vbcast.lane.b32.xlu1 %v2964_v11, 264  ;;  %1920 = vbcast.lane.b32.xlu0 %v1914_v24, 264  ;;  %v2320_v53 = vadd.f32 %v2319_v25, %v2318_v6  ;;  %v5899_v11 = vld [vmem:[%s6434_s8 + $0x310] sm:$0xff]  ;;  %v3304_v24 = vsel %vm2127_vm2, %v3135_v2, 0.0  ;;  %v3308_v25 = vsel %vm2127_vm2, %v3137_v56, 0.0 }
 0x721   :  { %v3302_v50 = vsel %vm2127_vm2, %v3134_v34, 0.0  ;;  %v2097_v2 = vmul.f32 %v5204_v22, %v5899_v11  ;;  %v4065_v22 = vld [vmem:[%s6434_s8 + $0x168] sm:$0xff]  ;;  %v6523_v56 = vld [vmem:[#allocation35_spill] sm:$0xff] }
 0x722   :  { %v3303_v14 = vadd.f32 %v3302_v50, %v3301_v44  ;;  %v5890_v62 = vpop.permute.xlu1 %2904  ;;  %v2630_v27 = vpop.permute.xlu0 %2629  ;;  %v2322_v38 = vadd.f32 %v2321_v40, %v2320_v53  ;;  %v5918_v50 = vld [vmem:[%s6434_s8 + $0x318] sm:$0xff]  ;;  %v1936_v40 = vrot.slane %v5827_v8, %v4489_v5 }
 0x723   :  { %v3136_v48 = vmul.f32 %v4063_v52, %v2630_v27  ;;  %6522 = vst [vmem:[#allocation8_spill] sm:$0xff] %v5918_v50  ;;  %v2323_v57 = vsel %vm2127_vm2, %v2097_v2, 0.0  ;;  %v2098_v52 = vmul.f32 %v6523_v56, %v5918_v50  ;;  %v6524_v2 = vld [vmem:[#allocation28_spill] sm:$0xff]  ;;  %v6526_v50 = vld [vmem:[#allocation22_spill] sm:$0xff] }
 0x724   :  { %v3305_v3 = vadd.f32 %v3304_v24, %v3303_v14  ;;  %2977 = vbcast.lane.b32.xlu1 %v2975_v45, 256  ;;  %1927 = vbcast.lane.b32.xlu0 %v1925_v58, 256  ;;  %v4064_v14 = vld [vmem:[%s6434_s8 + $0x170] sm:$0xff] }
 0x725   :  { %v3306_v6 = vsel %vm2127_vm2, %v3136_v48, 0.0  ;;  %v3139_v61 = vmul.f32 %v4064_v14, %v5692_v59  ;;  %v2986_v59 = vrot.slane %v5641_v36, %v4501_v49  ;;  %v4067_v14 = vld [vmem:[%s6434_s8 + $0x178] sm:$0xff] }
 0x726   :  { %v3307_v32 = vadd.f32 %v3306_v6, %v3305_v3  ;;  %v5913_v34 = vpop.permute.xlu1 %2911  ;;  %v2641_v44 = vpop.permute.xlu0 %2640 }
 0x727   :  { %v3138_v27 = vmul.f32 %v4065_v22, %v2641_v44 }
 0x728   :  { %v3309_v24 = vadd.f32 %v3308_v25, %v3307_v32  ;;  %2981 = vbcast.lane.b32.xlu1 %v2975_v45, 264  ;;  %1931 = vbcast.lane.b32.xlu0 %v1925_v58, 264  ;;  %v2324_v32 = vadd.f32 %v2323_v57, %v2322_v38  ;;  %v5941_v45 = vld [vmem:[%s6434_s8 + $0x320] sm:$0xff]  ;;  %v3312_v25 = vsel %vm2127_vm2, %v3139_v61, 0.0  ;;  %v5954_v38 = vld [vmem:[%s6434_s8 + $0x328] sm:$0xff] }
 0x729   :  { %v3310_v53 = vsel %vm2127_vm2, %v3138_v27, 0.0  ;;  %v4066_v58 = vld [vmem:[%s6434_s8 + $0x180] sm:$0xff]  ;;  %v4068_v27 = vld [vmem:[%s6434_s8 + $0x188] sm:$0xff] }
 0x72a   :  { %v3311_v48 = vadd.f32 %v3310_v53, %v3309_v24  ;;  %v5932_v3 = vpop.permute.xlu1 %2915  ;;  %v2652_v6 = vpop.permute.xlu0 %2651  ;;  %v3141_v44 = vmul.f32 %v4066_v58, %v6524_v2  ;;  %v3142_v24 = vmul.f32 %v4068_v27, %v5595_v10  ;;  %v2325_v53 = vsel %vm2127_vm2, %v2098_v52, 0.0  ;;  %v6525_v57 = vld [vmem:[#allocation36_spill] sm:$0xff]  ;;  %v5975_v52 = vld [vmem:[%s6434_s8 + $0x330] sm:$0xff] }
 0x72b   :  { %v3140_v22 = vmul.f32 %v4067_v14, %v2652_v6  ;;  %v2099_v56 = vmul.f32 %v6525_v57, %v5941_v45  ;;  %v2326_v2 = vadd.f32 %v2325_v53, %v2324_v32  ;;  %v4069_v14 = vld [vmem:[%s6434_s8 + $0x190] sm:$0xff]  ;;  %v2997_v57 = vrot.slane %v5641_v36, %v4504_v51  ;;  %v5999_v36 = vld [vmem:[%s6434_s8 + $0x338] sm:$0xff] }
 0x72c   :  { %v3313_v5 = vadd.f32 %v3312_v25, %v3311_v48  ;;  %2988 = vbcast.lane.b32.xlu1 %v2986_v59, 256  ;;  %1938 = vbcast.lane.b32.xlu0 %v1936_v40, 256  ;;  %v3316_v25 = vsel %vm2127_vm2, %v3141_v44, 0.0  ;;  %v3143_v10 = vmul.f32 %v4069_v14, %v6526_v50  ;;  %v3318_v32 = vsel %vm2127_vm2, %v3142_v24, 0.0  ;;  %v4070_v44 = vld [vmem:[%s6434_s8 + $0x198] sm:$0xff] }
 0x72d   :  { %v3314_v61 = vsel %vm2127_vm2, %v3140_v22, 0.0  ;;  %v1947_v24 = vrot.slane %v5827_v8, %v4492_v7 }
 0x72e   :  { %v3315_v48 = vadd.f32 %v3314_v61, %v3313_v5  ;;  %v5964_v6 = vpop.permute.xlu1 %2746  ;;  %v1855_v58 = vpop.permute.xlu0 %1854  ;;  %v3144_v5 = vmul.f32 %v4070_v44, %v5618_v28  ;;  %v2327_v61 = vsel %vm2127_vm2, %v2099_v56, 0.0  ;;  %v4071_v28 = vld [vmem:[%s6434_s8 + $0x1a0] sm:$0xff] }
 0x72f   :  { %v2100_v22 = vmul.f32 %v1855_v58, %v5954_v38  ;;  %v3320_v58 = vsel %vm2127_vm2, %v3143_v10, 0.0  ;;  %v4072_v10 = vld [vmem:[%s6434_s8 + $0x1a8] sm:$0xff] }
 0x730   :  { %v3317_v27 = vadd.f32 %v3316_v25, %v3315_v48  ;;  %2992 = vbcast.lane.b32.xlu1 %v2986_v59, 264  ;;  %1942 = vbcast.lane.b32.xlu0 %v1936_v40, 264  ;;  %v2328_v48 = vadd.f32 %v2327_v61, %v2326_v2  ;;  %v6527_v25 = vld [vmem:[#allocation29_spill] sm:$0xff]  ;;  %v3322_v2 = vsel %vm2127_vm2, %v3144_v5, 0.0  ;;  %v6528_v5 = vld [vmem:[#allocation23_spill] sm:$0xff] }
 0x731   :  { %v2329_v50 = vsel %vm2127_vm2, %v2100_v22, 0.0  ;;  %v3145_v14 = vmul.f32 %v4071_v28, %v6527_v25 }
 0x732   :  { %v3319_v53 = vadd.f32 %v3318_v32, %v3317_v27  ;;  %v5984_v59 = vpop.permute.xlu1 %2757  ;;  %v1862_v40 = vpop.permute.xlu0 %1861  ;;  %v2330_v7 = vadd.f32 %v2329_v50, %v2328_v48  ;;  %v3146_v27 = vmul.f32 %v4072_v10, %v5645_v54  ;;  %v4073_v50 = vld [vmem:[%s6434_s8 + $0x1b0] sm:$0xff] }
 0x733   :  { %v2101_v56 = vmul.f32 %v1862_v40, %v5975_v52  ;;  %v3147_v48 = vmul.f32 %v4073_v50, %v6528_v5  ;;  %v4076_v5 = vld [vmem:[%s6434_s8 + $0x1c8] sm:$0xff] }
 0x734   :  { %v3321_v22 = vadd.f32 %v3320_v58, %v3319_v53  ;;  %2999 = vbcast.lane.b32.xlu1 %v2997_v57, 256  ;;  %1949 = vbcast.lane.b32.xlu0 %v1947_v24, 256  ;;  %v3324_v58 = vsel %vm2127_vm2, %v3145_v14, 0.0  ;;  %v3326_v54 = vsel %vm2127_vm2, %v3146_v27, 0.0 }
 0x735   :  { %v2331_v32 = vsel %vm2127_vm2, %v2101_v56, 0.0  ;;  %v4074_v56 = vld [vmem:[%s6434_s8 + $0x1b8] sm:$0xff]  ;;  %v3328_v27 = vsel %vm2127_vm2, %v3147_v48, 0.0 }
 0x736   :  { %v3323_v44 = vadd.f32 %v3322_v2, %v3321_v22  ;;  %v6007_v61 = vpop.permute.xlu1 %2768  ;;  %v1866_v53 = vpop.permute.xlu0 %1865  ;;  %v2332_v40 = vadd.f32 %v2331_v32, %v2330_v7  ;;  %v3148_v22 = vmul.f32 %v4074_v56, %v5668_v19  ;;  %v3052_v32 = vrot.slane %v5451_v60, %v4495_v9  ;;  %v4075_v19 = vld [vmem:[%s6434_s8 + $0x1c0] sm:$0xff] }
 0x737   :  { %v2102_v28 = vmul.f32 %v1866_v53, %v5999_v36 }
 0x738   :  { %v3325_v25 = vadd.f32 %v3324_v58, %v3323_v44  ;;  %3003 = vbcast.lane.b32.xlu1 %v2997_v57, 264  ;;  %1953 = vbcast.lane.b32.xlu0 %v1947_v24, 264  ;;  %v1958_v57 = vrot.slane %v5827_v8, %v4495_v9  ;;  %v6529_v44 = vld [vmem:[#allocation30_spill] sm:$0xff]  ;;  %v3330_v50 = vsel %vm2127_vm2, %v3148_v22, 0.0  ;;  %v3150_v9 = vmul.f32 %v4076_v5, %v5694_v46  ;;  %v4078_v46 = vld [vmem:[%s6434_s8 + $0x1d8] sm:$0xff] }
 0x739   :  { %v2333_v14 = vsel %vm2127_vm2, %v2102_v28, 0.0  ;;  %v3149_v53 = vmul.f32 %v4075_v19, %v6529_v44  ;;  %v4080_v5 = vld [vmem:[%s6434_s8 + $0x1e8] sm:$0xff] }
 0x73a   :  { %v3327_v7 = vadd.f32 %v3326_v54, %v3325_v25  ;;  %v6021_v2 = vpop.permute.xlu1 %2779  ;;  %v6023_v10 = vpop.permute.xlu0 %2838  ;;  %v6029_v24 = vadd.f32 %v2333_v14, %v2332_v40  ;;  %v4077_v54 = vld [vmem:[%s6434_s8 + $0x1d0] sm:$0xff]  ;;  %v3334_v14 = vsel %vm2127_vm2, %v3150_v9, 0.0  ;;  %v3154_v9 = vmul.f32 %v4080_v5, %v5742_v30  ;;  %v4082_v30 = vld [vmem:[%s6434_s8 + $0x1f8] sm:$0xff] }
 0x73b   :  { %v3332_v25 = vsel %vm2127_vm2, %v3149_v53, 0.0  ;;  %v3151_v56 = vmul.f32 %v4077_v54, %v5457_v12  ;;  %v3063_v53 = vrot.slane %v5451_v60, %v4498_v47  ;;  %v1969_v12 = vrot.slane %v5827_v8, %v4498_v47 }
 0x73c   :  { %v3329_v58 = vadd.f32 %v3328_v27, %v3327_v7  ;;  %3054 = vbcast.lane.b32.xlu1 %v3052_v32, 256  ;;  %1960 = vbcast.lane.b32.xlu0 %v1958_v57, 256  ;;  %v3152_v7 = vmul.f32 %v4078_v46, %v5716_v15  ;;  %v3156_v46 = vmul.f32 %v4082_v30, %v5764_v20 }
 0x73e   :  { %v3331_v40 = vadd.f32 %v3330_v50, %v3329_v58  ;;  %v6041_v28 = vpop.permute.xlu1 %2790  ;;  %v6043_v48 = vpop.permute.xlu0 %2849  ;;  %v3338_v50 = vsel %vm2127_vm2, %v3152_v7, 0.0 }
 0x740   :  { %v3333_v22 = vadd.f32 %v3332_v25, %v3331_v40  ;;  %3058 = vbcast.lane.b32.xlu1 %v3052_v32, 264  ;;  %1964 = vbcast.lane.b32.xlu0 %v1958_v57, 264  ;;  %v3336_v32 = vsel %vm2127_vm2, %v3151_v56, 0.0  ;;  %v4079_v57 = vld [vmem:[%s6434_s8 + $0x1e0] sm:$0xff] }
 0x741   :  { %v3153_v58 = vmul.f32 %v4079_v57, %v5490_v42  ;;  %v4081_v42 = vld [vmem:[%s6434_s8 + $0x1f0] sm:$0xff]  ;;  %v3074_v57 = vrot.slane %v5451_v60, %v4501_v49 }
 0x742   :  { %v3335_v27 = vadd.f32 %v3334_v14, %v3333_v22  ;;  %v6055_v19 = vpop.permute.xlu1 %2801  ;;  %v6057_v44 = vpop.permute.xlu0 %2860  ;;  %v3155_v56 = vmul.f32 %v4081_v42, %v5505_v1  ;;  %v3342_v14 = vsel %vm2127_vm2, %v3154_v9, 0.0  ;;  %v1980_v1 = vrot.slane %v5827_v8, %v4501_v49  ;;  %v4084_v49 = vld [vmem:[%s6434_s8 + $0x210] sm:$0xff] }
 0x743   :  { %v3340_v54 = vsel %vm2127_vm2, %v3153_v58, 0.0 }
 0x744   :  { %v3337_v15 = vadd.f32 %v3336_v32, %v3335_v27  ;;  %3065 = vbcast.lane.b32.xlu1 %v3063_v53, 256  ;;  %1971 = vbcast.lane.b32.xlu0 %v1969_v12, 256 }
 0x746   :  { %v3339_v47 = vadd.f32 %v3338_v50, %v3337_v15  ;;  %v6073_v40 = vpop.permute.xlu1 %2812  ;;  %v6075_v25 = vpop.permute.xlu0 %2871  ;;  %v3346_v15 = vsel %vm2127_vm2, %v3156_v46, 0.0 }
 0x748   :  { %v3341_v22 = vadd.f32 %v3340_v54, %v3339_v47  ;;  %3069 = vbcast.lane.b32.xlu1 %v3063_v53, 264  ;;  %1975 = vbcast.lane.b32.xlu0 %v1969_v12, 264  ;;  %v3344_v53 = vsel %vm2127_vm2, %v3155_v56, 0.0  ;;  %v4083_v12 = vld [vmem:[%s6434_s8 + $0x200] sm:$0xff]  ;;  %v3159_v54 = vmul.f32 %v4084_v49, %v5984_v59  ;;  %v1991_v59 = vrot.slane %v5827_v8, %v4504_v51 }
 0x749   :  { %v3157_v58 = vmul.f32 %v4083_v12, %v5964_v6  ;;  %v4085_v6 = vld [vmem:[%s6434_s8 + $0x208] sm:$0xff]  ;;  %v4086_v12 = vld [vmem:[%s6434_s8 + $0x220] sm:$0xff] }
 0x74a   :  { %v3343_v7 = vadd.f32 %v3342_v14, %v3341_v22  ;;  %v6087_v27 = vpop.permute.xlu1 %2823  ;;  %v6089_v32 = vpop.permute.xlu0 %2882 }
 0x74b   :  { %v3348_v47 = vsel %vm2127_vm2, %v3157_v58, 0.0 }
 0x74c   :  { %v3345_v20 = vadd.f32 %v3344_v53, %v3343_v7  ;;  %3076 = vbcast.lane.b32.xlu1 %v3074_v57, 256  ;;  %1982 = vbcast.lane.b32.xlu0 %v1980_v1, 256  ;;  %v3085_v7 = vrot.slane %v5451_v60, %v4504_v51  ;;  %v3352_v53 = vsel %vm2127_vm2, %v3159_v54, 0.0 }
 0x74e   :  { %v3347_v50 = vadd.f32 %v3346_v15, %v3345_v20  ;;  %v6101_v5 = vpop.permute.xlu1 %3010  ;;  %v2751_v9 = vpop.permute.xlu0 %2750 }
 0x74f   :  { %v3158_v42 = vmul.f32 %v4085_v6, %v2751_v9 }
 0x750   :  { %v3349_v56 = vadd.f32 %v3348_v47, %v3347_v50  ;;  %3080 = vbcast.lane.b32.xlu1 %v3074_v57, 264  ;;  %1986 = vbcast.lane.b32.xlu0 %v1980_v1, 264  ;;  %v3161_v57 = vmul.f32 %v4086_v12, %v6007_v61  ;;  %v4087_v1 = vld [vmem:[%s6434_s8 + $0x218] sm:$0xff]  ;;  %v4088_v61 = vld [vmem:[%s6434_s8 + $0x230] sm:$0xff]  ;;  %v4089_v47 = vld [vmem:[%s6434_s8 + $0x228] sm:$0xff] }
 0x751   :  { %v3350_v22 = vsel %vm2127_vm2, %v3158_v42, 0.0  ;;  %v3163_v9 = vmul.f32 %v4088_v61, %v6021_v2  ;;  %v4090_v2 = vld [vmem:[%s6434_s8 + $0x240] sm:$0xff] }
 0x752   :  { %v3351_v14 = vadd.f32 %v3350_v22, %v3349_v56  ;;  %v6112_v30 = vpop.permute.xlu1 %3014  ;;  %v2762_v46 = vpop.permute.xlu0 %2761  ;;  %v3356_v50 = vsel %vm2127_vm2, %v3161_v57, 0.0 }
 0x753   :  { %v3160_v58 = vmul.f32 %v4087_v1, %v2762_v46  ;;  %v3165_v46 = vmul.f32 %v4090_v2, %v6041_v28 }
 0x754   :  { %v3353_v20 = vadd.f32 %v3352_v53, %v3351_v14  ;;  %3087 = vbcast.lane.b32.xlu1 %v3085_v7, 256  ;;  %1993 = vbcast.lane.b32.xlu0 %v1991_v59, 256  ;;  %v3360_v14 = vsel %vm2127_vm2, %v3163_v9, 0.0  ;;  %v4091_v53 = vld [vmem:[%s6434_s8 + $0x238] sm:$0xff] }
 0x755   :  { %v3354_v60 = vsel %vm2127_vm2, %v3160_v58, 0.0 }
 0x756   :  { %v3355_v15 = vadd.f32 %v3354_v60, %v3353_v20  ;;  %v6127_v51 = vpop.permute.xlu1 %3021  ;;  %v2773_v8 = vpop.permute.xlu0 %2772  ;;  %v3364_v20 = vsel %vm2127_vm2, %v3165_v46, 0.0  ;;  %v4092_v60 = vld [vmem:[%s6434_s8 + $0x250] sm:$0xff] }
 0x757   :  { %v3162_v49 = vmul.f32 %v4089_v47, %v2773_v8  ;;  %v3167_v28 = vmul.f32 %v4092_v60, %v6055_v19 }
 0x758   :  { %v3357_v54 = vadd.f32 %v3356_v50, %v3355_v15  ;;  %3091 = vbcast.lane.b32.xlu1 %v3085_v7, 264  ;;  %1997 = vbcast.lane.b32.xlu0 %v1991_v59, 264  ;;  %v4093_v15 = vld [vmem:[%s6434_s8 + $0x248] sm:$0xff] }
 0x759   :  { %v3358_v6 = vsel %vm2127_vm2, %v3162_v49, 0.0 }
 0x75a   :  { %v3359_v42 = vadd.f32 %v3358_v6, %v3357_v54  ;;  %v6138_v56 = vpop.permute.xlu1 %3025  ;;  %v2784_v22 = vpop.permute.xlu0 %2783  ;;  %v3368_v54 = vsel %vm2127_vm2, %v3167_v28, 0.0  ;;  %v4094_v6 = vld [vmem:[%s6434_s8 + $0x260] sm:$0xff] }
 0x75b   :  { %v3164_v7 = vmul.f32 %v4091_v53, %v2784_v22  ;;  %v3169_v19 = vmul.f32 %v4094_v6, %v6073_v40  ;;  %v4096_v40 = vld [vmem:[%s6434_s8 + $0x268] sm:$0xff] }
 0x75c   :  { %v3361_v59 = vadd.f32 %v3360_v14, %v3359_v42  ;;  %v4095_v42 = vld [vmem:[%s6434_s8 + $0x258] sm:$0xff] }
 0x75d   :  { %v3362_v12 = vsel %vm2127_vm2, %v3164_v7, 0.0 }
 0x75e   :  { %v3363_v57 = vadd.f32 %v3362_v12, %v3361_v59  ;;  %v6149_v1 = vpop.permute.xlu1 %3032  ;;  %v2795_v58 = vpop.permute.xlu0 %2794  ;;  %v3372_v59 = vsel %vm2127_vm2, %v3169_v19, 0.0  ;;  %v3171_v12 = vmul.f32 %v6087_v27, %v5437_v17  ;;  %v3174_v27 = vmul.f32 %v6023_v10, %v5510_v21 }
 0x75f   :  { %v3166_v8 = vmul.f32 %v4093_v15, %v2795_v58 }
 0x760   :  { %v3365_v50 = vadd.f32 %v3364_v20, %v3363_v57 }
 0x761   :  { %v3366_v61 = vsel %vm2127_vm2, %v3166_v8, 0.0  ;;  %v3173_v8 = vmul.f32 %v5714_v0, %v5488_v37  ;;  %v3382_v0 = vsel %vm2127_vm2, %v3174_v27, 0.0 }
 0x762   :  { %v3367_v9 = vadd.f32 %v3366_v61, %v3365_v50  ;;  %v6160_v47 = vpop.permute.xlu1 %3036  ;;  %v2806_v49 = vpop.permute.xlu0 %2805  ;;  %v3376_v50 = vsel %vm2127_vm2, %v3171_v12, 0.0 }
 0x763   :  { %v3168_v22 = vmul.f32 %v4095_v42, %v2806_v49  ;;  %v3380_v19 = vsel %vm2127_vm2, %v3173_v8, 0.0  ;;  %v3175_v42 = vmul.f32 %v5740_v18, %v5528_v39  ;;  %v3178_v39 = vmul.f32 %v6057_v44, %v5600_v43  ;;  %v6532_v44 = vld [vmem:[#allocation31_spill] sm:$0xff] }
 0x764   :  { %v3369_v14 = vadd.f32 %v3368_v54, %v3367_v9  ;;  %v3181_v8 = vmul.f32 %v5803_v13, %v6532_v44 }
 0x765   :  { %v3370_v2 = vsel %vm2127_vm2, %v3168_v22, 0.0  ;;  %v3384_v10 = vsel %vm2127_vm2, %v3175_v42, 0.0 }
 0x766   :  { %v3371_v46 = vadd.f32 %v3370_v2, %v3369_v14  ;;  %v6171_v53 = vpop.permute.xlu1 %3043  ;;  %v2817_v7 = vpop.permute.xlu0 %2816  ;;  %v3177_v2 = vmul.f32 %v5762_v29, %v5574_v4 }
 0x767   :  { %v3170_v57 = vmul.f32 %v4096_v40, %v2817_v7 }
 0x768   :  { %v3373_v58 = vadd.f32 %v3372_v59, %v3371_v46 }
 0x769   :  { %v3374_v20 = vsel %vm2127_vm2, %v3170_v57, 0.0 }
 0x76a   :  { %v3375_v60 = vadd.f32 %v3374_v20, %v3373_v58  ;;  %v6180_v28 = vpop.permute.xlu1 %3047  ;;  %v2828_v15 = vpop.permute.xlu0 %2827  ;;  %v3390_v58 = vsel %vm2127_vm2, %v3178_v39, 0.0  ;;  %v6531_v20 = vld [vmem:[#allocation24_spill] sm:$0xff] }
 0x76b   :  { %v3172_v61 = vmul.f32 %v2828_v15, %v5466_v63  ;;  %v3176_v63 = vmul.f32 %v6043_v48, %v5552_v31  ;;  %v3388_v31 = vsel %vm2127_vm2, %v3177_v2, 0.0  ;;  %v6530_v48 = vld [vmem:[#allocation27_spill] sm:$0xff]  ;;  %v3180_v4 = vmul.f32 %v6075_v25, %v6531_v20 }
 0x76c   :  { %v3377_v17 = vadd.f32 %v3376_v50, %v3375_v60  ;;  %v3179_v40 = vmul.f32 %v6530_v48, %v5625_v23  ;;  %v3396_v25 = vsel %vm2127_vm2, %v3181_v8, 0.0 }
 0x76d   :  { %v3378_v9 = vsel %vm2127_vm2, %v3172_v61, 0.0  ;;  %v3386_v7 = vsel %vm2127_vm2, %v3176_v63, 0.0  ;;  %v3394_v61 = vsel %vm2127_vm2, %v3180_v4, 0.0 }
 0x76e   :  { %v3379_v49 = vadd.f32 %v3378_v9, %v3377_v17  ;;  %v2923_v54 = vpop.permute.xlu1 %2922  ;;  %v6189_v6 = vpop.permute.xlu0 %1872  ;;  %v3392_v43 = vsel %vm2127_vm2, %v3179_v40, 0.0  ;;  %v6533_v17 = vld [vmem:[#allocation25_spill] sm:$0xff] }
 0x76f   :  { %v3182_v23 = vmul.f32 %v6089_v32, %v6533_v17 }
 0x770   :  { %v3381_v37 = vadd.f32 %v3380_v19, %v3379_v49  ;;  %v6534_v19 = vld [vmem:[#allocation32_spill] sm:$0xff] }
 0x771   :  { %v3183_v42 = vmul.f32 %v5829_v33, %v6534_v19  ;;  %v3398_v13 = vsel %vm2127_vm2, %v3182_v23, 0.0 }
 0x772   :  { %v3383_v22 = vadd.f32 %v3382_v0, %v3381_v37  ;;  %v2927_v14 = vpop.permute.xlu1 %2926  ;;  %v6197_v21 = vpop.permute.xlu0 %1876  ;;  %v6535_v0 = vld [vmem:[#allocation26_spill] sm:$0xff] }
 0x773   :  { %v3184_v63 = vmul.f32 %v5848_v16, %v6535_v0  ;;  %v3400_v32 = vsel %vm2127_vm2, %v3183_v42, 0.0  ;;  %v3190_v23 = vmul.f32 %v2927_v14, %v5876_v41 }
 0x774   :  { %v3385_v46 = vadd.f32 %v3384_v10, %v3383_v22 }
 0x775   :  { %v3414_v42 = vsel %vm2127_vm2, %v3190_v23, 0.0 }
 0x776   :  { %v3387_v18 = vadd.f32 %v3386_v7, %v3385_v46  ;;  %v2934_v59 = vpop.permute.xlu1 %2933  ;;  %v6205_v12 = vpop.permute.xlu0 %1883  ;;  %v6536_v46 = vld [vmem:[#allocation33_spill] sm:$0xff] }
 0x777   :  { %v3185_v7 = vmul.f32 %v5871_v26, %v6536_v46  ;;  %v3188_v26 = vmul.f32 %v5932_v3, %v5834_v35  ;;  %v3191_v35 = vmul.f32 %v2934_v59, %v5899_v11  ;;  %v1271_v11 = vld [vmem:[%s6434_s8 + $0x340] sm:$0xff] }
 0x778   :  { %v3389_v57 = vadd.f32 %v3388_v31, %v3387_v18  ;;  %v3402_v18 = vsel %vm2127_vm2, %v3184_v63, 0.0  ;;  %v6537_v31 = vld [vmem:[#allocation6_spill] sm:$0xff] }
 0x779   :  { %v3186_v33 = vmul.f32 %v5890_v62, %v6537_v31  ;;  %v3410_v17 = vsel %vm2127_vm2, %v3188_v26, 0.0  ;;  %v1273_v31 = vld [vmem:[%s6434_s8 + $0x350] sm:$0xff] }
 0x77a   :  { %v3391_v29 = vadd.f32 %v3390_v58, %v3389_v57  ;;  %v2938_v60 = vpop.permute.xlu1 %2937  ;;  %v6213_v15 = vpop.permute.xlu0 %1887  ;;  %v3404_v57 = vsel %vm2127_vm2, %v3185_v7, 0.0  ;;  %v6538_v58 = vld [vmem:[#allocation5_spill] sm:$0xff] }
 0x77b   :  { %v3187_v20 = vmul.f32 %v5913_v34, %v6538_v58 }
 0x77c   :  { %v3393_v50 = vadd.f32 %v3392_v43, %v3391_v29  ;;  %v3406_v29 = vsel %vm2127_vm2, %v3186_v33, 0.0 }
 0x77d   :  { %v3408_v62 = vsel %vm2127_vm2, %v3187_v20, 0.0 }
 0x77e   :  { %v3395_v27 = vadd.f32 %v3394_v61, %v3393_v50  ;;  %v2945_v9 = vpop.permute.xlu1 %2944  ;;  %v6221_v49 = vpop.permute.xlu0 %1894  ;;  %v3189_v50 = vmul.f32 %v2923_v54, %v5857_v55 }
 0x77f   :  { %v3193_v41 = vmul.f32 %v2945_v9, %v5941_v45  ;;  %v1272_v45 = vld [vmem:[%s6434_s8 + $0x348] sm:$0xff] }
 0x780   :  { %v3397_v37 = vadd.f32 %v3396_v25, %v3395_v27  ;;  %v3412_v19 = vsel %vm2127_vm2, %v3189_v50, 0.0 }
 0x781   :  { %v3420_v7 = vsel %vm2127_vm2, %v3193_v41, 0.0 }
 0x782   :  { %v3399_v22 = vadd.f32 %v3398_v13, %v3397_v37  ;;  %v2949_v10 = vpop.permute.xlu1 %2948  ;;  %v6229_v2 = vpop.permute.xlu0 %1898  ;;  %v6539_v37 = vld [vmem:[#allocation8_spill] sm:$0xff]  ;;  %v3416_v13 = vsel %vm2127_vm2, %v3191_v35, 0.0 }
 0x783   :  { %v3192_v0 = vmul.f32 %v2938_v60, %v6539_v37 }
 0x784   :  { %v3401_v39 = vadd.f32 %v3400_v32, %v3399_v22  ;;  %v3194_v32 = vmul.f32 %v2949_v10, %v5954_v38 }
 0x785   :  { %v3418_v22 = vsel %vm2127_vm2, %v3192_v0, 0.0 }
 0x786   :  { %v3403_v48 = vadd.f32 %v3402_v18, %v3401_v39  ;;  %v2956_v40 = vpop.permute.xlu1 %2955  ;;  %v6237_v16 = vpop.permute.xlu0 %1905  ;;  %v2103_v18 = vmul.f32 %v6189_v6, %v1271_v11  ;;  %v3422_v38 = vsel %vm2127_vm2, %v3194_v32, 0.0  ;;  %v1274_v6 = vld [vmem:[%s6434_s8 + $0x358] sm:$0xff] }
 0x787   :  { %v3195_v39 = vmul.f32 %v2956_v40, %v5975_v52  ;;  %v2104_v52 = vmul.f32 %v6197_v21, %v1272_v45 }
 0x788   :  { %v3405_v4 = vadd.f32 %v3404_v57, %v3403_v48 }
 0x789   :  { %v3424_v40 = vsel %vm2127_vm2, %v3195_v39, 0.0  ;;  %v2337_v50 = vsel %vm2127_vm2, %v2104_v52, 0.0 }
 0x78a   :  { %v3407_v43 = vadd.f32 %v3406_v29, %v3405_v4  ;;  %v2960_v44 = vpop.permute.xlu1 %2959  ;;  %v6245_v8 = vpop.permute.xlu0 %1909  ;;  %v2105_v4 = vmul.f32 %v6205_v12, %v1273_v31 }
 0x78b   :  { %v3196_v10 = vmul.f32 %v2960_v44, %v5999_v36  ;;  %v2335_v36 = vsel %vm2127_vm2, %v2103_v18, 0.0  ;;  %v1279_v18 = vld [vmem:[%s6434_s8 + $0x380] sm:$0xff] }
 0x78c   :  { %v3409_v61 = vadd.f32 %v3408_v62, %v3407_v43  ;;  %v1275_v43 = vld [vmem:[%s6434_s8 + $0x360] sm:$0xff]  ;;  %v2336_v12 = vadd.f32 %v2335_v36, %v6029_v24 }
 0x78d   :  { %v3426_v29 = vsel %vm2127_vm2, %v3196_v10, 0.0  ;;  %v2107_v35 = vmul.f32 %v6221_v49, %v1275_v43 }
 0x78e   :  { %v3411_v34 = vadd.f32 %v3410_v17, %v3409_v61  ;;  %v2967_v27 = vpop.permute.xlu1 %2966  ;;  %v6251_v25 = vpop.permute.xlu0 %1916  ;;  %v2106_v61 = vmul.f32 %v6213_v15, %v1274_v6  ;;  %v2338_v37 = vadd.f32 %v2337_v50, %v2336_v12  ;;  %v1277_v15 = vld [vmem:[%s6434_s8 + $0x370] sm:$0xff] }
 0x78f   :  { %v3197_v58 = vmul.f32 %v2967_v27, %v1271_v11  ;;  %v2343_v11 = vsel %vm2127_vm2, %v2107_v35, 0.0 }
 0x790   :  { %v3413_v3 = vadd.f32 %v3412_v19, %v3411_v34  ;;  %v1276_v34 = vld [vmem:[%s6434_s8 + $0x368] sm:$0xff]  ;;  %v2339_v19 = vsel %vm2127_vm2, %v2105_v4, 0.0 }
 0x791   :  { %v3428_v17 = vsel %vm2127_vm2, %v3197_v58, 0.0  ;;  %v2340_v49 = vadd.f32 %v2339_v19, %v2338_v37 }
 0x792   :  { %v3415_v63 = vadd.f32 %v3414_v42, %v3413_v3  ;;  %v2971_v55 = vpop.permute.xlu1 %2970  ;;  %v6257_v54 = vpop.permute.xlu0 %1920 }
 0x793   :  { %v3198_v26 = vmul.f32 %v2971_v55, %v1272_v45  ;;  %v2341_v55 = vsel %vm2127_vm2, %v2106_v61, 0.0 }
 0x794   :  { %v3417_v14 = vadd.f32 %v3416_v13, %v3415_v63  ;;  %v2108_v13 = vmul.f32 %v6229_v2, %v1276_v34  ;;  %v2342_v39 = vadd.f32 %v2341_v55, %v2340_v49 }
 0x795   :  { %v3430_v3 = vsel %vm2127_vm2, %v3198_v26, 0.0 }
 0x796   :  { %v3419_v59 = vadd.f32 %v3418_v22, %v3417_v14  ;;  %v2978_v46 = vpop.permute.xlu1 %2977  ;;  %v6266_v60 = vpop.permute.xlu0 %1927  ;;  %v1278_v22 = vld [vmem:[%s6434_s8 + $0x378] sm:$0xff] }
 0x797   :  { %v3199_v23 = vmul.f32 %v2978_v46, %v1273_v31  ;;  %v2110_v10 = vmul.f32 %v6245_v8, %v1278_v22 }
 0x798   :  { %v3421_v9 = vadd.f32 %v3420_v7, %v3419_v59  ;;  %v2109_v59 = vmul.f32 %v6237_v16, %v1277_v15 }
 0x799   :  { %v3432_v41 = vsel %vm2127_vm2, %v3199_v23, 0.0  ;;  %v2349_v26 = vsel %vm2127_vm2, %v2110_v10, 0.0 }
 0x79a   :  { %v3423_v33 = vadd.f32 %v3422_v38, %v3421_v9  ;;  %v2982_v48 = vpop.permute.xlu1 %2981  ;;  %v6279_v57 = vpop.permute.xlu0 %1931  ;;  %v2345_v38 = vsel %vm2127_vm2, %v2108_v13, 0.0  ;;  %v2347_v52 = vsel %vm2127_vm2, %v2109_v59, 0.0 }
 0x79b   :  { %v3200_v42 = vmul.f32 %v2982_v48, %v1274_v6  ;;  %v2344_v48 = vadd.f32 %v2343_v11, %v2342_v39  ;;  %v3205_v6 = vmul.f32 %v6101_v5, %v1279_v18 }
 0x79c   :  { %v3425_v20 = vadd.f32 %v3424_v40, %v3423_v33  ;;  %v2111_v40 = vmul.f32 %v6251_v25, %v1279_v18  ;;  %v1281_v25 = vld [vmem:[%s6434_s8 + $0x390] sm:$0xff] }
 0x79d   :  { %v3434_v46 = vsel %vm2127_vm2, %v3200_v42, 0.0  ;;  %v2346_v36 = vadd.f32 %v2345_v38, %v2344_v48  ;;  %v2113_v23 = vmul.f32 %v6266_v60, %v1281_v25  ;;  %v3207_v42 = vmul.f32 %v6127_v51, %v1281_v25  ;;  %v1283_v60 = vld [vmem:[%s6434_s8 + $0x3a0] sm:$0xff]  ;;  %v1284_v51 = vld [vmem:[%s6434_s8 + $0x3a8] sm:$0xff] }
 0x79e   :  { %v3427_v21 = vadd.f32 %v3426_v29, %v3425_v20  ;;  %v2989_v44 = vpop.permute.xlu1 %2988  ;;  %v6292_v62 = vpop.permute.xlu0 %1938  ;;  %v1280_v20 = vld [vmem:[%s6434_s8 + $0x388] sm:$0xff]  ;;  %v3209_v11 = vmul.f32 %v6149_v1, %v1283_v60  ;;  %v1286_v1 = vld [vmem:[%s6434_s8 + $0x3b8] sm:$0xff] }
 0x79f   :  { %v3201_v14 = vmul.f32 %v2989_v44, %v1275_v43  ;;  %v2112_v43 = vmul.f32 %v6257_v54, %v1280_v20  ;;  %v2348_v5 = vadd.f32 %v2347_v52, %v2346_v36  ;;  %v3206_v61 = vmul.f32 %v6112_v30, %v1280_v20  ;;  %v1282_v54 = vld [vmem:[%s6434_s8 + $0x398] sm:$0xff] }
 0x7a0   :  { %v3429_v27 = vadd.f32 %v3428_v17, %v3427_v21  ;;  %v2351_v17 = vsel %vm2127_vm2, %v2111_v40, 0.0  ;;  %v2114_v37 = vmul.f32 %v6279_v57, %v1282_v54  ;;  %v3208_v55 = vmul.f32 %v6138_v56, %v1282_v54 }
 0x7a1   :  { %v3436_v31 = vsel %vm2127_vm2, %v3201_v14, 0.0  ;;  %v2353_v30 = vsel %vm2127_vm2, %v2112_v43, 0.0  ;;  %v2355_v13 = vsel %vm2127_vm2, %v2113_v23, 0.0  ;;  %v3452_v48 = vsel %vm2127_vm2, %v3209_v11, 0.0 }
 0x7a2   :  { %v3431_v0 = vadd.f32 %v3430_v3, %v3429_v27  ;;  %v2993_v63 = vpop.permute.xlu1 %2992  ;;  %v6307_v24 = vpop.permute.xlu0 %1942  ;;  %v3444_v3 = vsel %vm2127_vm2, %v3205_v6, 0.0  ;;  %v2357_v59 = vsel %vm2127_vm2, %v2114_v37, 0.0  ;;  %v3450_v39 = vsel %vm2127_vm2, %v3208_v55, 0.0 }
 0x7a3   :  { %v3202_v7 = vmul.f32 %v2993_v63, %v1276_v34  ;;  %v2350_v34 = vadd.f32 %v2349_v26, %v2348_v5  ;;  %v3446_v63 = vsel %vm2127_vm2, %v3206_v61, 0.0  ;;  %v2116_v56 = vmul.f32 %v6307_v24, %v1284_v51  ;;  %v1287_v24 = vld [vmem:[%s6434_s8 + $0x3c0] sm:$0xff] }
 0x7a4   :  { %v3433_v32 = vadd.f32 %v3432_v41, %v3431_v0  ;;  %v2115_v41 = vmul.f32 %v6292_v62, %v1283_v60  ;;  %v1285_v62 = vld [vmem:[%s6434_s8 + $0x3b0] sm:$0xff]  ;;  %v3212_v20 = vmul.f32 %v6180_v28, %v1286_v1  ;;  %v1290_v28 = vld [vmem:[%s6434_s8 + $0x3d8] sm:$0xff] }
 0x7a5   :  { %v3438_v58 = vsel %vm2127_vm2, %v3202_v7, 0.0 }
 0x7a6   :  { %v3435_v45 = vadd.f32 %v3434_v46, %v3433_v32  ;;  %v3000_v9 = vpop.permute.xlu1 %2999  ;;  %v1950_v2 = vpop.permute.xlu0 %1949  ;;  %v3448_v32 = vsel %vm2127_vm2, %v3207_v42, 0.0 }
 0x7a7   :  { %v3203_v33 = vmul.f32 %v3000_v9, %v1277_v15  ;;  %v2352_v15 = vadd.f32 %v2351_v17, %v2350_v34  ;;  %v2359_v9 = vsel %vm2127_vm2, %v2115_v41, 0.0  ;;  %v2117_v18 = vmul.f32 %v1950_v2, %v1285_v62 }
 0x7a8   :  { %v3437_v16 = vadd.f32 %v3436_v31, %v3435_v45  ;;  %v3210_v45 = vmul.f32 %v6160_v47, %v1284_v51  ;;  %v2361_v47 = vsel %vm2127_vm2, %v2116_v56, 0.0  ;;  %v3458_v17 = vsel %vm2127_vm2, %v3212_v20, 0.0 }
 0x7a9   :  { %v3440_v21 = vsel %vm2127_vm2, %v3203_v33, 0.0  ;;  %v2354_v14 = vadd.f32 %v2353_v30, %v2352_v15  ;;  %v2363_v36 = vsel %vm2127_vm2, %v2117_v18, 0.0 }
 0x7aa   :  { %v3439_v4 = vadd.f32 %v3438_v58, %v3437_v16  ;;  %v3004_v8 = vpop.permute.xlu1 %3003  ;;  %v1954_v29 = vpop.permute.xlu0 %1953  ;;  %v3211_v16 = vmul.f32 %v6171_v53, %v1285_v62  ;;  %v1288_v58 = vld [vmem:[%s6434_s8 + $0x3c8] sm:$0xff]  ;;  %v3454_v6 = vsel %vm2127_vm2, %v3210_v45, 0.0  ;;  %v1289_v53 = vld [vmem:[%s6434_s8 + $0x3d0] sm:$0xff] }
 0x7ab   :  { %v3204_v44 = vmul.f32 %v3004_v8, %v1278_v22  ;;  %v2356_v46 = vadd.f32 %v2355_v13, %v2354_v14  ;;  %v2118_v52 = vmul.f32 %v1954_v29, %v1286_v1 }
 0x7ac   :  { %v3441_v50 = vadd.f32 %v3440_v21, %v3439_v4  ;;  %v3456_v21 = vsel %vm2127_vm2, %v3211_v16, 0.0 }
 0x7ad   :  { %v3442_v12 = vsel %vm2127_vm2, %v3204_v44, 0.0  ;;  %v2358_v38 = vadd.f32 %v2357_v59, %v2356_v46  ;;  %v2365_v44 = vsel %vm2127_vm2, %v2118_v52, 0.0  ;;  %v1294_v52 = vld [vmem:[%s6434_s8 + $0x3f8] sm:$0xff] }
 0x7ae   :  { %v3443_v27 = vadd.f32 %v3442_v12, %v3441_v50  ;;  %v3055_v19 = vpop.permute.xlu1 %3054  ;;  %v1961_v35 = vpop.permute.xlu0 %1960 }
 0x7af   :  { %v2360_v2 = vadd.f32 %v2359_v9, %v2358_v38  ;;  %v2119_v4 = vmul.f32 %v1961_v35, %v1287_v24  ;;  %v3213_v25 = vmul.f32 %v3055_v19, %v1287_v24  ;;  %v1291_v35 = vld [vmem:[%s6434_s8 + $0x3e0] sm:$0xff] }
 0x7b0   :  { %v3445_v0 = vadd.f32 %v3444_v3, %v3443_v27 }
 0x7b1   :  { %v2362_v8 = vadd.f32 %v2361_v47, %v2360_v2  ;;  %v2367_v23 = vsel %vm2127_vm2, %v2119_v4, 0.0  ;;  %v3460_v42 = vsel %vm2127_vm2, %v3213_v25, 0.0 }
 0x7b2   :  { %v3447_v57 = vadd.f32 %v3446_v63, %v3445_v0  ;;  %v3059_v49 = vpop.permute.xlu1 %3058  ;;  %v1965_v22 = vpop.permute.xlu0 %1964  ;;  %v1292_v63 = vld [vmem:[%s6434_s8 + $0x3e8] sm:$0xff] }
 0x7b3   :  { %v2120_v5 = vmul.f32 %v1965_v22, %v1288_v58  ;;  %v2364_v50 = vadd.f32 %v2363_v36, %v2362_v8  ;;  %v3214_v12 = vmul.f32 %v3059_v49, %v1288_v58 }
 0x7b4   :  { %v3449_v7 = vadd.f32 %v3448_v32, %v3447_v57 }
 0x7b5   :  { %v2366_v34 = vadd.f32 %v2365_v44, %v2364_v50  ;;  %v2369_v30 = vsel %vm2127_vm2, %v2120_v5, 0.0  ;;  %v3462_v55 = vsel %vm2127_vm2, %v3214_v12, 0.0 }
 0x7b6   :  { %v3451_v10 = vadd.f32 %v3450_v39, %v3449_v7  ;;  %v3066_v31 = vpop.permute.xlu1 %3065  ;;  %v1972_v33 = vpop.permute.xlu0 %1971  ;;  %v1293_v7 = vld [vmem:[%s6434_s8 + $0x3f0] sm:$0xff] }
 0x7b7   :  { %v2121_v54 = vmul.f32 %v1972_v33, %v1289_v53  ;;  %v3215_v37 = vmul.f32 %v3066_v31, %v1289_v53  ;;  %v2368_v0 = vadd.f32 %v2367_v23, %v2366_v34 }
 0x7b8   :  { %v3453_v40 = vadd.f32 %v3452_v48, %v3451_v10 }
 0x7b9   :  { %v2371_v13 = vsel %vm2127_vm2, %v2121_v54, 0.0  ;;  %v2370_v57 = vadd.f32 %v2369_v30, %v2368_v0  ;;  %v3464_v32 = vsel %vm2127_vm2, %v3215_v37, 0.0 }
 0x7ba   :  { %v3455_v26 = vadd.f32 %v3454_v6, %v3453_v40  ;;  %v3070_v29 = vpop.permute.xlu1 %3069  ;;  %v1976_v43 = vpop.permute.xlu0 %1975 }
 0x7bb   :  { %v2122_v60 = vmul.f32 %v1976_v43, %v1290_v28  ;;  %v3216_v41 = vmul.f32 %v3070_v29, %v1290_v28  ;;  %v2372_v46 = vadd.f32 %v2371_v13, %v2370_v57 }
 0x7bc   :  { %v3457_v61 = vadd.f32 %v3456_v21, %v3455_v26 }
 0x7bd   :  { %v2373_v11 = vsel %vm2127_vm2, %v2122_v60, 0.0  ;;  %v3466_v39 = vsel %vm2127_vm2, %v3216_v41, 0.0 }
 0x7be   :  { %v3459_v27 = vadd.f32 %v3458_v17, %v3457_v61  ;;  %v3077_v19 = vpop.permute.xlu1 %3076  ;;  %v1983_v3 = vpop.permute.xlu0 %1982  ;;  %v2374_v1 = vadd.f32 %v2373_v11, %v2372_v46 }
 0x7bf   :  { %v2123_v51 = vmul.f32 %v1983_v3, %v1291_v35  ;;  %v3217_v59 = vmul.f32 %v3077_v19, %v1291_v35  ;;  %v3559_v3 = vld [vmem:[%s6435_s9] ss:$0 sm:$0xff] }
 0x7c0   :  { %v3461_v15 = vadd.f32 %v3460_v42, %v3459_v27 }
 0x7c1   :  { %v2375_v45 = vsel %vm2127_vm2, %v2123_v51, 0.0  ;;  %v3468_v24 = vsel %vm2127_vm2, %v3217_v59, 0.0 }
 0x7c2   :  { %v3463_v14 = vadd.f32 %v3462_v55, %v3461_v15  ;;  %v3081_v49 = vpop.permute.xlu1 %3080  ;;  %v1987_v22 = vpop.permute.xlu0 %1986  ;;  %v2376_v47 = vadd.f32 %v2375_v45, %v2374_v1 }
 0x7c3   :  { %v2124_v56 = vmul.f32 %v1987_v22, %v1292_v63  ;;  %v3218_v9 = vmul.f32 %v3081_v49, %v1292_v63 }
 0x7c4   :  { %v3465_v62 = vadd.f32 %v3464_v32, %v3463_v14 }
 0x7c5   :  { %v2377_v31 = vsel %vm2127_vm2, %v2124_v56, 0.0  ;;  %v3470_v2 = vsel %vm2127_vm2, %v3218_v9, 0.0 }
 0x7c6   :  { %v3467_v18 = vadd.f32 %v3466_v39, %v3465_v62  ;;  %v3088_v38 = vpop.permute.xlu1 %3087  ;;  %v1994_v10 = vpop.permute.xlu0 %1993  ;;  %v2378_v6 = vadd.f32 %v2377_v31, %v2376_v47 }
 0x7c7   :  { %v3219_v33 = vmul.f32 %v3088_v38, %v1293_v7  ;;  %v2125_v48 = vmul.f32 %v1994_v10, %v1293_v7 }
 0x7c8   :  { %v3469_v16 = vadd.f32 %v3468_v24, %v3467_v18 }
 0x7c9   :  { %v2379_v40 = vsel %vm2127_vm2, %v2125_v48, 0.0  ;;  %v3472_v4 = vsel %vm2127_vm2, %v3219_v33, 0.0 }
 0x7ca   :  { %v3471_v58 = vadd.f32 %v3470_v2, %v3469_v16  ;;  %v3092_v20 = vpop.permute.xlu1 %3091  ;;  %v1998_v36 = vpop.permute.xlu0 %1997  ;;  %v2380_v29 = vadd.f32 %v2379_v40, %v2378_v6 }
 0x7cb   :  { %v3220_v8 = vmul.f32 %v3092_v20, %v1294_v52  ;;  %v2126_v26 = vmul.f32 %v1998_v36, %v1294_v52 }
 0x7cc   :  { %v3473_v53 = vadd.f32 %v3472_v4, %v3471_v58 }
 0x7cd   :  { %v3474_v43 = vsel %vm2127_vm2, %v3220_v8, 0.0  ;;  %v2381_v21 = vsel %vm2127_vm2, %v2126_v26, 0.0 }
 0x7ce   :  { %v3475_v44 = vadd.f32 %v3474_v43, %v3473_v53  ;;  %v2382_v25 = vadd.f32 %v2381_v21, %v2380_v29 }
 0x7d0   :  { %v3476_v5 = vrot.slane %v3475_v44, 4  ;;  %v2383_v50 = vrot.slane %v2382_v25, 4 }
 0x7d2   :  { %v3477_v61 = vadd.f32 %v3476_v5, %v3475_v44  ;;  %v2384_v28 = vadd.f32 %v2383_v50, %v2382_v25 }
 0x7d4   :  { %v3478_v17 = vrot.slane %v3477_v61, 2  ;;  %v2385_v23 = vrot.slane %v2384_v28, 2 }
 0x7d6   :  { %v3479_v12 = vadd.f32 %v3478_v17, %v3477_v61  ;;  %v2386_v54 = vadd.f32 %v2385_v23, %v2384_v28 }
 0x7d8   :  { %v3480_v34 = vrot.slane %v3479_v12, 1  ;;  %v2387_v27 = vrot.slane %v2386_v54, 1 }
 0x7da   :  { %v2388_v35 = vadd.f32 %v2387_v27, %v2386_v54  ;;  %v3481_v19 = vadd.f32 %v3480_v34, %v3479_v12 }
 0x7dc   :  { %v3483_v42 = vsel %vm3482_vm3, %v2388_v35, %v3481_v19 }
 0x7dd   :  { %v3491_v30 = vadd.f32 %v3559_v3, %v3483_v42 }
 0x7df   :  { %3493 = vst.msk [vmem:[#allocation2] sm:$0x3] %vm3492_vm4, %v3491_v30 }
 0x7e0   :  { %4108 = shalt.err (!%p4105_p4)
}
 0x7e1   :  { %3503 = dma.vmem_to_hbm [thread:$0]  %s3501_s14, 32, %s6436_s10, [#allocation3]  }
 0x7e2   :  { %4117 = dma.done.wait [#allocation3], 32  }
 0x7e3   :  { %4118 = vsyncadd [#allocation3], 4294967264 }
 0x7e4   :  { %3507 = vsyncpa [#allocation3], 1 }

</bundles_post_ra>
